<compile_context>
chip_gen: v6e
topology: v6e:2x2x1
jax: 0.10.0
libtpu: 0.0.40
codegen_flags: <defaults>
</compile_context>

<pallas_src>
import functools
import math

import jax
import jax.numpy as jnp
from jax.experimental import pallas as pl
from jax.experimental.pallas import tpu as pltpu


def _round_up(x, m):
    return (x + m - 1) // m * m


def _cdiv(a, b):
    return -(-a // b)


def _make_kernel(K, Wp, C_in, Kc, Kc_pad, Mt):
    """Kernel closure over all static shape constants.

    w_ref: (C_out, Kc_pad)      bf16  combined weights (+ bias column at Kc)
    x_ref: (1, 1, C_in, Win)    bf16  padded, flattened image window
    o_ref: (1, C_out, Mt)       f32   output tile (NCHW, flattened padded W-stride)
    p_ref: (Kc_pad, Mt)         bf16  VMEM scratch holding the im2col patches
    """

    def kernel(w_ref, x_ref, o_ref, p_ref):
        # ---- in-VMEM im2col: K*K static shifted lane-slices of the window ----
        for kh in range(K):
            for kw in range(K):
                tap = kh * K + kw
                off = kh * Wp + kw               # static lane offset of this tap
                p_ref[tap * C_in:(tap + 1) * C_in, :] = (
                    x_ref[0, 0, :, off:off + Mt])
        # ---- bias row (=1.0) and zero padding rows of the contraction ----
        pad_rows = Kc_pad - Kc
        row = jax.lax.broadcasted_iota(jnp.int32, (pad_rows, Mt), 0)
        p_ref[Kc:Kc_pad, :] = (row == 0).astype(p_ref.dtype)
        # ---- single deep MXU matmul, f32 accumulation, lane-dense output ----
        o_ref[0] = jnp.dot(w_ref[...], p_ref[...],
                           preferred_element_type=jnp.float32)

    return kernel


def inception_block_v1(x_nchw, weights, biases, num_kernels):
    """weights[i]: (C_out, C_in, 2i+1, 2i+1) (PyTorch OIHW); biases[i]: (C_out,)."""
    N, C_in, H, W = x_nchw.shape
    C_out = weights[0].shape[0]
    K = 2 * num_kernels - 1            # largest kernel size
    P = num_kernels - 1                # its "same" padding
    Hp, Wp = H + 2 * P, W + 2 * P

    # ---- fuse the num_kernels branches into one KxK conv (exact algebra) ----
    w_comb = jnp.zeros((K, K, C_in, C_out), jnp.float32)
    for i in range(num_kernels):
        k = 2 * i + 1
        pad = (K - k) // 2
        w_hwio = jnp.transpose(weights[i], (2, 3, 1, 0))      # (k, k, C_in, C_out)
        w_comb = w_comb.at[pad:pad + k, pad:pad + k].add(w_hwio)
    w_comb = w_comb / num_kernels
    b_comb = jnp.stack(biases, 0).mean(0)                     # (C_out,)

    # Contraction index ordering: r = (kh*K + kw)*C_in + c ; bias folded at r=Kc.
    Kc = K * K * C_in
    Kc_pad = _round_up(Kc + 1, 128)
    w_mat = jnp.transpose(w_comb, (3, 0, 1, 2)).reshape(C_out, Kc)
    w_mat = jnp.concatenate(
        [w_mat, b_comb.reshape(C_out, 1),
         jnp.zeros((C_out, Kc_pad - Kc - 1), jnp.float32)], axis=1)
    w_mat = w_mat.astype(jnp.bfloat16)

    # ---- pad spatially ONCE and flatten the padded image (no im2col in HBM) ----
    x_pad = jnp.pad(x_nchw.astype(jnp.bfloat16),
                    ((0, 0), (0, 0), (P, P), (P, P)))
    x_flat = x_pad.reshape(N, C_in, Hp * Wp)

    # Output "base positions" b = h*Wp + w live on the padded row stride Wp.
    # Compute all H*Wp of them (the junk padded columns are sliced off after).
    M_base = H * Wp
    max_off = (K - 1) * Wp + (K - 1)          # largest tap offset

    # Balanced lane tiles; cap so the (Kc_pad, Mt) bf16 scratch stays <= 4 MiB.
    cap = max(128, min(1024, (4 * 1024 * 1024) // (Kc_pad * 2)))
    T = _cdiv(M_base, cap)
    Mt = _round_up(_cdiv(M_base, T), 128)
    M_pad = T * Mt
    Win = _round_up(Mt + max_off, 128)        # per-tile input window (lanes)

    L_need = (T - 1) * Mt + Win
    x_flat = jnp.pad(x_flat, ((0, 0), (0, 0), (0, L_need - Hp * Wp)))
    if T == 1:
        windows = x_flat.reshape(N, 1, C_in, Win)             # pure view, no copy
    else:
        windows = jnp.stack(
            [x_flat[:, :, t * Mt:t * Mt + Win] for t in range(T)], axis=1)

    kernel = _make_kernel(K, Wp, C_in, Kc, Kc_pad, Mt)

    flops = 2 * N * T * C_out * Kc_pad * Mt
    bytes_accessed = (windows.size * 2 + w_mat.size * 2 + N * C_out * M_pad * 4)

    out_flat = pl.pallas_call(
        kernel,
        out_shape=jax.ShapeDtypeStruct((N, C_out, M_pad), jnp.float32),
        grid=(N, T),
        in_specs=[
            pl.BlockSpec((C_out, Kc_pad), lambda n, t: (0, 0)),   # weights resident
            pl.BlockSpec((1, 1, C_in, Win), lambda n, t: (n, t, 0, 0)),
        ],
        out_specs=pl.BlockSpec((1, C_out, Mt), lambda n, t: (n, 0, t)),
        scratch_shapes=[pltpu.VMEM((Kc_pad, Mt), jnp.bfloat16)],
        compiler_params=pltpu.CompilerParams(
            dimension_semantics=("parallel", "parallel")),
        cost_estimate=pl.CostEstimate(
            flops=flops, transcendentals=0, bytes_accessed=bytes_accessed),
    )(w_mat, windows)

    # base position b = h*Wp + w  ->  keep rows h < H, columns w < W.
    out = out_flat[:, :, :H * Wp].reshape(N, C_out, H, Wp)[:, :, :, :W]
    return out


def _reference(x_nchw, weights, biases, num_kernels):
    """Pure-JAX reference matching the PyTorch forward (stack + mean)."""
    outs = []
    for i in range(num_kernels):
        o = jax.lax.conv_general_dilated(
            x_nchw, weights[i], window_strides=(1, 1),
            padding=[(i, i), (i, i)],
            dimension_numbers=("NCHW", "OIHW", "NCHW"))
        outs.append(o + biases[i][None, :, None, None])
    return jnp.stack(outs, -1).mean(-1)


if __name__ == "__main__":
    key = jax.random.PRNGKey(0)
    N, C_in, H, W = 2, 4, 16, 16
    C_out = 8
    num_kernels = 6

    key, kx = jax.random.split(key)
    x = jax.random.normal(kx, (N, C_in, H, W), dtype=jnp.float32)

    # Deterministic Kaiming-normal (fan_out, relu) init, bias = 0 (as in __init__).
    weights, biases = [], []
    for i in range(num_kernels):
        k = 2 * i + 1
        key, kw = jax.random.split(key)
        fan_out = C_out * k * k
        std = math.sqrt(2.0 / fan_out)
        weights.append(jax.random.normal(kw, (C_out, C_in, k, k), jnp.float32) * std)
        biases.append(jnp.zeros((C_out,), jnp.float32))

    run = jax.jit(functools.partial(inception_block_v1, num_kernels=num_kernels))
    out = jax.block_until_ready(run(x, weights, biases))

    ref = _reference(x, weights, biases, num_kernels)
    assert out.shape == (N, C_out, H, W), out.shape
    assert bool(jnp.all(jnp.isfinite(out)))
    assert bool(jnp.allclose(out, ref, rtol=2e-2, atol=2e-2)), \
        float(jnp.max(jnp.abs(out - ref)))

    print("KERNEL_OK")
</pallas_src>

<mosaic_0001>
module attributes {stable_mosaic.version = 11 : i64} {
  func.func @kernel(%arg0: i32, %arg1: i32, %arg2: memref<8x512xbf16, #tpu.memory_space<vmem>>, %arg3: memref<1x1x4x896xbf16, #tpu.memory_space<vmem>>, %arg4: memref<1x8x512xf32, #tpu.memory_space<vmem>>, %arg5: memref<512x512xbf16, #tpu.memory_space<vmem>>) attributes {dimension_semantics = [#tpu.dimension_semantics<parallel>, #tpu.dimension_semantics<parallel>], iteration_bounds = array<i64: 2, 1>, scalar_prefetch = 0 : i64, scratch_operands = 1 : i64, tpu.core_type = #tpu.core_type<tc>, window_params = [{pipeline_mode = #tpu.pipeline_mode<synchronous>, transform_indices = @transform_0, window_bounds = array<i64: 8, 512>}, {transform_indices = @transform_1, window_bounds = array<i64: 1, 1, 4, 896>}, {transform_indices = @transform_2, window_bounds = array<i64: 1, 8, 512>}]} {
    %c0 = arith.constant 0 : index
    %c0_0 = arith.constant 0 : index
    %c0_1 = arith.constant 0 : index
    %c0_2 = arith.constant 0 : index
    %0 = vector.load %arg3[%c0, %c0_0, %c0_1, %c0_2] : memref<1x1x4x896xbf16, #tpu.memory_space<vmem>>, vector<1x1x4x512xbf16>
    %1 = vector.shape_cast %0 : vector<1x1x4x512xbf16> to vector<4x512xbf16>
    %c0_3 = arith.constant 0 : index
    %c0_4 = arith.constant 0 : index
    %2 = vector.load %arg5[%c0_3, %c0_4] : memref<512x512xbf16, #tpu.memory_space<vmem>>, vector<4x512xbf16>
    tpu.vector_store %arg5[%c0_3, %c0_4], %1 {strides = array<i32>} : memref<512x512xbf16, #tpu.memory_space<vmem>>, vector<4x512xbf16>,
    %c0_5 = arith.constant 0 : index
    %c0_6 = arith.constant 0 : index
    %c0_7 = arith.constant 0 : index
    %c1 = arith.constant 1 : index
    %3 = vector.load %arg3[%c0_5, %c0_6, %c0_7, %c1] : memref<1x1x4x896xbf16, #tpu.memory_space<vmem>>, vector<1x1x4x512xbf16>
    %4 = vector.shape_cast %3 : vector<1x1x4x512xbf16> to vector<4x512xbf16>
    %c4 = arith.constant 4 : index
    %c0_8 = arith.constant 0 : index
    %5 = vector.load %arg5[%c4, %c0_8] : memref<512x512xbf16, #tpu.memory_space<vmem>>, vector<4x512xbf16>
    tpu.vector_store %arg5[%c4, %c0_8], %4 {strides = array<i32>} : memref<512x512xbf16, #tpu.memory_space<vmem>>, vector<4x512xbf16>,
    %c0_9 = arith.constant 0 : index
    %c0_10 = arith.constant 0 : index
    %c0_11 = arith.constant 0 : index
    %c2 = arith.constant 2 : index
    %6 = vector.load %arg3[%c0_9, %c0_10, %c0_11, %c2] : memref<1x1x4x896xbf16, #tpu.memory_space<vmem>>, vector<1x1x4x512xbf16>
    %7 = vector.shape_cast %6 : vector<1x1x4x512xbf16> to vector<4x512xbf16>
    %c8 = arith.constant 8 : index
    %c0_12 = arith.constant 0 : index
    %8 = vector.load %arg5[%c8, %c0_12] : memref<512x512xbf16, #tpu.memory_space<vmem>>, vector<4x512xbf16>
    tpu.vector_store %arg5[%c8, %c0_12], %7 {strides = array<i32>} : memref<512x512xbf16, #tpu.memory_space<vmem>>, vector<4x512xbf16>,
    %c0_13 = arith.constant 0 : index
    %c0_14 = arith.constant 0 : index
    %c0_15 = arith.constant 0 : index
    %c3 = arith.constant 3 : index
    %9 = vector.load %arg3[%c0_13, %c0_14, %c0_15, %c3] : memref<1x1x4x896xbf16, #tpu.memory_space<vmem>>, vector<1x1x4x512xbf16>
    %10 = vector.shape_cast %9 : vector<1x1x4x512xbf16> to vector<4x512xbf16>
    %c12 = arith.constant 12 : index
    %c0_16 = arith.constant 0 : index
    %11 = vector.load %arg5[%c12, %c0_16] : memref<512x512xbf16, #tpu.memory_space<vmem>>, vector<4x512xbf16>
    tpu.vector_store %arg5[%c12, %c0_16], %10 {strides = array<i32>} : memref<512x512xbf16, #tpu.memory_space<vmem>>, vector<4x512xbf16>,
    %c0_17 = arith.constant 0 : index
    %c0_18 = arith.constant 0 : index
    %c0_19 = arith.constant 0 : index
    %c4_20 = arith.constant 4 : index
    %12 = vector.load %arg3[%c0_17, %c0_18, %c0_19, %c4_20] : memref<1x1x4x896xbf16, #tpu.memory_space<vmem>>, vector<1x1x4x512xbf16>
    %13 = vector.shape_cast %12 : vector<1x1x4x512xbf16> to vector<4x512xbf16>
    %c16 = arith.constant 16 : index
    %c0_21 = arith.constant 0 : index
    %14 = vector.load %arg5[%c16, %c0_21] : memref<512x512xbf16, #tpu.memory_space<vmem>>, vector<4x512xbf16>
    tpu.vector_store %arg5[%c16, %c0_21], %13 {strides = array<i32>} : memref<512x512xbf16, #tpu.memory_space<vmem>>, vector<4x512xbf16>,
    %c0_22 = arith.constant 0 : index
    %c0_23 = arith.constant 0 : index
    %c0_24 = arith.constant 0 : index
    %c5 = arith.constant 5 : index
    %15 = vector.load %arg3[%c0_22, %c0_23, %c0_24, %c5] : memref<1x1x4x896xbf16, #tpu.memory_space<vmem>>, vector<1x1x4x512xbf16>
    %16 = vector.shape_cast %15 : vector<1x1x4x512xbf16> to vector<4x512xbf16>
    %c20 = arith.constant 20 : index
    %c0_25 = arith.constant 0 : index
    %17 = vector.load %arg5[%c20, %c0_25] : memref<512x512xbf16, #tpu.memory_space<vmem>>, vector<4x512xbf16>
    tpu.vector_store %arg5[%c20, %c0_25], %16 {strides = array<i32>} : memref<512x512xbf16, #tpu.memory_space<vmem>>, vector<4x512xbf16>,
    %c0_26 = arith.constant 0 : index
    %c0_27 = arith.constant 0 : index
    %c0_28 = arith.constant 0 : index
    %c6 = arith.constant 6 : index
    %18 = vector.load %arg3[%c0_26, %c0_27, %c0_28, %c6] : memref<1x1x4x896xbf16, #tpu.memory_space<vmem>>, vector<1x1x4x512xbf16>
    %19 = vector.shape_cast %18 : vector<1x1x4x512xbf16> to vector<4x512xbf16>
    %c24 = arith.constant 24 : index
    %c0_29 = arith.constant 0 : index
    %20 = vector.load %arg5[%c24, %c0_29] : memref<512x512xbf16, #tpu.memory_space<vmem>>, vector<4x512xbf16>
    tpu.vector_store %arg5[%c24, %c0_29], %19 {strides = array<i32>} : memref<512x512xbf16, #tpu.memory_space<vmem>>, vector<4x512xbf16>,
    %c0_30 = arith.constant 0 : index
    %c0_31 = arith.constant 0 : index
    %c0_32 = arith.constant 0 : index
    %c7 = arith.constant 7 : index
    %21 = vector.load %arg3[%c0_30, %c0_31, %c0_32, %c7] : memref<1x1x4x896xbf16, #tpu.memory_space<vmem>>, vector<1x1x4x512xbf16>
    %22 = vector.shape_cast %21 : vector<1x1x4x512xbf16> to vector<4x512xbf16>
    %c28 = arith.constant 28 : index
    %c0_33 = arith.constant 0 : index
    %23 = vector.load %arg5[%c28, %c0_33] : memref<512x512xbf16, #tpu.memory_space<vmem>>, vector<4x512xbf16>
    tpu.vector_store %arg5[%c28, %c0_33], %22 {strides = array<i32>} : memref<512x512xbf16, #tpu.memory_space<vmem>>, vector<4x512xbf16>,
    %c0_34 = arith.constant 0 : index
    %c0_35 = arith.constant 0 : index
    %c0_36 = arith.constant 0 : index
    %c8_37 = arith.constant 8 : index
    %24 = vector.load %arg3[%c0_34, %c0_35, %c0_36, %c8_37] : memref<1x1x4x896xbf16, #tpu.memory_space<vmem>>, vector<1x1x4x512xbf16>
    %25 = vector.shape_cast %24 : vector<1x1x4x512xbf16> to vector<4x512xbf16>
    %c32 = arith.constant 32 : index
    %c0_38 = arith.constant 0 : index
    %26 = vector.load %arg5[%c32, %c0_38] : memref<512x512xbf16, #tpu.memory_space<vmem>>, vector<4x512xbf16>
    tpu.vector_store %arg5[%c32, %c0_38], %25 {strides = array<i32>} : memref<512x512xbf16, #tpu.memory_space<vmem>>, vector<4x512xbf16>,
    %c0_39 = arith.constant 0 : index
    %c0_40 = arith.constant 0 : index
    %c0_41 = arith.constant 0 : index
    %c9 = arith.constant 9 : index
    %27 = vector.load %arg3[%c0_39, %c0_40, %c0_41, %c9] : memref<1x1x4x896xbf16, #tpu.memory_space<vmem>>, vector<1x1x4x512xbf16>
    %28 = vector.shape_cast %27 : vector<1x1x4x512xbf16> to vector<4x512xbf16>
    %c36 = arith.constant 36 : index
    %c0_42 = arith.constant 0 : index
    %29 = vector.load %arg5[%c36, %c0_42] : memref<512x512xbf16, #tpu.memory_space<vmem>>, vector<4x512xbf16>
    tpu.vector_store %arg5[%c36, %c0_42], %28 {strides = array<i32>} : memref<512x512xbf16, #tpu.memory_space<vmem>>, vector<4x512xbf16>,
    %c0_43 = arith.constant 0 : index
    %c0_44 = arith.constant 0 : index
    %c0_45 = arith.constant 0 : index
    %c10 = arith.constant 10 : index
    %30 = vector.load %arg3[%c0_43, %c0_44, %c0_45, %c10] : memref<1x1x4x896xbf16, #tpu.memory_space<vmem>>, vector<1x1x4x512xbf16>
    %31 = vector.shape_cast %30 : vector<1x1x4x512xbf16> to vector<4x512xbf16>
    %c40 = arith.constant 40 : index
    %c0_46 = arith.constant 0 : index
    %32 = vector.load %arg5[%c40, %c0_46] : memref<512x512xbf16, #tpu.memory_space<vmem>>, vector<4x512xbf16>
    tpu.vector_store %arg5[%c40, %c0_46], %31 {strides = array<i32>} : memref<512x512xbf16, #tpu.memory_space<vmem>>, vector<4x512xbf16>,
    %c0_47 = arith.constant 0 : index
    %c0_48 = arith.constant 0 : index
    %c0_49 = arith.constant 0 : index
    %c26 = arith.constant 26 : index
    %33 = vector.load %arg3[%c0_47, %c0_48, %c0_49, %c26] : memref<1x1x4x896xbf16, #tpu.memory_space<vmem>>, vector<1x1x4x512xbf16>
    %34 = vector.shape_cast %33 : vector<1x1x4x512xbf16> to vector<4x512xbf16>
    %c44 = arith.constant 44 : index
    %c0_50 = arith.constant 0 : index
    %35 = vector.load %arg5[%c44, %c0_50] : memref<512x512xbf16, #tpu.memory_space<vmem>>, vector<4x512xbf16>
    tpu.vector_store %arg5[%c44, %c0_50], %34 {strides = array<i32>} : memref<512x512xbf16, #tpu.memory_space<vmem>>, vector<4x512xbf16>,
    %c0_51 = arith.constant 0 : index
    %c0_52 = arith.constant 0 : index
    %c0_53 = arith.constant 0 : index
    %c27 = arith.constant 27 : index
    %36 = vector.load %arg3[%c0_51, %c0_52, %c0_53, %c27] : memref<1x1x4x896xbf16, #tpu.memory_space<vmem>>, vector<1x1x4x512xbf16>
    %37 = vector.shape_cast %36 : vector<1x1x4x512xbf16> to vector<4x512xbf16>
    %c48 = arith.constant 48 : index
    %c0_54 = arith.constant 0 : index
    %38 = vector.load %arg5[%c48, %c0_54] : memref<512x512xbf16, #tpu.memory_space<vmem>>, vector<4x512xbf16>
    tpu.vector_store %arg5[%c48, %c0_54], %37 {strides = array<i32>} : memref<512x512xbf16, #tpu.memory_space<vmem>>, vector<4x512xbf16>,
    %c0_55 = arith.constant 0 : index
    %c0_56 = arith.constant 0 : index
    %c0_57 = arith.constant 0 : index
    %c28_58 = arith.constant 28 : index
    %39 = vector.load %arg3[%c0_55, %c0_56, %c0_57, %c28_58] : memref<1x1x4x896xbf16, #tpu.memory_space<vmem>>, vector<1x1x4x512xbf16>
    %40 = vector.shape_cast %39 : vector<1x1x4x512xbf16> to vector<4x512xbf16>
    %c52 = arith.constant 52 : index
    %c0_59 = arith.constant 0 : index
    %41 = vector.load %arg5[%c52, %c0_59] : memref<512x512xbf16, #tpu.memory_space<vmem>>, vector<4x512xbf16>
    tpu.vector_store %arg5[%c52, %c0_59], %40 {strides = array<i32>} : memref<512x512xbf16, #tpu.memory_space<vmem>>, vector<4x512xbf16>,
    %c0_60 = arith.constant 0 : index
    %c0_61 = arith.constant 0 : index
    %c0_62 = arith.constant 0 : index
    %c29 = arith.constant 29 : index
    %42 = vector.load %arg3[%c0_60, %c0_61, %c0_62, %c29] : memref<1x1x4x896xbf16, #tpu.memory_space<vmem>>, vector<1x1x4x512xbf16>
    %43 = vector.shape_cast %42 : vector<1x1x4x512xbf16> to vector<4x512xbf16>
    %c56 = arith.constant 56 : index
    %c0_63 = arith.constant 0 : index
    %44 = vector.load %arg5[%c56, %c0_63] : memref<512x512xbf16, #tpu.memory_space<vmem>>, vector<4x512xbf16>
    tpu.vector_store %arg5[%c56, %c0_63], %43 {strides = array<i32>} : memref<512x512xbf16, #tpu.memory_space<vmem>>, vector<4x512xbf16>,
    %c0_64 = arith.constant 0 : index
    %c0_65 = arith.constant 0 : index
    %c0_66 = arith.constant 0 : index
    %c30 = arith.constant 30 : index
    %45 = vector.load %arg3[%c0_64, %c0_65, %c0_66, %c30] : memref<1x1x4x896xbf16, #tpu.memory_space<vmem>>, vector<1x1x4x512xbf16>
    %46 = vector.shape_cast %45 : vector<1x1x4x512xbf16> to vector<4x512xbf16>
    %c60 = arith.constant 60 : index
    %c0_67 = arith.constant 0 : index
    %47 = vector.load %arg5[%c60, %c0_67] : memref<512x512xbf16, #tpu.memory_space<vmem>>, vector<4x512xbf16>
    tpu.vector_store %arg5[%c60, %c0_67], %46 {strides = array<i32>} : memref<512x512xbf16, #tpu.memory_space<vmem>>, vector<4x512xbf16>,
    %c0_68 = arith.constant 0 : index
    %c0_69 = arith.constant 0 : index
    %c0_70 = arith.constant 0 : index
    %c31 = arith.constant 31 : index
    %48 = vector.load %arg3[%c0_68, %c0_69, %c0_70, %c31] : memref<1x1x4x896xbf16, #tpu.memory_space<vmem>>, vector<1x1x4x512xbf16>
    %49 = vector.shape_cast %48 : vector<1x1x4x512xbf16> to vector<4x512xbf16>
    %c64 = arith.constant 64 : index
    %c0_71 = arith.constant 0 : index
    %50 = vector.load %arg5[%c64, %c0_71] : memref<512x512xbf16, #tpu.memory_space<vmem>>, vector<4x512xbf16>
    tpu.vector_store %arg5[%c64, %c0_71], %49 {strides = array<i32>} : memref<512x512xbf16, #tpu.memory_space<vmem>>, vector<4x512xbf16>,
    %c0_72 = arith.constant 0 : index
    %c0_73 = arith.constant 0 : index
    %c0_74 = arith.constant 0 : index
    %c32_75 = arith.constant 32 : index
    %51 = vector.load %arg3[%c0_72, %c0_73, %c0_74, %c32_75] : memref<1x1x4x896xbf16, #tpu.memory_space<vmem>>, vector<1x1x4x512xbf16>
    %52 = vector.shape_cast %51 : vector<1x1x4x512xbf16> to vector<4x512xbf16>
    %c68 = arith.constant 68 : index
    %c0_76 = arith.constant 0 : index
    %53 = vector.load %arg5[%c68, %c0_76] : memref<512x512xbf16, #tpu.memory_space<vmem>>, vector<4x512xbf16>
    tpu.vector_store %arg5[%c68, %c0_76], %52 {strides = array<i32>} : memref<512x512xbf16, #tpu.memory_space<vmem>>, vector<4x512xbf16>,
    %c0_77 = arith.constant 0 : index
    %c0_78 = arith.constant 0 : index
    %c0_79 = arith.constant 0 : index
    %c33 = arith.constant 33 : index
    %54 = vector.load %arg3[%c0_77, %c0_78, %c0_79, %c33] : memref<1x1x4x896xbf16, #tpu.memory_space<vmem>>, vector<1x1x4x512xbf16>
    %55 = vector.shape_cast %54 : vector<1x1x4x512xbf16> to vector<4x512xbf16>
    %c72 = arith.constant 72 : index
    %c0_80 = arith.constant 0 : index
    %56 = vector.load %arg5[%c72, %c0_80] : memref<512x512xbf16, #tpu.memory_space<vmem>>, vector<4x512xbf16>
    tpu.vector_store %arg5[%c72, %c0_80], %55 {strides = array<i32>} : memref<512x512xbf16, #tpu.memory_space<vmem>>, vector<4x512xbf16>,
    %c0_81 = arith.constant 0 : index
    %c0_82 = arith.constant 0 : index
    %c0_83 = arith.constant 0 : index
    %c34 = arith.constant 34 : index
    %57 = vector.load %arg3[%c0_81, %c0_82, %c0_83, %c34] : memref<1x1x4x896xbf16, #tpu.memory_space<vmem>>, vector<1x1x4x512xbf16>
    %58 = vector.shape_cast %57 : vector<1x1x4x512xbf16> to vector<4x512xbf16>
    %c76 = arith.constant 76 : index
    %c0_84 = arith.constant 0 : index
    %59 = vector.load %arg5[%c76, %c0_84] : memref<512x512xbf16, #tpu.memory_space<vmem>>, vector<4x512xbf16>
    tpu.vector_store %arg5[%c76, %c0_84], %58 {strides = array<i32>} : memref<512x512xbf16, #tpu.memory_space<vmem>>, vector<4x512xbf16>,
    %c0_85 = arith.constant 0 : index
    %c0_86 = arith.constant 0 : index
    %c0_87 = arith.constant 0 : index
    %c35 = arith.constant 35 : index
    %60 = vector.load %arg3[%c0_85, %c0_86, %c0_87, %c35] : memref<1x1x4x896xbf16, #tpu.memory_space<vmem>>, vector<1x1x4x512xbf16>
    %61 = vector.shape_cast %60 : vector<1x1x4x512xbf16> to vector<4x512xbf16>
    %c80 = arith.constant 80 : index
    %c0_88 = arith.constant 0 : index
    %62 = vector.load %arg5[%c80, %c0_88] : memref<512x512xbf16, #tpu.memory_space<vmem>>, vector<4x512xbf16>
    tpu.vector_store %arg5[%c80, %c0_88], %61 {strides = array<i32>} : memref<512x512xbf16, #tpu.memory_space<vmem>>, vector<4x512xbf16>,
    %c0_89 = arith.constant 0 : index
    %c0_90 = arith.constant 0 : index
    %c0_91 = arith.constant 0 : index
    %c36_92 = arith.constant 36 : index
    %63 = vector.load %arg3[%c0_89, %c0_90, %c0_91, %c36_92] : memref<1x1x4x896xbf16, #tpu.memory_space<vmem>>, vector<1x1x4x512xbf16>
    %64 = vector.shape_cast %63 : vector<1x1x4x512xbf16> to vector<4x512xbf16>
    %c84 = arith.constant 84 : index
    %c0_93 = arith.constant 0 : index
    %65 = vector.load %arg5[%c84, %c0_93] : memref<512x512xbf16, #tpu.memory_space<vmem>>, vector<4x512xbf16>
    tpu.vector_store %arg5[%c84, %c0_93], %64 {strides = array<i32>} : memref<512x512xbf16, #tpu.memory_space<vmem>>, vector<4x512xbf16>,
    %c0_94 = arith.constant 0 : index
    %c0_95 = arith.constant 0 : index
    %c0_96 = arith.constant 0 : index
    %c52_97 = arith.constant 52 : index
    %66 = vector.load %arg3[%c0_94, %c0_95, %c0_96, %c52_97] : memref<1x1x4x896xbf16, #tpu.memory_space<vmem>>, vector<1x1x4x512xbf16>
    %67 = vector.shape_cast %66 : vector<1x1x4x512xbf16> to vector<4x512xbf16>
    %c88 = arith.constant 88 : index
    %c0_98 = arith.constant 0 : index
    %68 = vector.load %arg5[%c88, %c0_98] : memref<512x512xbf16, #tpu.memory_space<vmem>>, vector<4x512xbf16>
    tpu.vector_store %arg5[%c88, %c0_98], %67 {strides = array<i32>} : memref<512x512xbf16, #tpu.memory_space<vmem>>, vector<4x512xbf16>,
    %c0_99 = arith.constant 0 : index
    %c0_100 = arith.constant 0 : index
    %c0_101 = arith.constant 0 : index
    %c53 = arith.constant 53 : index
    %69 = vector.load %arg3[%c0_99, %c0_100, %c0_101, %c53] : memref<1x1x4x896xbf16, #tpu.memory_space<vmem>>, vector<1x1x4x512xbf16>
    %70 = vector.shape_cast %69 : vector<1x1x4x512xbf16> to vector<4x512xbf16>
    %c92 = arith.constant 92 : index
    %c0_102 = arith.constant 0 : index
    %71 = vector.load %arg5[%c92, %c0_102] : memref<512x512xbf16, #tpu.memory_space<vmem>>, vector<4x512xbf16>
    tpu.vector_store %arg5[%c92, %c0_102], %70 {strides = array<i32>} : memref<512x512xbf16, #tpu.memory_space<vmem>>, vector<4x512xbf16>,
    %c0_103 = arith.constant 0 : index
    %c0_104 = arith.constant 0 : index
    %c0_105 = arith.constant 0 : index
    %c54 = arith.constant 54 : index
    %72 = vector.load %arg3[%c0_103, %c0_104, %c0_105, %c54] : memref<1x1x4x896xbf16, #tpu.memory_space<vmem>>, vector<1x1x4x512xbf16>
    %73 = vector.shape_cast %72 : vector<1x1x4x512xbf16> to vector<4x512xbf16>
    %c96 = arith.constant 96 : index
    %c0_106 = arith.constant 0 : index
    %74 = vector.load %arg5[%c96, %c0_106] : memref<512x512xbf16, #tpu.memory_space<vmem>>, vector<4x512xbf16>
    tpu.vector_store %arg5[%c96, %c0_106], %73 {strides = array<i32>} : memref<512x512xbf16, #tpu.memory_space<vmem>>, vector<4x512xbf16>,
    %c0_107 = arith.constant 0 : index
    %c0_108 = arith.constant 0 : index
    %c0_109 = arith.constant 0 : index
    %c55 = arith.constant 55 : index
    %75 = vector.load %arg3[%c0_107, %c0_108, %c0_109, %c55] : memref<1x1x4x896xbf16, #tpu.memory_space<vmem>>, vector<1x1x4x512xbf16>
    %76 = vector.shape_cast %75 : vector<1x1x4x512xbf16> to vector<4x512xbf16>
    %c100 = arith.constant 100 : index
    %c0_110 = arith.constant 0 : index
    %77 = vector.load %arg5[%c100, %c0_110] : memref<512x512xbf16, #tpu.memory_space<vmem>>, vector<4x512xbf16>
    tpu.vector_store %arg5[%c100, %c0_110], %76 {strides = array<i32>} : memref<512x512xbf16, #tpu.memory_space<vmem>>, vector<4x512xbf16>,
    %c0_111 = arith.constant 0 : index
    %c0_112 = arith.constant 0 : index
    %c0_113 = arith.constant 0 : index
    %c56_114 = arith.constant 56 : index
    %78 = vector.load %arg3[%c0_111, %c0_112, %c0_113, %c56_114] : memref<1x1x4x896xbf16, #tpu.memory_space<vmem>>, vector<1x1x4x512xbf16>
    %79 = vector.shape_cast %78 : vector<1x1x4x512xbf16> to vector<4x512xbf16>
    %c104 = arith.constant 104 : index
    %c0_115 = arith.constant 0 : index
    %80 = vector.load %arg5[%c104, %c0_115] : memref<512x512xbf16, #tpu.memory_space<vmem>>, vector<4x512xbf16>
    tpu.vector_store %arg5[%c104, %c0_115], %79 {strides = array<i32>} : memref<512x512xbf16, #tpu.memory_space<vmem>>, vector<4x512xbf16>,
    %c0_116 = arith.constant 0 : index
    %c0_117 = arith.constant 0 : index
    %c0_118 = arith.constant 0 : index
    %c57 = arith.constant 57 : index
    %81 = vector.load %arg3[%c0_116, %c0_117, %c0_118, %c57] : memref<1x1x4x896xbf16, #tpu.memory_space<vmem>>, vector<1x1x4x512xbf16>
    %82 = vector.shape_cast %81 : vector<1x1x4x512xbf16> to vector<4x512xbf16>
    %c108 = arith.constant 108 : index
    %c0_119 = arith.constant 0 : index
    %83 = vector.load %arg5[%c108, %c0_119] : memref<512x512xbf16, #tpu.memory_space<vmem>>, vector<4x512xbf16>
    tpu.vector_store %arg5[%c108, %c0_119], %82 {strides = array<i32>} : memref<512x512xbf16, #tpu.memory_space<vmem>>, vector<4x512xbf16>,
    %c0_120 = arith.constant 0 : index
    %c0_121 = arith.constant 0 : index
    %c0_122 = arith.constant 0 : index
    %c58 = arith.constant 58 : index
    %84 = vector.load %arg3[%c0_120, %c0_121, %c0_122, %c58] : memref<1x1x4x896xbf16, #tpu.memory_space<vmem>>, vector<1x1x4x512xbf16>
    %85 = vector.shape_cast %84 : vector<1x1x4x512xbf16> to vector<4x512xbf16>
    %c112 = arith.constant 112 : index
    %c0_123 = arith.constant 0 : index
    %86 = vector.load %arg5[%c112, %c0_123] : memref<512x512xbf16, #tpu.memory_space<vmem>>, vector<4x512xbf16>
    tpu.vector_store %arg5[%c112, %c0_123], %85 {strides = array<i32>} : memref<512x512xbf16, #tpu.memory_space<vmem>>, vector<4x512xbf16>,
    %c0_124 = arith.constant 0 : index
    %c0_125 = arith.constant 0 : index
    %c0_126 = arith.constant 0 : index
    %c59 = arith.constant 59 : index
    %87 = vector.load %arg3[%c0_124, %c0_125, %c0_126, %c59] : memref<1x1x4x896xbf16, #tpu.memory_space<vmem>>, vector<1x1x4x512xbf16>
    %88 = vector.shape_cast %87 : vector<1x1x4x512xbf16> to vector<4x512xbf16>
    %c116 = arith.constant 116 : index
    %c0_127 = arith.constant 0 : index
    %89 = vector.load %arg5[%c116, %c0_127] : memref<512x512xbf16, #tpu.memory_space<vmem>>, vector<4x512xbf16>
    tpu.vector_store %arg5[%c116, %c0_127], %88 {strides = array<i32>} : memref<512x512xbf16, #tpu.memory_space<vmem>>, vector<4x512xbf16>,
    %c0_128 = arith.constant 0 : index
    %c0_129 = arith.constant 0 : index
    %c0_130 = arith.constant 0 : index
    %c60_131 = arith.constant 60 : index
    %90 = vector.load %arg3[%c0_128, %c0_129, %c0_130, %c60_131] : memref<1x1x4x896xbf16, #tpu.memory_space<vmem>>, vector<1x1x4x512xbf16>
    %91 = vector.shape_cast %90 : vector<1x1x4x512xbf16> to vector<4x512xbf16>
    %c120 = arith.constant 120 : index
    %c0_132 = arith.constant 0 : index
    %92 = vector.load %arg5[%c120, %c0_132] : memref<512x512xbf16, #tpu.memory_space<vmem>>, vector<4x512xbf16>
    tpu.vector_store %arg5[%c120, %c0_132], %91 {strides = array<i32>} : memref<512x512xbf16, #tpu.memory_space<vmem>>, vector<4x512xbf16>,
    %c0_133 = arith.constant 0 : index
    %c0_134 = arith.constant 0 : index
    %c0_135 = arith.constant 0 : index
    %c61 = arith.constant 61 : index
    %93 = vector.load %arg3[%c0_133, %c0_134, %c0_135, %c61] : memref<1x1x4x896xbf16, #tpu.memory_space<vmem>>, vector<1x1x4x512xbf16>
    %94 = vector.shape_cast %93 : vector<1x1x4x512xbf16> to vector<4x512xbf16>
    %c124 = arith.constant 124 : index
    %c0_136 = arith.constant 0 : index
    %95 = vector.load %arg5[%c124, %c0_136] : memref<512x512xbf16, #tpu.memory_space<vmem>>, vector<4x512xbf16>
    tpu.vector_store %arg5[%c124, %c0_136], %94 {strides = array<i32>} : memref<512x512xbf16, #tpu.memory_space<vmem>>, vector<4x512xbf16>,
    %c0_137 = arith.constant 0 : index
    %c0_138 = arith.constant 0 : index
    %c0_139 = arith.constant 0 : index
    %c62 = arith.constant 62 : index
    %96 = vector.load %arg3[%c0_137, %c0_138, %c0_139, %c62] : memref<1x1x4x896xbf16, #tpu.memory_space<vmem>>, vector<1x1x4x512xbf16>
    %97 = vector.shape_cast %96 : vector<1x1x4x512xbf16> to vector<4x512xbf16>
    %c128 = arith.constant 128 : index
    %c0_140 = arith.constant 0 : index
    %98 = vector.load %arg5[%c128, %c0_140] : memref<512x512xbf16, #tpu.memory_space<vmem>>, vector<4x512xbf16>
    tpu.vector_store %arg5[%c128, %c0_140], %97 {strides = array<i32>} : memref<512x512xbf16, #tpu.memory_space<vmem>>, vector<4x512xbf16>,
    %c0_141 = arith.constant 0 : index
    %c0_142 = arith.constant 0 : index
    %c0_143 = arith.constant 0 : index
    %c78 = arith.constant 78 : index
    %99 = vector.load %arg3[%c0_141, %c0_142, %c0_143, %c78] : memref<1x1x4x896xbf16, #tpu.memory_space<vmem>>, vector<1x1x4x512xbf16>
    %100 = vector.shape_cast %99 : vector<1x1x4x512xbf16> to vector<4x512xbf16>
    %c132 = arith.constant 132 : index
    %c0_144 = arith.constant 0 : index
    %101 = vector.load %arg5[%c132, %c0_144] : memref<512x512xbf16, #tpu.memory_space<vmem>>, vector<4x512xbf16>
    tpu.vector_store %arg5[%c132, %c0_144], %100 {strides = array<i32>} : memref<512x512xbf16, #tpu.memory_space<vmem>>, vector<4x512xbf16>,
    %c0_145 = arith.constant 0 : index
    %c0_146 = arith.constant 0 : index
    %c0_147 = arith.constant 0 : index
    %c79 = arith.constant 79 : index
    %102 = vector.load %arg3[%c0_145, %c0_146, %c0_147, %c79] : memref<1x1x4x896xbf16, #tpu.memory_space<vmem>>, vector<1x1x4x512xbf16>
    %103 = vector.shape_cast %102 : vector<1x1x4x512xbf16> to vector<4x512xbf16>
    %c136 = arith.constant 136 : index
    %c0_148 = arith.constant 0 : index
    %104 = vector.load %arg5[%c136, %c0_148] : memref<512x512xbf16, #tpu.memory_space<vmem>>, vector<4x512xbf16>
    tpu.vector_store %arg5[%c136, %c0_148], %103 {strides = array<i32>} : memref<512x512xbf16, #tpu.memory_space<vmem>>, vector<4x512xbf16>,
    %c0_149 = arith.constant 0 : index
    %c0_150 = arith.constant 0 : index
    %c0_151 = arith.constant 0 : index
    %c80_152 = arith.constant 80 : index
    %105 = vector.load %arg3[%c0_149, %c0_150, %c0_151, %c80_152] : memref<1x1x4x896xbf16, #tpu.memory_space<vmem>>, vector<1x1x4x512xbf16>
    %106 = vector.shape_cast %105 : vector<1x1x4x512xbf16> to vector<4x512xbf16>
    %c140 = arith.constant 140 : index
    %c0_153 = arith.constant 0 : index
    %107 = vector.load %arg5[%c140, %c0_153] : memref<512x512xbf16, #tpu.memory_space<vmem>>, vector<4x512xbf16>
    tpu.vector_store %arg5[%c140, %c0_153], %106 {strides = array<i32>} : memref<512x512xbf16, #tpu.memory_space<vmem>>, vector<4x512xbf16>,
    %c0_154 = arith.constant 0 : index
    %c0_155 = arith.constant 0 : index
    %c0_156 = arith.constant 0 : index
    %c81 = arith.constant 81 : index
    %108 = vector.load %arg3[%c0_154, %c0_155, %c0_156, %c81] : memref<1x1x4x896xbf16, #tpu.memory_space<vmem>>, vector<1x1x4x512xbf16>
    %109 = vector.shape_cast %108 : vector<1x1x4x512xbf16> to vector<4x512xbf16>
    %c144 = arith.constant 144 : index
    %c0_157 = arith.constant 0 : index
    %110 = vector.load %arg5[%c144, %c0_157] : memref<512x512xbf16, #tpu.memory_space<vmem>>, vector<4x512xbf16>
    tpu.vector_store %arg5[%c144, %c0_157], %109 {strides = array<i32>} : memref<512x512xbf16, #tpu.memory_space<vmem>>, vector<4x512xbf16>,
    %c0_158 = arith.constant 0 : index
    %c0_159 = arith.constant 0 : index
    %c0_160 = arith.constant 0 : index
    %c82 = arith.constant 82 : index
    %111 = vector.load %arg3[%c0_158, %c0_159, %c0_160, %c82] : memref<1x1x4x896xbf16, #tpu.memory_space<vmem>>, vector<1x1x4x512xbf16>
    %112 = vector.shape_cast %111 : vector<1x1x4x512xbf16> to vector<4x512xbf16>
    %c148 = arith.constant 148 : index
    %c0_161 = arith.constant 0 : index
    %113 = vector.load %arg5[%c148, %c0_161] : memref<512x512xbf16, #tpu.memory_space<vmem>>, vector<4x512xbf16>
    tpu.vector_store %arg5[%c148, %c0_161], %112 {strides = array<i32>} : memref<512x512xbf16, #tpu.memory_space<vmem>>, vector<4x512xbf16>,
    %c0_162 = arith.constant 0 : index
    %c0_163 = arith.constant 0 : index
    %c0_164 = arith.constant 0 : index
    %c83 = arith.constant 83 : index
    %114 = vector.load %arg3[%c0_162, %c0_163, %c0_164, %c83] : memref<1x1x4x896xbf16, #tpu.memory_space<vmem>>, vector<1x1x4x512xbf16>
    %115 = vector.shape_cast %114 : vector<1x1x4x512xbf16> to vector<4x512xbf16>
    %c152 = arith.constant 152 : index
    %c0_165 = arith.constant 0 : index
    %116 = vector.load %arg5[%c152, %c0_165] : memref<512x512xbf16, #tpu.memory_space<vmem>>, vector<4x512xbf16>
    tpu.vector_store %arg5[%c152, %c0_165], %115 {strides = array<i32>} : memref<512x512xbf16, #tpu.memory_space<vmem>>, vector<4x512xbf16>,
    %c0_166 = arith.constant 0 : index
    %c0_167 = arith.constant 0 : index
    %c0_168 = arith.constant 0 : index
    %c84_169 = arith.constant 84 : index
    %117 = vector.load %arg3[%c0_166, %c0_167, %c0_168, %c84_169] : memref<1x1x4x896xbf16, #tpu.memory_space<vmem>>, vector<1x1x4x512xbf16>
    %118 = vector.shape_cast %117 : vector<1x1x4x512xbf16> to vector<4x512xbf16>
    %c156 = arith.constant 156 : index
    %c0_170 = arith.constant 0 : index
    %119 = vector.load %arg5[%c156, %c0_170] : memref<512x512xbf16, #tpu.memory_space<vmem>>, vector<4x512xbf16>
    tpu.vector_store %arg5[%c156, %c0_170], %118 {strides = array<i32>} : memref<512x512xbf16, #tpu.memory_space<vmem>>, vector<4x512xbf16>,
    %c0_171 = arith.constant 0 : index
    %c0_172 = arith.constant 0 : index
    %c0_173 = arith.constant 0 : index
    %c85 = arith.constant 85 : index
    %120 = vector.load %arg3[%c0_171, %c0_172, %c0_173, %c85] : memref<1x1x4x896xbf16, #tpu.memory_space<vmem>>, vector<1x1x4x512xbf16>
    %121 = vector.shape_cast %120 : vector<1x1x4x512xbf16> to vector<4x512xbf16>
    %c160 = arith.constant 160 : index
    %c0_174 = arith.constant 0 : index
    %122 = vector.load %arg5[%c160, %c0_174] : memref<512x512xbf16, #tpu.memory_space<vmem>>, vector<4x512xbf16>
    tpu.vector_store %arg5[%c160, %c0_174], %121 {strides = array<i32>} : memref<512x512xbf16, #tpu.memory_space<vmem>>, vector<4x512xbf16>,
    %c0_175 = arith.constant 0 : index
    %c0_176 = arith.constant 0 : index
    %c0_177 = arith.constant 0 : index
    %c86 = arith.constant 86 : index
    %123 = vector.load %arg3[%c0_175, %c0_176, %c0_177, %c86] : memref<1x1x4x896xbf16, #tpu.memory_space<vmem>>, vector<1x1x4x512xbf16>
    %124 = vector.shape_cast %123 : vector<1x1x4x512xbf16> to vector<4x512xbf16>
    %c164 = arith.constant 164 : index
    %c0_178 = arith.constant 0 : index
    %125 = vector.load %arg5[%c164, %c0_178] : memref<512x512xbf16, #tpu.memory_space<vmem>>, vector<4x512xbf16>
    tpu.vector_store %arg5[%c164, %c0_178], %124 {strides = array<i32>} : memref<512x512xbf16, #tpu.memory_space<vmem>>, vector<4x512xbf16>,
    %c0_179 = arith.constant 0 : index
    %c0_180 = arith.constant 0 : index
    %c0_181 = arith.constant 0 : index
    %c87 = arith.constant 87 : index
    %126 = vector.load %arg3[%c0_179, %c0_180, %c0_181, %c87] : memref<1x1x4x896xbf16, #tpu.memory_space<vmem>>, vector<1x1x4x512xbf16>
    %127 = vector.shape_cast %126 : vector<1x1x4x512xbf16> to vector<4x512xbf16>
    %c168 = arith.constant 168 : index
    %c0_182 = arith.constant 0 : index
    %128 = vector.load %arg5[%c168, %c0_182] : memref<512x512xbf16, #tpu.memory_space<vmem>>, vector<4x512xbf16>
    tpu.vector_store %arg5[%c168, %c0_182], %127 {strides = array<i32>} : memref<512x512xbf16, #tpu.memory_space<vmem>>, vector<4x512xbf16>,
    %c0_183 = arith.constant 0 : index
    %c0_184 = arith.constant 0 : index
    %c0_185 = arith.constant 0 : index
    %c88_186 = arith.constant 88 : index
    %129 = vector.load %arg3[%c0_183, %c0_184, %c0_185, %c88_186] : memref<1x1x4x896xbf16, #tpu.memory_space<vmem>>, vector<1x1x4x512xbf16>
    %130 = vector.shape_cast %129 : vector<1x1x4x512xbf16> to vector<4x512xbf16>
    %c172 = arith.constant 172 : index
    %c0_187 = arith.constant 0 : index
    %131 = vector.load %arg5[%c172, %c0_187] : memref<512x512xbf16, #tpu.memory_space<vmem>>, vector<4x512xbf16>
    tpu.vector_store %arg5[%c172, %c0_187], %130 {strides = array<i32>} : memref<512x512xbf16, #tpu.memory_space<vmem>>, vector<4x512xbf16>,
    %c0_188 = arith.constant 0 : index
    %c0_189 = arith.constant 0 : index
    %c0_190 = arith.constant 0 : index
    %c104_191 = arith.constant 104 : index
    %132 = vector.load %arg3[%c0_188, %c0_189, %c0_190, %c104_191] : memref<1x1x4x896xbf16, #tpu.memory_space<vmem>>, vector<1x1x4x512xbf16>
    %133 = vector.shape_cast %132 : vector<1x1x4x512xbf16> to vector<4x512xbf16>
    %c176 = arith.constant 176 : index
    %c0_192 = arith.constant 0 : index
    %134 = vector.load %arg5[%c176, %c0_192] : memref<512x512xbf16, #tpu.memory_space<vmem>>, vector<4x512xbf16>
    tpu.vector_store %arg5[%c176, %c0_192], %133 {strides = array<i32>} : memref<512x512xbf16, #tpu.memory_space<vmem>>, vector<4x512xbf16>,
    %c0_193 = arith.constant 0 : index
    %c0_194 = arith.constant 0 : index
    %c0_195 = arith.constant 0 : index
    %c105 = arith.constant 105 : index
    %135 = vector.load %arg3[%c0_193, %c0_194, %c0_195, %c105] : memref<1x1x4x896xbf16, #tpu.memory_space<vmem>>, vector<1x1x4x512xbf16>
    %136 = vector.shape_cast %135 : vector<1x1x4x512xbf16> to vector<4x512xbf16>
    %c180 = arith.constant 180 : index
    %c0_196 = arith.constant 0 : index
    %137 = vector.load %arg5[%c180, %c0_196] : memref<512x512xbf16, #tpu.memory_space<vmem>>, vector<4x512xbf16>
    tpu.vector_store %arg5[%c180, %c0_196], %136 {strides = array<i32>} : memref<512x512xbf16, #tpu.memory_space<vmem>>, vector<4x512xbf16>,
    %c0_197 = arith.constant 0 : index
    %c0_198 = arith.constant 0 : index
    %c0_199 = arith.constant 0 : index
    %c106 = arith.constant 106 : index
    %138 = vector.load %arg3[%c0_197, %c0_198, %c0_199, %c106] : memref<1x1x4x896xbf16, #tpu.memory_space<vmem>>, vector<1x1x4x512xbf16>
    %139 = vector.shape_cast %138 : vector<1x1x4x512xbf16> to vector<4x512xbf16>
    %c184 = arith.constant 184 : index
    %c0_200 = arith.constant 0 : index
    %140 = vector.load %arg5[%c184, %c0_200] : memref<512x512xbf16, #tpu.memory_space<vmem>>, vector<4x512xbf16>
    tpu.vector_store %arg5[%c184, %c0_200], %139 {strides = array<i32>} : memref<512x512xbf16, #tpu.memory_space<vmem>>, vector<4x512xbf16>,
    %c0_201 = arith.constant 0 : index
    %c0_202 = arith.constant 0 : index
    %c0_203 = arith.constant 0 : index
    %c107 = arith.constant 107 : index
    %141 = vector.load %arg3[%c0_201, %c0_202, %c0_203, %c107] : memref<1x1x4x896xbf16, #tpu.memory_space<vmem>>, vector<1x1x4x512xbf16>
    %142 = vector.shape_cast %141 : vector<1x1x4x512xbf16> to vector<4x512xbf16>
    %c188 = arith.constant 188 : index
    %c0_204 = arith.constant 0 : index
    %143 = vector.load %arg5[%c188, %c0_204] : memref<512x512xbf16, #tpu.memory_space<vmem>>, vector<4x512xbf16>
    tpu.vector_store %arg5[%c188, %c0_204], %142 {strides = array<i32>} : memref<512x512xbf16, #tpu.memory_space<vmem>>, vector<4x512xbf16>,
    %c0_205 = arith.constant 0 : index
    %c0_206 = arith.constant 0 : index
    %c0_207 = arith.constant 0 : index
    %c108_208 = arith.constant 108 : index
    %144 = vector.load %arg3[%c0_205, %c0_206, %c0_207, %c108_208] : memref<1x1x4x896xbf16, #tpu.memory_space<vmem>>, vector<1x1x4x512xbf16>
    %145 = vector.shape_cast %144 : vector<1x1x4x512xbf16> to vector<4x512xbf16>
    %c192 = arith.constant 192 : index
    %c0_209 = arith.constant 0 : index
    %146 = vector.load %arg5[%c192, %c0_209] : memref<512x512xbf16, #tpu.memory_space<vmem>>, vector<4x512xbf16>
    tpu.vector_store %arg5[%c192, %c0_209], %145 {strides = array<i32>} : memref<512x512xbf16, #tpu.memory_space<vmem>>, vector<4x512xbf16>,
    %c0_210 = arith.constant 0 : index
    %c0_211 = arith.constant 0 : index
    %c0_212 = arith.constant 0 : index
    %c109 = arith.constant 109 : index
    %147 = vector.load %arg3[%c0_210, %c0_211, %c0_212, %c109] : memref<1x1x4x896xbf16, #tpu.memory_space<vmem>>, vector<1x1x4x512xbf16>
    %148 = vector.shape_cast %147 : vector<1x1x4x512xbf16> to vector<4x512xbf16>
    %c196 = arith.constant 196 : index
    %c0_213 = arith.constant 0 : index
    %149 = vector.load %arg5[%c196, %c0_213] : memref<512x512xbf16, #tpu.memory_space<vmem>>, vector<4x512xbf16>
    tpu.vector_store %arg5[%c196, %c0_213], %148 {strides = array<i32>} : memref<512x512xbf16, #tpu.memory_space<vmem>>, vector<4x512xbf16>,
    %c0_214 = arith.constant 0 : index
    %c0_215 = arith.constant 0 : index
    %c0_216 = arith.constant 0 : index
    %c110 = arith.constant 110 : index
    %150 = vector.load %arg3[%c0_214, %c0_215, %c0_216, %c110] : memref<1x1x4x896xbf16, #tpu.memory_space<vmem>>, vector<1x1x4x512xbf16>
    %151 = vector.shape_cast %150 : vector<1x1x4x512xbf16> to vector<4x512xbf16>
    %c200 = arith.constant 200 : index
    %c0_217 = arith.constant 0 : index
    %152 = vector.load %arg5[%c200, %c0_217] : memref<512x512xbf16, #tpu.memory_space<vmem>>, vector<4x512xbf16>
    tpu.vector_store %arg5[%c200, %c0_217], %151 {strides = array<i32>} : memref<512x512xbf16, #tpu.memory_space<vmem>>, vector<4x512xbf16>,
    %c0_218 = arith.constant 0 : index
    %c0_219 = arith.constant 0 : index
    %c0_220 = arith.constant 0 : index
    %c111 = arith.constant 111 : index
    %153 = vector.load %arg3[%c0_218, %c0_219, %c0_220, %c111] : memref<1x1x4x896xbf16, #tpu.memory_space<vmem>>, vector<1x1x4x512xbf16>
    %154 = vector.shape_cast %153 : vector<1x1x4x512xbf16> to vector<4x512xbf16>
    %c204 = arith.constant 204 : index
    %c0_221 = arith.constant 0 : index
    %155 = vector.load %arg5[%c204, %c0_221] : memref<512x512xbf16, #tpu.memory_space<vmem>>, vector<4x512xbf16>
    tpu.vector_store %arg5[%c204, %c0_221], %154 {strides = array<i32>} : memref<512x512xbf16, #tpu.memory_space<vmem>>, vector<4x512xbf16>,
    %c0_222 = arith.constant 0 : index
    %c0_223 = arith.constant 0 : index
    %c0_224 = arith.constant 0 : index
    %c112_225 = arith.constant 112 : index
    %156 = vector.load %arg3[%c0_222, %c0_223, %c0_224, %c112_225] : memref<1x1x4x896xbf16, #tpu.memory_space<vmem>>, vector<1x1x4x512xbf16>
    %157 = vector.shape_cast %156 : vector<1x1x4x512xbf16> to vector<4x512xbf16>
    %c208 = arith.constant 208 : index
    %c0_226 = arith.constant 0 : index
    %158 = vector.load %arg5[%c208, %c0_226] : memref<512x512xbf16, #tpu.memory_space<vmem>>, vector<4x512xbf16>
    tpu.vector_store %arg5[%c208, %c0_226], %157 {strides = array<i32>} : memref<512x512xbf16, #tpu.memory_space<vmem>>, vector<4x512xbf16>,
    %c0_227 = arith.constant 0 : index
    %c0_228 = arith.constant 0 : index
    %c0_229 = arith.constant 0 : index
    %c113 = arith.constant 113 : index
    %159 = vector.load %arg3[%c0_227, %c0_228, %c0_229, %c113] : memref<1x1x4x896xbf16, #tpu.memory_space<vmem>>, vector<1x1x4x512xbf16>
    %160 = vector.shape_cast %159 : vector<1x1x4x512xbf16> to vector<4x512xbf16>
    %c212 = arith.constant 212 : index
    %c0_230 = arith.constant 0 : index
    %161 = vector.load %arg5[%c212, %c0_230] : memref<512x512xbf16, #tpu.memory_space<vmem>>, vector<4x512xbf16>
    tpu.vector_store %arg5[%c212, %c0_230], %160 {strides = array<i32>} : memref<512x512xbf16, #tpu.memory_space<vmem>>, vector<4x512xbf16>,
    %c0_231 = arith.constant 0 : index
    %c0_232 = arith.constant 0 : index
    %c0_233 = arith.constant 0 : index
    %c114 = arith.constant 114 : index
    %162 = vector.load %arg3[%c0_231, %c0_232, %c0_233, %c114] : memref<1x1x4x896xbf16, #tpu.memory_space<vmem>>, vector<1x1x4x512xbf16>
    %163 = vector.shape_cast %162 : vector<1x1x4x512xbf16> to vector<4x512xbf16>
    %c216 = arith.constant 216 : index
    %c0_234 = arith.constant 0 : index
    %164 = vector.load %arg5[%c216, %c0_234] : memref<512x512xbf16, #tpu.memory_space<vmem>>, vector<4x512xbf16>
    tpu.vector_store %arg5[%c216, %c0_234], %163 {strides = array<i32>} : memref<512x512xbf16, #tpu.memory_space<vmem>>, vector<4x512xbf16>,
    %c0_235 = arith.constant 0 : index
    %c0_236 = arith.constant 0 : index
    %c0_237 = arith.constant 0 : index
    %c130 = arith.constant 130 : index
    %165 = vector.load %arg3[%c0_235, %c0_236, %c0_237, %c130] : memref<1x1x4x896xbf16, #tpu.memory_space<vmem>>, vector<1x1x4x512xbf16>
    %166 = vector.shape_cast %165 : vector<1x1x4x512xbf16> to vector<4x512xbf16>
    %c220 = arith.constant 220 : index
    %c0_238 = arith.constant 0 : index
    %167 = vector.load %arg5[%c220, %c0_238] : memref<512x512xbf16, #tpu.memory_space<vmem>>, vector<4x512xbf16>
    tpu.vector_store %arg5[%c220, %c0_238], %166 {strides = array<i32>} : memref<512x512xbf16, #tpu.memory_space<vmem>>, vector<4x512xbf16>,
    %c0_239 = arith.constant 0 : index
    %c0_240 = arith.constant 0 : index
    %c0_241 = arith.constant 0 : index
    %c131 = arith.constant 131 : index
    %168 = vector.load %arg3[%c0_239, %c0_240, %c0_241, %c131] : memref<1x1x4x896xbf16, #tpu.memory_space<vmem>>, vector<1x1x4x512xbf16>
    %169 = vector.shape_cast %168 : vector<1x1x4x512xbf16> to vector<4x512xbf16>
    %c224 = arith.constant 224 : index
    %c0_242 = arith.constant 0 : index
    %170 = vector.load %arg5[%c224, %c0_242] : memref<512x512xbf16, #tpu.memory_space<vmem>>, vector<4x512xbf16>
    tpu.vector_store %arg5[%c224, %c0_242], %169 {strides = array<i32>} : memref<512x512xbf16, #tpu.memory_space<vmem>>, vector<4x512xbf16>,
    %c0_243 = arith.constant 0 : index
    %c0_244 = arith.constant 0 : index
    %c0_245 = arith.constant 0 : index
    %c132_246 = arith.constant 132 : index
    %171 = vector.load %arg3[%c0_243, %c0_244, %c0_245, %c132_246] : memref<1x1x4x896xbf16, #tpu.memory_space<vmem>>, vector<1x1x4x512xbf16>
    %172 = vector.shape_cast %171 : vector<1x1x4x512xbf16> to vector<4x512xbf16>
    %c228 = arith.constant 228 : index
    %c0_247 = arith.constant 0 : index
    %173 = vector.load %arg5[%c228, %c0_247] : memref<512x512xbf16, #tpu.memory_space<vmem>>, vector<4x512xbf16>
    tpu.vector_store %arg5[%c228, %c0_247], %172 {strides = array<i32>} : memref<512x512xbf16, #tpu.memory_space<vmem>>, vector<4x512xbf16>,
    %c0_248 = arith.constant 0 : index
    %c0_249 = arith.constant 0 : index
    %c0_250 = arith.constant 0 : index
    %c133 = arith.constant 133 : index
    %174 = vector.load %arg3[%c0_248, %c0_249, %c0_250, %c133] : memref<1x1x4x896xbf16, #tpu.memory_space<vmem>>, vector<1x1x4x512xbf16>
    %175 = vector.shape_cast %174 : vector<1x1x4x512xbf16> to vector<4x512xbf16>
    %c232 = arith.constant 232 : index
    %c0_251 = arith.constant 0 : index
    %176 = vector.load %arg5[%c232, %c0_251] : memref<512x512xbf16, #tpu.memory_space<vmem>>, vector<4x512xbf16>
    tpu.vector_store %arg5[%c232, %c0_251], %175 {strides = array<i32>} : memref<512x512xbf16, #tpu.memory_space<vmem>>, vector<4x512xbf16>,
    %c0_252 = arith.constant 0 : index
    %c0_253 = arith.constant 0 : index
    %c0_254 = arith.constant 0 : index
    %c134 = arith.constant 134 : index
    %177 = vector.load %arg3[%c0_252, %c0_253, %c0_254, %c134] : memref<1x1x4x896xbf16, #tpu.memory_space<vmem>>, vector<1x1x4x512xbf16>
    %178 = vector.shape_cast %177 : vector<1x1x4x512xbf16> to vector<4x512xbf16>
    %c236 = arith.constant 236 : index
    %c0_255 = arith.constant 0 : index
    %179 = vector.load %arg5[%c236, %c0_255] : memref<512x512xbf16, #tpu.memory_space<vmem>>, vector<4x512xbf16>
    tpu.vector_store %arg5[%c236, %c0_255], %178 {strides = array<i32>} : memref<512x512xbf16, #tpu.memory_space<vmem>>, vector<4x512xbf16>,
    %c0_256 = arith.constant 0 : index
    %c0_257 = arith.constant 0 : index
    %c0_258 = arith.constant 0 : index
    %c135 = arith.constant 135 : index
    %180 = vector.load %arg3[%c0_256, %c0_257, %c0_258, %c135] : memref<1x1x4x896xbf16, #tpu.memory_space<vmem>>, vector<1x1x4x512xbf16>
    %181 = vector.shape_cast %180 : vector<1x1x4x512xbf16> to vector<4x512xbf16>
    %c240 = arith.constant 240 : index
    %c0_259 = arith.constant 0 : index
    %182 = vector.load %arg5[%c240, %c0_259] : memref<512x512xbf16, #tpu.memory_space<vmem>>, vector<4x512xbf16>
    tpu.vector_store %arg5[%c240, %c0_259], %181 {strides = array<i32>} : memref<512x512xbf16, #tpu.memory_space<vmem>>, vector<4x512xbf16>,
    %c0_260 = arith.constant 0 : index
    %c0_261 = arith.constant 0 : index
    %c0_262 = arith.constant 0 : index
    %c136_263 = arith.constant 136 : index
    %183 = vector.load %arg3[%c0_260, %c0_261, %c0_262, %c136_263] : memref<1x1x4x896xbf16, #tpu.memory_space<vmem>>, vector<1x1x4x512xbf16>
    %184 = vector.shape_cast %183 : vector<1x1x4x512xbf16> to vector<4x512xbf16>
    %c244 = arith.constant 244 : index
    %c0_264 = arith.constant 0 : index
    %185 = vector.load %arg5[%c244, %c0_264] : memref<512x512xbf16, #tpu.memory_space<vmem>>, vector<4x512xbf16>
    tpu.vector_store %arg5[%c244, %c0_264], %184 {strides = array<i32>} : memref<512x512xbf16, #tpu.memory_space<vmem>>, vector<4x512xbf16>,
    %c0_265 = arith.constant 0 : index
    %c0_266 = arith.constant 0 : index
    %c0_267 = arith.constant 0 : index
    %c137 = arith.constant 137 : index
    %186 = vector.load %arg3[%c0_265, %c0_266, %c0_267, %c137] : memref<1x1x4x896xbf16, #tpu.memory_space<vmem>>, vector<1x1x4x512xbf16>
    %187 = vector.shape_cast %186 : vector<1x1x4x512xbf16> to vector<4x512xbf16>
    %c248 = arith.constant 248 : index
    %c0_268 = arith.constant 0 : index
    %188 = vector.load %arg5[%c248, %c0_268] : memref<512x512xbf16, #tpu.memory_space<vmem>>, vector<4x512xbf16>
    tpu.vector_store %arg5[%c248, %c0_268], %187 {strides = array<i32>} : memref<512x512xbf16, #tpu.memory_space<vmem>>, vector<4x512xbf16>,
    %c0_269 = arith.constant 0 : index
    %c0_270 = arith.constant 0 : index
    %c0_271 = arith.constant 0 : index
    %c138 = arith.constant 138 : index
    %189 = vector.load %arg3[%c0_269, %c0_270, %c0_271, %c138] : memref<1x1x4x896xbf16, #tpu.memory_space<vmem>>, vector<1x1x4x512xbf16>
    %190 = vector.shape_cast %189 : vector<1x1x4x512xbf16> to vector<4x512xbf16>
    %c252 = arith.constant 252 : index
    %c0_272 = arith.constant 0 : index
    %191 = vector.load %arg5[%c252, %c0_272] : memref<512x512xbf16, #tpu.memory_space<vmem>>, vector<4x512xbf16>
    tpu.vector_store %arg5[%c252, %c0_272], %190 {strides = array<i32>} : memref<512x512xbf16, #tpu.memory_space<vmem>>, vector<4x512xbf16>,
    %c0_273 = arith.constant 0 : index
    %c0_274 = arith.constant 0 : index
    %c0_275 = arith.constant 0 : index
    %c139 = arith.constant 139 : index
    %192 = vector.load %arg3[%c0_273, %c0_274, %c0_275, %c139] : memref<1x1x4x896xbf16, #tpu.memory_space<vmem>>, vector<1x1x4x512xbf16>
    %193 = vector.shape_cast %192 : vector<1x1x4x512xbf16> to vector<4x512xbf16>
    %c256 = arith.constant 256 : index
    %c0_276 = arith.constant 0 : index
    %194 = vector.load %arg5[%c256, %c0_276] : memref<512x512xbf16, #tpu.memory_space<vmem>>, vector<4x512xbf16>
    tpu.vector_store %arg5[%c256, %c0_276], %193 {strides = array<i32>} : memref<512x512xbf16, #tpu.memory_space<vmem>>, vector<4x512xbf16>,
    %c0_277 = arith.constant 0 : index
    %c0_278 = arith.constant 0 : index
    %c0_279 = arith.constant 0 : index
    %c140_280 = arith.constant 140 : index
    %195 = vector.load %arg3[%c0_277, %c0_278, %c0_279, %c140_280] : memref<1x1x4x896xbf16, #tpu.memory_space<vmem>>, vector<1x1x4x512xbf16>
    %196 = vector.shape_cast %195 : vector<1x1x4x512xbf16> to vector<4x512xbf16>
    %c260 = arith.constant 260 : index
    %c0_281 = arith.constant 0 : index
    %197 = vector.load %arg5[%c260, %c0_281] : memref<512x512xbf16, #tpu.memory_space<vmem>>, vector<4x512xbf16>
    tpu.vector_store %arg5[%c260, %c0_281], %196 {strides = array<i32>} : memref<512x512xbf16, #tpu.memory_space<vmem>>, vector<4x512xbf16>,
    %c0_282 = arith.constant 0 : index
    %c0_283 = arith.constant 0 : index
    %c0_284 = arith.constant 0 : index
    %c156_285 = arith.constant 156 : index
    %198 = vector.load %arg3[%c0_282, %c0_283, %c0_284, %c156_285] : memref<1x1x4x896xbf16, #tpu.memory_space<vmem>>, vector<1x1x4x512xbf16>
    %199 = vector.shape_cast %198 : vector<1x1x4x512xbf16> to vector<4x512xbf16>
    %c264 = arith.constant 264 : index
    %c0_286 = arith.constant 0 : index
    %200 = vector.load %arg5[%c264, %c0_286] : memref<512x512xbf16, #tpu.memory_space<vmem>>, vector<4x512xbf16>
    tpu.vector_store %arg5[%c264, %c0_286], %199 {strides = array<i32>} : memref<512x512xbf16, #tpu.memory_space<vmem>>, vector<4x512xbf16>,
    %c0_287 = arith.constant 0 : index
    %c0_288 = arith.constant 0 : index
    %c0_289 = arith.constant 0 : index
    %c157 = arith.constant 157 : index
    %201 = vector.load %arg3[%c0_287, %c0_288, %c0_289, %c157] : memref<1x1x4x896xbf16, #tpu.memory_space<vmem>>, vector<1x1x4x512xbf16>
    %202 = vector.shape_cast %201 : vector<1x1x4x512xbf16> to vector<4x512xbf16>
    %c268 = arith.constant 268 : index
    %c0_290 = arith.constant 0 : index
    %203 = vector.load %arg5[%c268, %c0_290] : memref<512x512xbf16, #tpu.memory_space<vmem>>, vector<4x512xbf16>
    tpu.vector_store %arg5[%c268, %c0_290], %202 {strides = array<i32>} : memref<512x512xbf16, #tpu.memory_space<vmem>>, vector<4x512xbf16>,
    %c0_291 = arith.constant 0 : index
    %c0_292 = arith.constant 0 : index
    %c0_293 = arith.constant 0 : index
    %c158 = arith.constant 158 : index
    %204 = vector.load %arg3[%c0_291, %c0_292, %c0_293, %c158] : memref<1x1x4x896xbf16, #tpu.memory_space<vmem>>, vector<1x1x4x512xbf16>
    %205 = vector.shape_cast %204 : vector<1x1x4x512xbf16> to vector<4x512xbf16>
    %c272 = arith.constant 272 : index
    %c0_294 = arith.constant 0 : index
    %206 = vector.load %arg5[%c272, %c0_294] : memref<512x512xbf16, #tpu.memory_space<vmem>>, vector<4x512xbf16>
    tpu.vector_store %arg5[%c272, %c0_294], %205 {strides = array<i32>} : memref<512x512xbf16, #tpu.memory_space<vmem>>, vector<4x512xbf16>,
    %c0_295 = arith.constant 0 : index
    %c0_296 = arith.constant 0 : index
    %c0_297 = arith.constant 0 : index
    %c159 = arith.constant 159 : index
    %207 = vector.load %arg3[%c0_295, %c0_296, %c0_297, %c159] : memref<1x1x4x896xbf16, #tpu.memory_space<vmem>>, vector<1x1x4x512xbf16>
    %208 = vector.shape_cast %207 : vector<1x1x4x512xbf16> to vector<4x512xbf16>
    %c276 = arith.constant 276 : index
    %c0_298 = arith.constant 0 : index
    %209 = vector.load %arg5[%c276, %c0_298] : memref<512x512xbf16, #tpu.memory_space<vmem>>, vector<4x512xbf16>
    tpu.vector_store %arg5[%c276, %c0_298], %208 {strides = array<i32>} : memref<512x512xbf16, #tpu.memory_space<vmem>>, vector<4x512xbf16>,
    %c0_299 = arith.constant 0 : index
    %c0_300 = arith.constant 0 : index
    %c0_301 = arith.constant 0 : index
    %c160_302 = arith.constant 160 : index
    %210 = vector.load %arg3[%c0_299, %c0_300, %c0_301, %c160_302] : memref<1x1x4x896xbf16, #tpu.memory_space<vmem>>, vector<1x1x4x512xbf16>
    %211 = vector.shape_cast %210 : vector<1x1x4x512xbf16> to vector<4x512xbf16>
    %c280 = arith.constant 280 : index
    %c0_303 = arith.constant 0 : index
    %212 = vector.load %arg5[%c280, %c0_303] : memref<512x512xbf16, #tpu.memory_space<vmem>>, vector<4x512xbf16>
    tpu.vector_store %arg5[%c280, %c0_303], %211 {strides = array<i32>} : memref<512x512xbf16, #tpu.memory_space<vmem>>, vector<4x512xbf16>,
    %c0_304 = arith.constant 0 : index
    %c0_305 = arith.constant 0 : index
    %c0_306 = arith.constant 0 : index
    %c161 = arith.constant 161 : index
    %213 = vector.load %arg3[%c0_304, %c0_305, %c0_306, %c161] : memref<1x1x4x896xbf16, #tpu.memory_space<vmem>>, vector<1x1x4x512xbf16>
    %214 = vector.shape_cast %213 : vector<1x1x4x512xbf16> to vector<4x512xbf16>
    %c284 = arith.constant 284 : index
    %c0_307 = arith.constant 0 : index
    %215 = vector.load %arg5[%c284, %c0_307] : memref<512x512xbf16, #tpu.memory_space<vmem>>, vector<4x512xbf16>
    tpu.vector_store %arg5[%c284, %c0_307], %214 {strides = array<i32>} : memref<512x512xbf16, #tpu.memory_space<vmem>>, vector<4x512xbf16>,
    %c0_308 = arith.constant 0 : index
    %c0_309 = arith.constant 0 : index
    %c0_310 = arith.constant 0 : index
    %c162 = arith.constant 162 : index
    %216 = vector.load %arg3[%c0_308, %c0_309, %c0_310, %c162] : memref<1x1x4x896xbf16, #tpu.memory_space<vmem>>, vector<1x1x4x512xbf16>
    %217 = vector.shape_cast %216 : vector<1x1x4x512xbf16> to vector<4x512xbf16>
    %c288 = arith.constant 288 : index
    %c0_311 = arith.constant 0 : index
    %218 = vector.load %arg5[%c288, %c0_311] : memref<512x512xbf16, #tpu.memory_space<vmem>>, vector<4x512xbf16>
    tpu.vector_store %arg5[%c288, %c0_311], %217 {strides = array<i32>} : memref<512x512xbf16, #tpu.memory_space<vmem>>, vector<4x512xbf16>,
    %c0_312 = arith.constant 0 : index
    %c0_313 = arith.constant 0 : index
    %c0_314 = arith.constant 0 : index
    %c163 = arith.constant 163 : index
    %219 = vector.load %arg3[%c0_312, %c0_313, %c0_314, %c163] : memref<1x1x4x896xbf16, #tpu.memory_space<vmem>>, vector<1x1x4x512xbf16>
    %220 = vector.shape_cast %219 : vector<1x1x4x512xbf16> to vector<4x512xbf16>
    %c292 = arith.constant 292 : index
    %c0_315 = arith.constant 0 : index
    %221 = vector.load %arg5[%c292, %c0_315] : memref<512x512xbf16, #tpu.memory_space<vmem>>, vector<4x512xbf16>
    tpu.vector_store %arg5[%c292, %c0_315], %220 {strides = array<i32>} : memref<512x512xbf16, #tpu.memory_space<vmem>>, vector<4x512xbf16>,
    %c0_316 = arith.constant 0 : index
    %c0_317 = arith.constant 0 : index
    %c0_318 = arith.constant 0 : index
    %c164_319 = arith.constant 164 : index
    %222 = vector.load %arg3[%c0_316, %c0_317, %c0_318, %c164_319] : memref<1x1x4x896xbf16, #tpu.memory_space<vmem>>, vector<1x1x4x512xbf16>
    %223 = vector.shape_cast %222 : vector<1x1x4x512xbf16> to vector<4x512xbf16>
    %c296 = arith.constant 296 : index
    %c0_320 = arith.constant 0 : index
    %224 = vector.load %arg5[%c296, %c0_320] : memref<512x512xbf16, #tpu.memory_space<vmem>>, vector<4x512xbf16>
    tpu.vector_store %arg5[%c296, %c0_320], %223 {strides = array<i32>} : memref<512x512xbf16, #tpu.memory_space<vmem>>, vector<4x512xbf16>,
    %c0_321 = arith.constant 0 : index
    %c0_322 = arith.constant 0 : index
    %c0_323 = arith.constant 0 : index
    %c165 = arith.constant 165 : index
    %225 = vector.load %arg3[%c0_321, %c0_322, %c0_323, %c165] : memref<1x1x4x896xbf16, #tpu.memory_space<vmem>>, vector<1x1x4x512xbf16>
    %226 = vector.shape_cast %225 : vector<1x1x4x512xbf16> to vector<4x512xbf16>
    %c300 = arith.constant 300 : index
    %c0_324 = arith.constant 0 : index
    %227 = vector.load %arg5[%c300, %c0_324] : memref<512x512xbf16, #tpu.memory_space<vmem>>, vector<4x512xbf16>
    tpu.vector_store %arg5[%c300, %c0_324], %226 {strides = array<i32>} : memref<512x512xbf16, #tpu.memory_space<vmem>>, vector<4x512xbf16>,
    %c0_325 = arith.constant 0 : index
    %c0_326 = arith.constant 0 : index
    %c0_327 = arith.constant 0 : index
    %c166 = arith.constant 166 : index
    %228 = vector.load %arg3[%c0_325, %c0_326, %c0_327, %c166] : memref<1x1x4x896xbf16, #tpu.memory_space<vmem>>, vector<1x1x4x512xbf16>
    %229 = vector.shape_cast %228 : vector<1x1x4x512xbf16> to vector<4x512xbf16>
    %c304 = arith.constant 304 : index
    %c0_328 = arith.constant 0 : index
    %230 = vector.load %arg5[%c304, %c0_328] : memref<512x512xbf16, #tpu.memory_space<vmem>>, vector<4x512xbf16>
    tpu.vector_store %arg5[%c304, %c0_328], %229 {strides = array<i32>} : memref<512x512xbf16, #tpu.memory_space<vmem>>, vector<4x512xbf16>,
    %c0_329 = arith.constant 0 : index
    %c0_330 = arith.constant 0 : index
    %c0_331 = arith.constant 0 : index
    %c182 = arith.constant 182 : index
    %231 = vector.load %arg3[%c0_329, %c0_330, %c0_331, %c182] : memref<1x1x4x896xbf16, #tpu.memory_space<vmem>>, vector<1x1x4x512xbf16>
    %232 = vector.shape_cast %231 : vector<1x1x4x512xbf16> to vector<4x512xbf16>
    %c308 = arith.constant 308 : index
    %c0_332 = arith.constant 0 : index
    %233 = vector.load %arg5[%c308, %c0_332] : memref<512x512xbf16, #tpu.memory_space<vmem>>, vector<4x512xbf16>
    tpu.vector_store %arg5[%c308, %c0_332], %232 {strides = array<i32>} : memref<512x512xbf16, #tpu.memory_space<vmem>>, vector<4x512xbf16>,
    %c0_333 = arith.constant 0 : index
    %c0_334 = arith.constant 0 : index
    %c0_335 = arith.constant 0 : index
    %c183 = arith.constant 183 : index
    %234 = vector.load %arg3[%c0_333, %c0_334, %c0_335, %c183] : memref<1x1x4x896xbf16, #tpu.memory_space<vmem>>, vector<1x1x4x512xbf16>
    %235 = vector.shape_cast %234 : vector<1x1x4x512xbf16> to vector<4x512xbf16>
    %c312 = arith.constant 312 : index
    %c0_336 = arith.constant 0 : index
    %236 = vector.load %arg5[%c312, %c0_336] : memref<512x512xbf16, #tpu.memory_space<vmem>>, vector<4x512xbf16>
    tpu.vector_store %arg5[%c312, %c0_336], %235 {strides = array<i32>} : memref<512x512xbf16, #tpu.memory_space<vmem>>, vector<4x512xbf16>,
    %c0_337 = arith.constant 0 : index
    %c0_338 = arith.constant 0 : index
    %c0_339 = arith.constant 0 : index
    %c184_340 = arith.constant 184 : index
    %237 = vector.load %arg3[%c0_337, %c0_338, %c0_339, %c184_340] : memref<1x1x4x896xbf16, #tpu.memory_space<vmem>>, vector<1x1x4x512xbf16>
    %238 = vector.shape_cast %237 : vector<1x1x4x512xbf16> to vector<4x512xbf16>
    %c316 = arith.constant 316 : index
    %c0_341 = arith.constant 0 : index
    %239 = vector.load %arg5[%c316, %c0_341] : memref<512x512xbf16, #tpu.memory_space<vmem>>, vector<4x512xbf16>
    tpu.vector_store %arg5[%c316, %c0_341], %238 {strides = array<i32>} : memref<512x512xbf16, #tpu.memory_space<vmem>>, vector<4x512xbf16>,
    %c0_342 = arith.constant 0 : index
    %c0_343 = arith.constant 0 : index
    %c0_344 = arith.constant 0 : index
    %c185 = arith.constant 185 : index
    %240 = vector.load %arg3[%c0_342, %c0_343, %c0_344, %c185] : memref<1x1x4x896xbf16, #tpu.memory_space<vmem>>, vector<1x1x4x512xbf16>
    %241 = vector.shape_cast %240 : vector<1x1x4x512xbf16> to vector<4x512xbf16>
    %c320 = arith.constant 320 : index
    %c0_345 = arith.constant 0 : index
    %242 = vector.load %arg5[%c320, %c0_345] : memref<512x512xbf16, #tpu.memory_space<vmem>>, vector<4x512xbf16>
    tpu.vector_store %arg5[%c320, %c0_345], %241 {strides = array<i32>} : memref<512x512xbf16, #tpu.memory_space<vmem>>, vector<4x512xbf16>,
    %c0_346 = arith.constant 0 : index
    %c0_347 = arith.constant 0 : index
    %c0_348 = arith.constant 0 : index
    %c186 = arith.constant 186 : index
    %243 = vector.load %arg3[%c0_346, %c0_347, %c0_348, %c186] : memref<1x1x4x896xbf16, #tpu.memory_space<vmem>>, vector<1x1x4x512xbf16>
    %244 = vector.shape_cast %243 : vector<1x1x4x512xbf16> to vector<4x512xbf16>
    %c324 = arith.constant 324 : index
    %c0_349 = arith.constant 0 : index
    %245 = vector.load %arg5[%c324, %c0_349] : memref<512x512xbf16, #tpu.memory_space<vmem>>, vector<4x512xbf16>
    tpu.vector_store %arg5[%c324, %c0_349], %244 {strides = array<i32>} : memref<512x512xbf16, #tpu.memory_space<vmem>>, vector<4x512xbf16>,
    %c0_350 = arith.constant 0 : index
    %c0_351 = arith.constant 0 : index
    %c0_352 = arith.constant 0 : index
    %c187 = arith.constant 187 : index
    %246 = vector.load %arg3[%c0_350, %c0_351, %c0_352, %c187] : memref<1x1x4x896xbf16, #tpu.memory_space<vmem>>, vector<1x1x4x512xbf16>
    %247 = vector.shape_cast %246 : vector<1x1x4x512xbf16> to vector<4x512xbf16>
    %c328 = arith.constant 328 : index
    %c0_353 = arith.constant 0 : index
    %248 = vector.load %arg5[%c328, %c0_353] : memref<512x512xbf16, #tpu.memory_space<vmem>>, vector<4x512xbf16>
    tpu.vector_store %arg5[%c328, %c0_353], %247 {strides = array<i32>} : memref<512x512xbf16, #tpu.memory_space<vmem>>, vector<4x512xbf16>,
    %c0_354 = arith.constant 0 : index
    %c0_355 = arith.constant 0 : index
    %c0_356 = arith.constant 0 : index
    %c188_357 = arith.constant 188 : index
    %249 = vector.load %arg3[%c0_354, %c0_355, %c0_356, %c188_357] : memref<1x1x4x896xbf16, #tpu.memory_space<vmem>>, vector<1x1x4x512xbf16>
    %250 = vector.shape_cast %249 : vector<1x1x4x512xbf16> to vector<4x512xbf16>
    %c332 = arith.constant 332 : index
    %c0_358 = arith.constant 0 : index
    %251 = vector.load %arg5[%c332, %c0_358] : memref<512x512xbf16, #tpu.memory_space<vmem>>, vector<4x512xbf16>
    tpu.vector_store %arg5[%c332, %c0_358], %250 {strides = array<i32>} : memref<512x512xbf16, #tpu.memory_space<vmem>>, vector<4x512xbf16>,
    %c0_359 = arith.constant 0 : index
    %c0_360 = arith.constant 0 : index
    %c0_361 = arith.constant 0 : index
    %c189 = arith.constant 189 : index
    %252 = vector.load %arg3[%c0_359, %c0_360, %c0_361, %c189] : memref<1x1x4x896xbf16, #tpu.memory_space<vmem>>, vector<1x1x4x512xbf16>
    %253 = vector.shape_cast %252 : vector<1x1x4x512xbf16> to vector<4x512xbf16>
    %c336 = arith.constant 336 : index
    %c0_362 = arith.constant 0 : index
    %254 = vector.load %arg5[%c336, %c0_362] : memref<512x512xbf16, #tpu.memory_space<vmem>>, vector<4x512xbf16>
    tpu.vector_store %arg5[%c336, %c0_362], %253 {strides = array<i32>} : memref<512x512xbf16, #tpu.memory_space<vmem>>, vector<4x512xbf16>,
    %c0_363 = arith.constant 0 : index
    %c0_364 = arith.constant 0 : index
    %c0_365 = arith.constant 0 : index
    %c190 = arith.constant 190 : index
    %255 = vector.load %arg3[%c0_363, %c0_364, %c0_365, %c190] : memref<1x1x4x896xbf16, #tpu.memory_space<vmem>>, vector<1x1x4x512xbf16>
    %256 = vector.shape_cast %255 : vector<1x1x4x512xbf16> to vector<4x512xbf16>
    %c340 = arith.constant 340 : index
    %c0_366 = arith.constant 0 : index
    %257 = vector.load %arg5[%c340, %c0_366] : memref<512x512xbf16, #tpu.memory_space<vmem>>, vector<4x512xbf16>
    tpu.vector_store %arg5[%c340, %c0_366], %256 {strides = array<i32>} : memref<512x512xbf16, #tpu.memory_space<vmem>>, vector<4x512xbf16>,
    %c0_367 = arith.constant 0 : index
    %c0_368 = arith.constant 0 : index
    %c0_369 = arith.constant 0 : index
    %c191 = arith.constant 191 : index
    %258 = vector.load %arg3[%c0_367, %c0_368, %c0_369, %c191] : memref<1x1x4x896xbf16, #tpu.memory_space<vmem>>, vector<1x1x4x512xbf16>
    %259 = vector.shape_cast %258 : vector<1x1x4x512xbf16> to vector<4x512xbf16>
    %c344 = arith.constant 344 : index
    %c0_370 = arith.constant 0 : index
    %260 = vector.load %arg5[%c344, %c0_370] : memref<512x512xbf16, #tpu.memory_space<vmem>>, vector<4x512xbf16>
    tpu.vector_store %arg5[%c344, %c0_370], %259 {strides = array<i32>} : memref<512x512xbf16, #tpu.memory_space<vmem>>, vector<4x512xbf16>,
    %c0_371 = arith.constant 0 : index
    %c0_372 = arith.constant 0 : index
    %c0_373 = arith.constant 0 : index
    %c192_374 = arith.constant 192 : index
    %261 = vector.load %arg3[%c0_371, %c0_372, %c0_373, %c192_374] : memref<1x1x4x896xbf16, #tpu.memory_space<vmem>>, vector<1x1x4x512xbf16>
    %262 = vector.shape_cast %261 : vector<1x1x4x512xbf16> to vector<4x512xbf16>
    %c348 = arith.constant 348 : index
    %c0_375 = arith.constant 0 : index
    %263 = vector.load %arg5[%c348, %c0_375] : memref<512x512xbf16, #tpu.memory_space<vmem>>, vector<4x512xbf16>
    tpu.vector_store %arg5[%c348, %c0_375], %262 {strides = array<i32>} : memref<512x512xbf16, #tpu.memory_space<vmem>>, vector<4x512xbf16>,
    %c0_376 = arith.constant 0 : index
    %c0_377 = arith.constant 0 : index
    %c0_378 = arith.constant 0 : index
    %c208_379 = arith.constant 208 : index
    %264 = vector.load %arg3[%c0_376, %c0_377, %c0_378, %c208_379] : memref<1x1x4x896xbf16, #tpu.memory_space<vmem>>, vector<1x1x4x512xbf16>
    %265 = vector.shape_cast %264 : vector<1x1x4x512xbf16> to vector<4x512xbf16>
    %c352 = arith.constant 352 : index
    %c0_380 = arith.constant 0 : index
    %266 = vector.load %arg5[%c352, %c0_380] : memref<512x512xbf16, #tpu.memory_space<vmem>>, vector<4x512xbf16>
    tpu.vector_store %arg5[%c352, %c0_380], %265 {strides = array<i32>} : memref<512x512xbf16, #tpu.memory_space<vmem>>, vector<4x512xbf16>,
    %c0_381 = arith.constant 0 : index
    %c0_382 = arith.constant 0 : index
    %c0_383 = arith.constant 0 : index
    %c209 = arith.constant 209 : index
    %267 = vector.load %arg3[%c0_381, %c0_382, %c0_383, %c209] : memref<1x1x4x896xbf16, #tpu.memory_space<vmem>>, vector<1x1x4x512xbf16>
    %268 = vector.shape_cast %267 : vector<1x1x4x512xbf16> to vector<4x512xbf16>
    %c356 = arith.constant 356 : index
    %c0_384 = arith.constant 0 : index
    %269 = vector.load %arg5[%c356, %c0_384] : memref<512x512xbf16, #tpu.memory_space<vmem>>, vector<4x512xbf16>
    tpu.vector_store %arg5[%c356, %c0_384], %268 {strides = array<i32>} : memref<512x512xbf16, #tpu.memory_space<vmem>>, vector<4x512xbf16>,
    %c0_385 = arith.constant 0 : index
    %c0_386 = arith.constant 0 : index
    %c0_387 = arith.constant 0 : index
    %c210 = arith.constant 210 : index
    %270 = vector.load %arg3[%c0_385, %c0_386, %c0_387, %c210] : memref<1x1x4x896xbf16, #tpu.memory_space<vmem>>, vector<1x1x4x512xbf16>
    %271 = vector.shape_cast %270 : vector<1x1x4x512xbf16> to vector<4x512xbf16>
    %c360 = arith.constant 360 : index
    %c0_388 = arith.constant 0 : index
    %272 = vector.load %arg5[%c360, %c0_388] : memref<512x512xbf16, #tpu.memory_space<vmem>>, vector<4x512xbf16>
    tpu.vector_store %arg5[%c360, %c0_388], %271 {strides = array<i32>} : memref<512x512xbf16, #tpu.memory_space<vmem>>, vector<4x512xbf16>,
    %c0_389 = arith.constant 0 : index
    %c0_390 = arith.constant 0 : index
    %c0_391 = arith.constant 0 : index
    %c211 = arith.constant 211 : index
    %273 = vector.load %arg3[%c0_389, %c0_390, %c0_391, %c211] : memref<1x1x4x896xbf16, #tpu.memory_space<vmem>>, vector<1x1x4x512xbf16>
    %274 = vector.shape_cast %273 : vector<1x1x4x512xbf16> to vector<4x512xbf16>
    %c364 = arith.constant 364 : index
    %c0_392 = arith.constant 0 : index
    %275 = vector.load %arg5[%c364, %c0_392] : memref<512x512xbf16, #tpu.memory_space<vmem>>, vector<4x512xbf16>
    tpu.vector_store %arg5[%c364, %c0_392], %274 {strides = array<i32>} : memref<512x512xbf16, #tpu.memory_space<vmem>>, vector<4x512xbf16>,
    %c0_393 = arith.constant 0 : index
    %c0_394 = arith.constant 0 : index
    %c0_395 = arith.constant 0 : index
    %c212_396 = arith.constant 212 : index
    %276 = vector.load %arg3[%c0_393, %c0_394, %c0_395, %c212_396] : memref<1x1x4x896xbf16, #tpu.memory_space<vmem>>, vector<1x1x4x512xbf16>
    %277 = vector.shape_cast %276 : vector<1x1x4x512xbf16> to vector<4x512xbf16>
    %c368 = arith.constant 368 : index
    %c0_397 = arith.constant 0 : index
    %278 = vector.load %arg5[%c368, %c0_397] : memref<512x512xbf16, #tpu.memory_space<vmem>>, vector<4x512xbf16>
    tpu.vector_store %arg5[%c368, %c0_397], %277 {strides = array<i32>} : memref<512x512xbf16, #tpu.memory_space<vmem>>, vector<4x512xbf16>,
    %c0_398 = arith.constant 0 : index
    %c0_399 = arith.constant 0 : index
    %c0_400 = arith.constant 0 : index
    %c213 = arith.constant 213 : index
    %279 = vector.load %arg3[%c0_398, %c0_399, %c0_400, %c213] : memref<1x1x4x896xbf16, #tpu.memory_space<vmem>>, vector<1x1x4x512xbf16>
    %280 = vector.shape_cast %279 : vector<1x1x4x512xbf16> to vector<4x512xbf16>
    %c372 = arith.constant 372 : index
    %c0_401 = arith.constant 0 : index
    %281 = vector.load %arg5[%c372, %c0_401] : memref<512x512xbf16, #tpu.memory_space<vmem>>, vector<4x512xbf16>
    tpu.vector_store %arg5[%c372, %c0_401], %280 {strides = array<i32>} : memref<512x512xbf16, #tpu.memory_space<vmem>>, vector<4x512xbf16>,
    %c0_402 = arith.constant 0 : index
    %c0_403 = arith.constant 0 : index
    %c0_404 = arith.constant 0 : index
    %c214 = arith.constant 214 : index
    %282 = vector.load %arg3[%c0_402, %c0_403, %c0_404, %c214] : memref<1x1x4x896xbf16, #tpu.memory_space<vmem>>, vector<1x1x4x512xbf16>
    %283 = vector.shape_cast %282 : vector<1x1x4x512xbf16> to vector<4x512xbf16>
    %c376 = arith.constant 376 : index
    %c0_405 = arith.constant 0 : index
    %284 = vector.load %arg5[%c376, %c0_405] : memref<512x512xbf16, #tpu.memory_space<vmem>>, vector<4x512xbf16>
    tpu.vector_store %arg5[%c376, %c0_405], %283 {strides = array<i32>} : memref<512x512xbf16, #tpu.memory_space<vmem>>, vector<4x512xbf16>,
    %c0_406 = arith.constant 0 : index
    %c0_407 = arith.constant 0 : index
    %c0_408 = arith.constant 0 : index
    %c215 = arith.constant 215 : index
    %285 = vector.load %arg3[%c0_406, %c0_407, %c0_408, %c215] : memref<1x1x4x896xbf16, #tpu.memory_space<vmem>>, vector<1x1x4x512xbf16>
    %286 = vector.shape_cast %285 : vector<1x1x4x512xbf16> to vector<4x512xbf16>
    %c380 = arith.constant 380 : index
    %c0_409 = arith.constant 0 : index
    %287 = vector.load %arg5[%c380, %c0_409] : memref<512x512xbf16, #tpu.memory_space<vmem>>, vector<4x512xbf16>
    tpu.vector_store %arg5[%c380, %c0_409], %286 {strides = array<i32>} : memref<512x512xbf16, #tpu.memory_space<vmem>>, vector<4x512xbf16>,
    %c0_410 = arith.constant 0 : index
    %c0_411 = arith.constant 0 : index
    %c0_412 = arith.constant 0 : index
    %c216_413 = arith.constant 216 : index
    %288 = vector.load %arg3[%c0_410, %c0_411, %c0_412, %c216_413] : memref<1x1x4x896xbf16, #tpu.memory_space<vmem>>, vector<1x1x4x512xbf16>
    %289 = vector.shape_cast %288 : vector<1x1x4x512xbf16> to vector<4x512xbf16>
    %c384 = arith.constant 384 : index
    %c0_414 = arith.constant 0 : index
    %290 = vector.load %arg5[%c384, %c0_414] : memref<512x512xbf16, #tpu.memory_space<vmem>>, vector<4x512xbf16>
    tpu.vector_store %arg5[%c384, %c0_414], %289 {strides = array<i32>} : memref<512x512xbf16, #tpu.memory_space<vmem>>, vector<4x512xbf16>,
    %c0_415 = arith.constant 0 : index
    %c0_416 = arith.constant 0 : index
    %c0_417 = arith.constant 0 : index
    %c217 = arith.constant 217 : index
    %291 = vector.load %arg3[%c0_415, %c0_416, %c0_417, %c217] : memref<1x1x4x896xbf16, #tpu.memory_space<vmem>>, vector<1x1x4x512xbf16>
    %292 = vector.shape_cast %291 : vector<1x1x4x512xbf16> to vector<4x512xbf16>
    %c388 = arith.constant 388 : index
    %c0_418 = arith.constant 0 : index
    %293 = vector.load %arg5[%c388, %c0_418] : memref<512x512xbf16, #tpu.memory_space<vmem>>, vector<4x512xbf16>
    tpu.vector_store %arg5[%c388, %c0_418], %292 {strides = array<i32>} : memref<512x512xbf16, #tpu.memory_space<vmem>>, vector<4x512xbf16>,
    %c0_419 = arith.constant 0 : index
    %c0_420 = arith.constant 0 : index
    %c0_421 = arith.constant 0 : index
    %c218 = arith.constant 218 : index
    %294 = vector.load %arg3[%c0_419, %c0_420, %c0_421, %c218] : memref<1x1x4x896xbf16, #tpu.memory_space<vmem>>, vector<1x1x4x512xbf16>
    %295 = vector.shape_cast %294 : vector<1x1x4x512xbf16> to vector<4x512xbf16>
    %c392 = arith.constant 392 : index
    %c0_422 = arith.constant 0 : index
    %296 = vector.load %arg5[%c392, %c0_422] : memref<512x512xbf16, #tpu.memory_space<vmem>>, vector<4x512xbf16>
    tpu.vector_store %arg5[%c392, %c0_422], %295 {strides = array<i32>} : memref<512x512xbf16, #tpu.memory_space<vmem>>, vector<4x512xbf16>,
    %c0_423 = arith.constant 0 : index
    %c0_424 = arith.constant 0 : index
    %c0_425 = arith.constant 0 : index
    %c234 = arith.constant 234 : index
    %297 = vector.load %arg3[%c0_423, %c0_424, %c0_425, %c234] : memref<1x1x4x896xbf16, #tpu.memory_space<vmem>>, vector<1x1x4x512xbf16>
    %298 = vector.shape_cast %297 : vector<1x1x4x512xbf16> to vector<4x512xbf16>
    %c396 = arith.constant 396 : index
    %c0_426 = arith.constant 0 : index
    %299 = vector.load %arg5[%c396, %c0_426] : memref<512x512xbf16, #tpu.memory_space<vmem>>, vector<4x512xbf16>
    tpu.vector_store %arg5[%c396, %c0_426], %298 {strides = array<i32>} : memref<512x512xbf16, #tpu.memory_space<vmem>>, vector<4x512xbf16>,
    %c0_427 = arith.constant 0 : index
    %c0_428 = arith.constant 0 : index
    %c0_429 = arith.constant 0 : index
    %c235 = arith.constant 235 : index
    %300 = vector.load %arg3[%c0_427, %c0_428, %c0_429, %c235] : memref<1x1x4x896xbf16, #tpu.memory_space<vmem>>, vector<1x1x4x512xbf16>
    %301 = vector.shape_cast %300 : vector<1x1x4x512xbf16> to vector<4x512xbf16>
    %c400 = arith.constant 400 : index
    %c0_430 = arith.constant 0 : index
    %302 = vector.load %arg5[%c400, %c0_430] : memref<512x512xbf16, #tpu.memory_space<vmem>>, vector<4x512xbf16>
    tpu.vector_store %arg5[%c400, %c0_430], %301 {strides = array<i32>} : memref<512x512xbf16, #tpu.memory_space<vmem>>, vector<4x512xbf16>,
    %c0_431 = arith.constant 0 : index
    %c0_432 = arith.constant 0 : index
    %c0_433 = arith.constant 0 : index
    %c236_434 = arith.constant 236 : index
    %303 = vector.load %arg3[%c0_431, %c0_432, %c0_433, %c236_434] : memref<1x1x4x896xbf16, #tpu.memory_space<vmem>>, vector<1x1x4x512xbf16>
    %304 = vector.shape_cast %303 : vector<1x1x4x512xbf16> to vector<4x512xbf16>
    %c404 = arith.constant 404 : index
    %c0_435 = arith.constant 0 : index
    %305 = vector.load %arg5[%c404, %c0_435] : memref<512x512xbf16, #tpu.memory_space<vmem>>, vector<4x512xbf16>
    tpu.vector_store %arg5[%c404, %c0_435], %304 {strides = array<i32>} : memref<512x512xbf16, #tpu.memory_space<vmem>>, vector<4x512xbf16>,
    %c0_436 = arith.constant 0 : index
    %c0_437 = arith.constant 0 : index
    %c0_438 = arith.constant 0 : index
    %c237 = arith.constant 237 : index
    %306 = vector.load %arg3[%c0_436, %c0_437, %c0_438, %c237] : memref<1x1x4x896xbf16, #tpu.memory_space<vmem>>, vector<1x1x4x512xbf16>
    %307 = vector.shape_cast %306 : vector<1x1x4x512xbf16> to vector<4x512xbf16>
    %c408 = arith.constant 408 : index
    %c0_439 = arith.constant 0 : index
    %308 = vector.load %arg5[%c408, %c0_439] : memref<512x512xbf16, #tpu.memory_space<vmem>>, vector<4x512xbf16>
    tpu.vector_store %arg5[%c408, %c0_439], %307 {strides = array<i32>} : memref<512x512xbf16, #tpu.memory_space<vmem>>, vector<4x512xbf16>,
    %c0_440 = arith.constant 0 : index
    %c0_441 = arith.constant 0 : index
    %c0_442 = arith.constant 0 : index
    %c238 = arith.constant 238 : index
    %309 = vector.load %arg3[%c0_440, %c0_441, %c0_442, %c238] : memref<1x1x4x896xbf16, #tpu.memory_space<vmem>>, vector<1x1x4x512xbf16>
    %310 = vector.shape_cast %309 : vector<1x1x4x512xbf16> to vector<4x512xbf16>
    %c412 = arith.constant 412 : index
    %c0_443 = arith.constant 0 : index
    %311 = vector.load %arg5[%c412, %c0_443] : memref<512x512xbf16, #tpu.memory_space<vmem>>, vector<4x512xbf16>
    tpu.vector_store %arg5[%c412, %c0_443], %310 {strides = array<i32>} : memref<512x512xbf16, #tpu.memory_space<vmem>>, vector<4x512xbf16>,
    %c0_444 = arith.constant 0 : index
    %c0_445 = arith.constant 0 : index
    %c0_446 = arith.constant 0 : index
    %c239 = arith.constant 239 : index
    %312 = vector.load %arg3[%c0_444, %c0_445, %c0_446, %c239] : memref<1x1x4x896xbf16, #tpu.memory_space<vmem>>, vector<1x1x4x512xbf16>
    %313 = vector.shape_cast %312 : vector<1x1x4x512xbf16> to vector<4x512xbf16>
    %c416 = arith.constant 416 : index
    %c0_447 = arith.constant 0 : index
    %314 = vector.load %arg5[%c416, %c0_447] : memref<512x512xbf16, #tpu.memory_space<vmem>>, vector<4x512xbf16>
    tpu.vector_store %arg5[%c416, %c0_447], %313 {strides = array<i32>} : memref<512x512xbf16, #tpu.memory_space<vmem>>, vector<4x512xbf16>,
    %c0_448 = arith.constant 0 : index
    %c0_449 = arith.constant 0 : index
    %c0_450 = arith.constant 0 : index
    %c240_451 = arith.constant 240 : index
    %315 = vector.load %arg3[%c0_448, %c0_449, %c0_450, %c240_451] : memref<1x1x4x896xbf16, #tpu.memory_space<vmem>>, vector<1x1x4x512xbf16>
    %316 = vector.shape_cast %315 : vector<1x1x4x512xbf16> to vector<4x512xbf16>
    %c420 = arith.constant 420 : index
    %c0_452 = arith.constant 0 : index
    %317 = vector.load %arg5[%c420, %c0_452] : memref<512x512xbf16, #tpu.memory_space<vmem>>, vector<4x512xbf16>
    tpu.vector_store %arg5[%c420, %c0_452], %316 {strides = array<i32>} : memref<512x512xbf16, #tpu.memory_space<vmem>>, vector<4x512xbf16>,
    %c0_453 = arith.constant 0 : index
    %c0_454 = arith.constant 0 : index
    %c0_455 = arith.constant 0 : index
    %c241 = arith.constant 241 : index
    %318 = vector.load %arg3[%c0_453, %c0_454, %c0_455, %c241] : memref<1x1x4x896xbf16, #tpu.memory_space<vmem>>, vector<1x1x4x512xbf16>
    %319 = vector.shape_cast %318 : vector<1x1x4x512xbf16> to vector<4x512xbf16>
    %c424 = arith.constant 424 : index
    %c0_456 = arith.constant 0 : index
    %320 = vector.load %arg5[%c424, %c0_456] : memref<512x512xbf16, #tpu.memory_space<vmem>>, vector<4x512xbf16>
    tpu.vector_store %arg5[%c424, %c0_456], %319 {strides = array<i32>} : memref<512x512xbf16, #tpu.memory_space<vmem>>, vector<4x512xbf16>,
    %c0_457 = arith.constant 0 : index
    %c0_458 = arith.constant 0 : index
    %c0_459 = arith.constant 0 : index
    %c242 = arith.constant 242 : index
    %321 = vector.load %arg3[%c0_457, %c0_458, %c0_459, %c242] : memref<1x1x4x896xbf16, #tpu.memory_space<vmem>>, vector<1x1x4x512xbf16>
    %322 = vector.shape_cast %321 : vector<1x1x4x512xbf16> to vector<4x512xbf16>
    %c428 = arith.constant 428 : index
    %c0_460 = arith.constant 0 : index
    %323 = vector.load %arg5[%c428, %c0_460] : memref<512x512xbf16, #tpu.memory_space<vmem>>, vector<4x512xbf16>
    tpu.vector_store %arg5[%c428, %c0_460], %322 {strides = array<i32>} : memref<512x512xbf16, #tpu.memory_space<vmem>>, vector<4x512xbf16>,
    %c0_461 = arith.constant 0 : index
    %c0_462 = arith.constant 0 : index
    %c0_463 = arith.constant 0 : index
    %c243 = arith.constant 243 : index
    %324 = vector.load %arg3[%c0_461, %c0_462, %c0_463, %c243] : memref<1x1x4x896xbf16, #tpu.memory_space<vmem>>, vector<1x1x4x512xbf16>
    %325 = vector.shape_cast %324 : vector<1x1x4x512xbf16> to vector<4x512xbf16>
    %c432 = arith.constant 432 : index
    %c0_464 = arith.constant 0 : index
    %326 = vector.load %arg5[%c432, %c0_464] : memref<512x512xbf16, #tpu.memory_space<vmem>>, vector<4x512xbf16>
    tpu.vector_store %arg5[%c432, %c0_464], %325 {strides = array<i32>} : memref<512x512xbf16, #tpu.memory_space<vmem>>, vector<4x512xbf16>,
    %c0_465 = arith.constant 0 : index
    %c0_466 = arith.constant 0 : index
    %c0_467 = arith.constant 0 : index
    %c244_468 = arith.constant 244 : index
    %327 = vector.load %arg3[%c0_465, %c0_466, %c0_467, %c244_468] : memref<1x1x4x896xbf16, #tpu.memory_space<vmem>>, vector<1x1x4x512xbf16>
    %328 = vector.shape_cast %327 : vector<1x1x4x512xbf16> to vector<4x512xbf16>
    %c436 = arith.constant 436 : index
    %c0_469 = arith.constant 0 : index
    %329 = vector.load %arg5[%c436, %c0_469] : memref<512x512xbf16, #tpu.memory_space<vmem>>, vector<4x512xbf16>
    tpu.vector_store %arg5[%c436, %c0_469], %328 {strides = array<i32>} : memref<512x512xbf16, #tpu.memory_space<vmem>>, vector<4x512xbf16>,
    %c0_470 = arith.constant 0 : index
    %c0_471 = arith.constant 0 : index
    %c0_472 = arith.constant 0 : index
    %c260_473 = arith.constant 260 : index
    %330 = vector.load %arg3[%c0_470, %c0_471, %c0_472, %c260_473] : memref<1x1x4x896xbf16, #tpu.memory_space<vmem>>, vector<1x1x4x512xbf16>
    %331 = vector.shape_cast %330 : vector<1x1x4x512xbf16> to vector<4x512xbf16>
    %c440 = arith.constant 440 : index
    %c0_474 = arith.constant 0 : index
    %332 = vector.load %arg5[%c440, %c0_474] : memref<512x512xbf16, #tpu.memory_space<vmem>>, vector<4x512xbf16>
    tpu.vector_store %arg5[%c440, %c0_474], %331 {strides = array<i32>} : memref<512x512xbf16, #tpu.memory_space<vmem>>, vector<4x512xbf16>,
    %c0_475 = arith.constant 0 : index
    %c0_476 = arith.constant 0 : index
    %c0_477 = arith.constant 0 : index
    %c261 = arith.constant 261 : index
    %333 = vector.load %arg3[%c0_475, %c0_476, %c0_477, %c261] : memref<1x1x4x896xbf16, #tpu.memory_space<vmem>>, vector<1x1x4x512xbf16>
    %334 = vector.shape_cast %333 : vector<1x1x4x512xbf16> to vector<4x512xbf16>
    %c444 = arith.constant 444 : index
    %c0_478 = arith.constant 0 : index
    %335 = vector.load %arg5[%c444, %c0_478] : memref<512x512xbf16, #tpu.memory_space<vmem>>, vector<4x512xbf16>
    tpu.vector_store %arg5[%c444, %c0_478], %334 {strides = array<i32>} : memref<512x512xbf16, #tpu.memory_space<vmem>>, vector<4x512xbf16>,
    %c0_479 = arith.constant 0 : index
    %c0_480 = arith.constant 0 : index
    %c0_481 = arith.constant 0 : index
    %c262 = arith.constant 262 : index
    %336 = vector.load %arg3[%c0_479, %c0_480, %c0_481, %c262] : memref<1x1x4x896xbf16, #tpu.memory_space<vmem>>, vector<1x1x4x512xbf16>
    %337 = vector.shape_cast %336 : vector<1x1x4x512xbf16> to vector<4x512xbf16>
    %c448 = arith.constant 448 : index
    %c0_482 = arith.constant 0 : index
    %338 = vector.load %arg5[%c448, %c0_482] : memref<512x512xbf16, #tpu.memory_space<vmem>>, vector<4x512xbf16>
    tpu.vector_store %arg5[%c448, %c0_482], %337 {strides = array<i32>} : memref<512x512xbf16, #tpu.memory_space<vmem>>, vector<4x512xbf16>,
    %c0_483 = arith.constant 0 : index
    %c0_484 = arith.constant 0 : index
    %c0_485 = arith.constant 0 : index
    %c263 = arith.constant 263 : index
    %339 = vector.load %arg3[%c0_483, %c0_484, %c0_485, %c263] : memref<1x1x4x896xbf16, #tpu.memory_space<vmem>>, vector<1x1x4x512xbf16>
    %340 = vector.shape_cast %339 : vector<1x1x4x512xbf16> to vector<4x512xbf16>
    %c452 = arith.constant 452 : index
    %c0_486 = arith.constant 0 : index
    %341 = vector.load %arg5[%c452, %c0_486] : memref<512x512xbf16, #tpu.memory_space<vmem>>, vector<4x512xbf16>
    tpu.vector_store %arg5[%c452, %c0_486], %340 {strides = array<i32>} : memref<512x512xbf16, #tpu.memory_space<vmem>>, vector<4x512xbf16>,
    %c0_487 = arith.constant 0 : index
    %c0_488 = arith.constant 0 : index
    %c0_489 = arith.constant 0 : index
    %c264_490 = arith.constant 264 : index
    %342 = vector.load %arg3[%c0_487, %c0_488, %c0_489, %c264_490] : memref<1x1x4x896xbf16, #tpu.memory_space<vmem>>, vector<1x1x4x512xbf16>
    %343 = vector.shape_cast %342 : vector<1x1x4x512xbf16> to vector<4x512xbf16>
    %c456 = arith.constant 456 : index
    %c0_491 = arith.constant 0 : index
    %344 = vector.load %arg5[%c456, %c0_491] : memref<512x512xbf16, #tpu.memory_space<vmem>>, vector<4x512xbf16>
    tpu.vector_store %arg5[%c456, %c0_491], %343 {strides = array<i32>} : memref<512x512xbf16, #tpu.memory_space<vmem>>, vector<4x512xbf16>,
    %c0_492 = arith.constant 0 : index
    %c0_493 = arith.constant 0 : index
    %c0_494 = arith.constant 0 : index
    %c265 = arith.constant 265 : index
    %345 = vector.load %arg3[%c0_492, %c0_493, %c0_494, %c265] : memref<1x1x4x896xbf16, #tpu.memory_space<vmem>>, vector<1x1x4x512xbf16>
    %346 = vector.shape_cast %345 : vector<1x1x4x512xbf16> to vector<4x512xbf16>
    %c460 = arith.constant 460 : index
    %c0_495 = arith.constant 0 : index
    %347 = vector.load %arg5[%c460, %c0_495] : memref<512x512xbf16, #tpu.memory_space<vmem>>, vector<4x512xbf16>
    tpu.vector_store %arg5[%c460, %c0_495], %346 {strides = array<i32>} : memref<512x512xbf16, #tpu.memory_space<vmem>>, vector<4x512xbf16>,
    %c0_496 = arith.constant 0 : index
    %c0_497 = arith.constant 0 : index
    %c0_498 = arith.constant 0 : index
    %c266 = arith.constant 266 : index
    %348 = vector.load %arg3[%c0_496, %c0_497, %c0_498, %c266] : memref<1x1x4x896xbf16, #tpu.memory_space<vmem>>, vector<1x1x4x512xbf16>
    %349 = vector.shape_cast %348 : vector<1x1x4x512xbf16> to vector<4x512xbf16>
    %c464 = arith.constant 464 : index
    %c0_499 = arith.constant 0 : index
    %350 = vector.load %arg5[%c464, %c0_499] : memref<512x512xbf16, #tpu.memory_space<vmem>>, vector<4x512xbf16>
    tpu.vector_store %arg5[%c464, %c0_499], %349 {strides = array<i32>} : memref<512x512xbf16, #tpu.memory_space<vmem>>, vector<4x512xbf16>,
    %c0_500 = arith.constant 0 : index
    %c0_501 = arith.constant 0 : index
    %c0_502 = arith.constant 0 : index
    %c267 = arith.constant 267 : index
    %351 = vector.load %arg3[%c0_500, %c0_501, %c0_502, %c267] : memref<1x1x4x896xbf16, #tpu.memory_space<vmem>>, vector<1x1x4x512xbf16>
    %352 = vector.shape_cast %351 : vector<1x1x4x512xbf16> to vector<4x512xbf16>
    %c468 = arith.constant 468 : index
    %c0_503 = arith.constant 0 : index
    %353 = vector.load %arg5[%c468, %c0_503] : memref<512x512xbf16, #tpu.memory_space<vmem>>, vector<4x512xbf16>
    tpu.vector_store %arg5[%c468, %c0_503], %352 {strides = array<i32>} : memref<512x512xbf16, #tpu.memory_space<vmem>>, vector<4x512xbf16>,
    %c0_504 = arith.constant 0 : index
    %c0_505 = arith.constant 0 : index
    %c0_506 = arith.constant 0 : index
    %c268_507 = arith.constant 268 : index
    %354 = vector.load %arg3[%c0_504, %c0_505, %c0_506, %c268_507] : memref<1x1x4x896xbf16, #tpu.memory_space<vmem>>, vector<1x1x4x512xbf16>
    %355 = vector.shape_cast %354 : vector<1x1x4x512xbf16> to vector<4x512xbf16>
    %c472 = arith.constant 472 : index
    %c0_508 = arith.constant 0 : index
    %356 = vector.load %arg5[%c472, %c0_508] : memref<512x512xbf16, #tpu.memory_space<vmem>>, vector<4x512xbf16>
    tpu.vector_store %arg5[%c472, %c0_508], %355 {strides = array<i32>} : memref<512x512xbf16, #tpu.memory_space<vmem>>, vector<4x512xbf16>,
    %c0_509 = arith.constant 0 : index
    %c0_510 = arith.constant 0 : index
    %c0_511 = arith.constant 0 : index
    %c269 = arith.constant 269 : index
    %357 = vector.load %arg3[%c0_509, %c0_510, %c0_511, %c269] : memref<1x1x4x896xbf16, #tpu.memory_space<vmem>>, vector<1x1x4x512xbf16>
    %358 = vector.shape_cast %357 : vector<1x1x4x512xbf16> to vector<4x512xbf16>
    %c476 = arith.constant 476 : index
    %c0_512 = arith.constant 0 : index
    %359 = vector.load %arg5[%c476, %c0_512] : memref<512x512xbf16, #tpu.memory_space<vmem>>, vector<4x512xbf16>
    tpu.vector_store %arg5[%c476, %c0_512], %358 {strides = array<i32>} : memref<512x512xbf16, #tpu.memory_space<vmem>>, vector<4x512xbf16>,
    %c0_513 = arith.constant 0 : index
    %c0_514 = arith.constant 0 : index
    %c0_515 = arith.constant 0 : index
    %c270 = arith.constant 270 : index
    %360 = vector.load %arg3[%c0_513, %c0_514, %c0_515, %c270] : memref<1x1x4x896xbf16, #tpu.memory_space<vmem>>, vector<1x1x4x512xbf16>
    %361 = vector.shape_cast %360 : vector<1x1x4x512xbf16> to vector<4x512xbf16>
    %c480 = arith.constant 480 : index
    %c0_516 = arith.constant 0 : index
    %362 = vector.load %arg5[%c480, %c0_516] : memref<512x512xbf16, #tpu.memory_space<vmem>>, vector<4x512xbf16>
    tpu.vector_store %arg5[%c480, %c0_516], %361 {strides = array<i32>} : memref<512x512xbf16, #tpu.memory_space<vmem>>, vector<4x512xbf16>,
    %363 = tpu.iota {dimensions = array<i32: 0>} : vector<28x512xi32>
    %c0_i32 = arith.constant 0 : i32
    %364 = vector.broadcast %c0_i32 : i32 to vector<28x512xi32>
    %365 = arith.cmpi eq, %363, %364 : vector<28x512xi32>
    %366 = arith.extui %365 : vector<28x512xi1> to vector<28x512xi32>
    %367 = arith.sitofp %366 : vector<28x512xi32> to vector<28x512xf32>
    %368 = arith.truncf %367 : vector<28x512xf32> to vector<28x512xbf16>
    %c484 = arith.constant 484 : index
    %c0_517 = arith.constant 0 : index
    %369 = vector.load %arg5[%c484, %c0_517] : memref<512x512xbf16, #tpu.memory_space<vmem>>, vector<28x512xbf16>
    tpu.vector_store %arg5[%c484, %c0_517], %368 {strides = array<i32>} : memref<512x512xbf16, #tpu.memory_space<vmem>>, vector<28x512xbf16>,
    %c0_518 = arith.constant 0 : index
    %c0_519 = arith.constant 0 : index
    %370 = vector.load %arg2[%c0_518, %c0_519] : memref<8x512xbf16, #tpu.memory_space<vmem>>, vector<8x512xbf16>
    %c0_520 = arith.constant 0 : index
    %c0_521 = arith.constant 0 : index
    %371 = vector.load %arg5[%c0_520, %c0_521] : memref<512x512xbf16, #tpu.memory_space<vmem>>, vector<512x512xbf16>
    %cst = arith.constant dense<0.000000e+00> : vector<8x512xf32>
    %372 = tpu.matmul %370, %371, %cst {dimension_numbers = #tpu.dot_dimension_numbers<[1], [0], [0], [1], [0, 0, 1, 1], [], []>} : vector<8x512xbf16>, vector<512x512xbf16>, vector<8x512xf32> -> vector<8x512xf32>
    %c0_522 = arith.constant 0 : index
    %c0_523 = arith.constant 0 : index
    %c0_524 = arith.constant 0 : index
    %373 = vector.load %arg4[%c0_522, %c0_523, %c0_524] : memref<1x8x512xf32, #tpu.memory_space<vmem>>, vector<1x8x512xf32>
    %374 = vector.shape_cast %373 : vector<1x8x512xf32> to vector<8x512xf32>
    %375 = vector.shape_cast %372 : vector<8x512xf32> to vector<1x8x512xf32>
    tpu.vector_store %arg4[%c0_522, %c0_523, %c0_524], %375 {strides = array<i32>} : memref<1x8x512xf32, #tpu.memory_space<vmem>>, vector<1x8x512xf32>,
    return
  }
  func.func @transform_0(%arg0: i32, %arg1: i32) -> (i32, i32) {
    %c0_i32 = arith.constant 0 : i32
    %c0_i32_0 = arith.constant 0 : i32
    %c0_i32_1 = arith.constant 0 : i32
    return %c0_i32, %c0_i32_0 : i32, i32
  }
  func.func @transform_1(%arg0: i32, %arg1: i32) -> (i32, i32, i32, i32) {
    %c0_i32 = arith.constant 0 : i32
    %c0_i32_0 = arith.constant 0 : i32
    %c0_i32_1 = arith.constant 0 : i32
    return %arg0, %arg1, %c0_i32, %c0_i32_0 : i32, i32, i32, i32
  }
  func.func @transform_2(%arg0: i32, %arg1: i32) -> (i32, i32, i32) {
    %c0_i32 = arith.constant 0 : i32
    %c0_i32_0 = arith.constant 0 : i32
    return %arg0, %c0_i32, %arg1 : i32, i32, i32
  }
}

</mosaic_0001>

<bundles_post_ra>
// kernel: inception_block_v1.1
= control target key start
LH: loop header
LB: loop body
LE: loop exit
PB: predicated region body
PF: predicated region fallthrough
CT: control target
= control target key end

     0   :  { %s7278_s9 = smov 0   ;;  %s7280_s10 = smov 0   ;;  %s9222_s0 = inlined_call_operand.vmem [shape: bf16[8,512], index: 0, kind: input, shape index: {}]   ;;  %s9223_s1 = inlined_call_operand.vmem [shape: bf16[2,1,4,896], index: 1, kind: input, shape index: {}]   ;;  %s9224_s2 = inlined_call_operand.vmem [shape: f32[2,8,512], index: 2, kind: output, shape index: {}]  }
   0x1   :  { %9465 = sst [smem:[#allocation30_spill]] %s9223_s1  ;;  %s7282_s11 = smov 0  }
   0x2 LB: > { %9466 = sst [smem:[#allocation3_spill]] %s7186_s10  ;;  %s24_s12 = sadd.s32 1, %s7186_s10  ;;  %s7190_s11 = sphi %s7282_s11, %s12_s11   ;;  %s7186_s10 = sphi %s7280_s10, %s9731_s10   ;;  %s7182_s9 = sphi %s7278_s9, %s9730_s9  }
   0x3   : > { %9467 = sst [smem:[#allocation4_spill]] %s7190_s11  ;;  %p6609_p0 = scmp.ge.s32.totalorder %s7190_s11, 1 }
   0x4   : > { %p26_p1 = scmp.ge.s32.totalorder %s24_s12, 2  ;;  %p132_p2 = scmp.lt.s32.totalorder %s7190_s11, 3 }
   0x6   : > { %s9733_s12 = smov (%p26_p1, %s24_s12), 0  ;;  %p133_p3 = pnand %p6609_p0, %p132_p2 }
   0x7   : > { %9468 = sst [smem:[#allocation5_spill]] %s9733_s12 }
   0x8   : > { %136 = sbr.rel (%p133_p3) target bundleno = 1069 (0x42d), region = 28 }
   0xd   : > { %p162_p4 = scmp.lt.s32.totalorder %s7182_s9, 1  ;;  %v210_v0 = vlaneseq  ;;  %v7192_v1 = vmov 1983009808   ;;  %s9469_s1 = sld [smem:[#allocation30_spill]]  ;;  %vm238_vm0 = vcmask 1043456   ;;  %vm240_vm1 = vcmask 1039360  }
   0xe   : > { %v208_v2 = vunpack.c.l.s4 %v7192_v1  ;;  %s9225_s17 = smov 126   ;;  %s7194_s18 = smov 127   ;;  %vm9241_vm2 = vcmask 1031168   ;;  %vm9253_vm3 = vcmask 1022976   ;;  %vm9252_vm4 = vcmask 1014784  }
   0xf   : > { %s9735_s9 = smov (!%p162_p4, %s7182_s9), 1  ;;  %v7298_v3 = vshrl.u32 %v210_v0, 7  ;;  %s9233_s19 = smov 125   ;;  %vm9247_vm5 = vcmask 1006592   ;;  %vm9246_vm6 = vcmask 998400   ;;  %vm9265_vm7 = vcmask 990208  }
  0x10   : > { %v209_v4 = vunpack.c.0.s8 %v208_v2  ;;  %s6811_s13 = smul.u32 14, %s9735_s9  ;;  %s9231_s20 = smov 124   ;;  %vm9264_vm8 = vcmask 982016   ;;  %vm9261_vm9 = vcmask 973824   ;;  %vm9260_vm10 = vcmask 965632  }
  0x11   : > { %s9229_s21 = smov 123   ;;  %s9227_s22 = smov 122   ;;  %vm685_vm11 = vcmask 834560   ;;  %vm729_vm12 = vcmask 826368   ;;  %vm9271_vm13 = vcmask 818176   ;;  %vm9270_vm14 = vcmask 809984  }
  0x12   : > { %v7302_v5 = vsub.s32 %v209_v4, %v7298_v3  ;;  %s9242_s23 = smov 121   ;;  %s9239_s24 = smov 120   ;;  %vm9283_vm15 = vcmask 801792  }
  0x13   : > { %s7307_s16 = scalar_lea.vmem %s9469_s1, %s6811_s13  ;;  %s9237_s25 = smov 119  }
  0x14   : > { %v7310_v6 = vld.sshfl [vmem:[%s7307_s16 + $0x8] sm:$0x3 pattern:$0x76325410]  ;;  %v202_v7 = vld [vmem:[%s7307_s16] sm:$0xff]  ;;  %s9235_s26 = smov 118  }
  0x15   : > { %278 = vrot.lane.b32.xlu1 %v7310_v6, %s9225_s17  ;;  %v7316_v8 = vrot.slane %v202_v7, %v7302_v5  ;;  %v206_v9 = vcombine.low %v202_v7, %v202_v7  ;;  %v252_v11 = vcombine.high %v202_v7, %v202_v7  ;;  %v6909_v12 = vld [vmem:[%s7307_s16 + $0x8] ss:$0 sps:$4 sm:$0x33]   ;;  %v181_v16 = vld [vmem:[%s7307_s16] sm:$0xff]  ;;  %s7203_s27 = smov 102   ;;  %s7204_s28 = smov 101  }
  0x16   : > { %v228_v14 = vrot.slane %v6909_v12, %v7302_v5  ;;  %v6910_v15 = vld [vmem:[%s7307_s16 + $0x8] ss:$0 sps:$4 sm:$0x33]   ;;  %v183_v17 = vcombine.high %v181_v16, %v181_v16  ;;  %s9248_s29 = smov 100   ;;  %s9244_s30 = smov 99  }
  0x17   : > { %231 = vrot.lane.b32.xlu0 %v7316_v8, %s7194_s18  ;;  %v7320_v10 = vrot.slane %v206_v9, %v7302_v5  ;;  %v7327_v13 = vrot.slane %v252_v11, %v7302_v5  ;;  %6613 = vst.sshfl [vmem:[#allocation2] sm:$0xf pattern:$0x76325410] %v181_v16  ;;  %v318_v18 = vrot.slane %v6910_v15, %v7302_v5  ;;  %s9303_s3 = smov 98   ;;  %s9256_s4 = smov 97  }
  0x18   : > { %6614 = vst.sshfl [vmem:[#allocation2 + $0x8] sm:$0xf pattern:$0x76325410] %v183_v17  ;;  %s9254_s5 = smov 96   ;;  %s9250_s6 = smov 95  }
  0x19   : > { %274 = vrot.lane.b32.xlu1 %v7316_v8, %s9225_s17  ;;  %v6911_v19 = vld [vmem:[%s7307_s16 + $0x8] ss:$0 sps:$4 sm:$0x33]   ;;  %s9306_s7 = smov 94   ;;  %s9300_s8 = smov 93  }
  0x1a   : > { %v407_v20 = vrot.slane %v6911_v19, %v7302_v5  ;;  %v6912_v21 = vld [vmem:[%s7307_s16 + $0x8] ss:$0 sps:$4 sm:$0x33]   ;;  %s9305_s13 = smov 92   ;;  %s7214_s14 = smov 76  }
  0x1b   : > { %229 = vrot.lane.b32.xlu0 %v7320_v10, %s7194_s18  ;;  %v496_v22 = vrot.slane %v6912_v21, %v7302_v5  ;;  %v6913_v23 = vld [vmem:[%s7307_s16 + $0x8] ss:$0 sps:$4 sm:$0x33]   ;;  %s7215_s15 = smov 75   ;;  %s9513_s1 = smov 44  }
  0x1c   : > { %v585_v24 = vrot.slane %v6913_v23, %v7302_v5  ;;  %v6914_v25 = vld [vmem:[%s7307_s16 + $0x8] ss:$0 sps:$4 sm:$0x33]   ;;  %s9516_s12 = smov 43   ;;  %s9519_s10 = smov 41  }
  0x1d   : > { %321 = vrot.lane.b32.xlu1 %v7316_v8, %s9233_s19  ;;  %v674_v26 = vrot.slane %v6914_v25, %v7302_v5  ;;  %v6915_v27 = vld [vmem:[%s7307_s16 + $0x8] ss:$0 sps:$4 sm:$0x33]   ;;  %s9521_s11 = smov 46  }
  0x1e   : > { %v763_v28 = vrot.slane %v6915_v27, %v7302_v5  ;;  %v6916_v29 = vld [vmem:[%s7307_s16 + $0x8] ss:$0 sps:$4 sm:$0x33]  }
  0x1f   : > { %276 = vrot.lane.b32.xlu0 %v7327_v13, %s9225_s17  ;;  %v852_v30 = vrot.slane %v6916_v29, %v7302_v5  ;;  %v6917_v31 = vld [vmem:[%s7307_s16 + $0x8] ss:$0 sps:$4 sm:$0x33]   ;;  %s9312_s17 = smov 69  }
  0x20   : > { %v941_v32 = vrot.slane %v6917_v31, %v7302_v5  ;;  %v6918_v33 = vld [vmem:[%s7307_s16 + $0x8] ss:$0 sps:$4 sm:$0x33]  }
  0x21   : > { %233 = vrot.lane.b32.xlu1 %v228_v14, %s7194_s18  ;;  %v1030_v34 = vrot.slane %v6918_v33, %v7302_v5  ;;  %v6919_v38 = vld [vmem:[%s7307_s16 + $0x8] ss:$0 sps:$4 sm:$0x33]   ;;  %s9308_s18 = smov 74  }
  0x22   : > { %v1119_v43 = vrot.slane %v6919_v38, %v7302_v5  ;;  %v6920_v62 = vld [vmem:[%s7307_s16 + $0x8] ss:$0 sps:$4 sm:$0x33]  }
  0x23   : > { %319 = vrot.lane.b32.xlu0 %v7320_v10, %s9233_s19  ;;  %v1208_v7 = vrot.slane %v6920_v62, %v7302_v5 }
  0x25   : > { %363 = vrot.lane.b32.xlu1 %v7316_v8, %s9231_s20 }
  0x27   : > { %323 = vrot.lane.b32.xlu0 %v318_v18, %s9233_s19  ;;  %s7225_s19 = smov 50  }
  0x29   : > { %367 = vrot.lane.b32.xlu1 %v7310_v6, %s9231_s20 }
  0x2b   : > { %365 = vrot.lane.b32.xlu0 %v7327_v13, %s9231_s20  ;;  %s9315_s20 = smov 66  }
  0x2d   : > { %410 = vrot.lane.b32.xlu1 %v7316_v8, %s9229_s21 }
  0x2f   : > { %408 = vrot.lane.b32.xlu0 %v7320_v10, %s9229_s21 }
  0x31   : > { %452 = vrot.lane.b32.xlu1 %v7316_v8, %s9227_s22 }
  0x33   : > { %412 = vrot.lane.b32.xlu0 %v407_v20, %s9229_s21  ;;  %s9289_s21 = smov 67  }
  0x35   : > { %456 = vrot.lane.b32.xlu1 %v7310_v6, %s9227_s22 }
  0x37   : > { %454 = vrot.lane.b32.xlu0 %v7327_v13, %s9227_s22  ;;  %s9310_s22 = smov 68  }
  0x39   : > { %499 = vrot.lane.b32.xlu1 %v7316_v8, %s9242_s23 }
  0x3b   : > { %497 = vrot.lane.b32.xlu0 %v7320_v10, %s9242_s23 }
  0x3d   : > { %541 = vrot.lane.b32.xlu1 %v7316_v8, %s9239_s24 }
  0x3f   : > { %501 = vrot.lane.b32.xlu0 %v496_v22, %s9242_s23  ;;  %s9367_s23 = smov 44  }
  0x41   : > { %545 = vrot.lane.b32.xlu1 %v7310_v6, %s9239_s24 }
  0x43   : > { %543 = vrot.lane.b32.xlu0 %v7327_v13, %s9239_s24  ;;  %s9288_s24 = smov 45  }
  0x45   : > { %588 = vrot.lane.b32.xlu1 %v7316_v8, %s9237_s25 }
  0x47   : > { %586 = vrot.lane.b32.xlu0 %v7320_v10, %s9237_s25 }
  0x49   : > { %630 = vrot.lane.b32.xlu1 %v7316_v8, %s9235_s26 }
  0x4b   : > { %590 = vrot.lane.b32.xlu0 %v585_v24, %s9237_s25  ;;  %s9321_s25 = smov 46  }
  0x4d   : > { %634 = vrot.lane.b32.xlu1 %v7310_v6, %s9235_s26 }
  0x4f   : > { %632 = vrot.lane.b32.xlu0 %v7327_v13, %s9235_s26  ;;  %s7226_s26 = smov 49  }
  0x51   : > { %677 = vrot.lane.b32.xlu1 %v7316_v8, %s7203_s27 }
  0x53   : > { %675 = vrot.lane.b32.xlu0 %v7320_v10, %s7203_s27 }
  0x55   : > { %719 = vrot.lane.b32.xlu1 %v7316_v8, %s7204_s28 }
  0x57   : > { %679 = vrot.lane.b32.xlu0 %v674_v26, %s7203_s27  ;;  %v6921_v26 = vld [vmem:[%s7307_s16 + $0x8] ss:$0 sps:$4 sm:$0x33]   ;;  %s9309_s27 = smov 73  }
  0x59   : > { %723 = vrot.lane.b32.xlu1 %v7310_v6, %s7204_s28 }
  0x5b   : > { %721 = vrot.lane.b32.xlu0 %v7327_v13, %s7204_s28  ;;  %s9297_s28 = smov 72  }
  0x5d   : > { %766 = vrot.lane.b32.xlu1 %v7316_v8, %s9248_s29 }
  0x5f   : > { %764 = vrot.lane.b32.xlu0 %v7320_v10, %s9248_s29 }
  0x61   : > { %808 = vrot.lane.b32.xlu1 %v7316_v8, %s9244_s30 }
  0x63   : > { %768 = vrot.lane.b32.xlu0 %v763_v28, %s9248_s29  ;;  %s9365_s29 = smov 42  }
  0x65   : > { %812 = vrot.lane.b32.xlu1 %v7310_v6, %s9244_s30 }
  0x67   : > { %810 = vrot.lane.b32.xlu0 %v7327_v13, %s9244_s30  ;;  %s9363_s30 = smov 43  }
  0x69   : > { %855 = vrot.lane.b32.xlu1 %v7316_v8, %s9303_s3 }
  0x6b   : > { %853 = vrot.lane.b32.xlu0 %v7320_v10, %s9303_s3 }
  0x6d   : > { %897 = vrot.lane.b32.xlu1 %v7316_v8, %s9256_s4 }
  0x6f   : > { %857 = vrot.lane.b32.xlu0 %v852_v30, %s9303_s3 }
  0x71   : > { %901 = vrot.lane.b32.xlu1 %v7310_v6, %s9256_s4 }
  0x73   : > { %899 = vrot.lane.b32.xlu0 %v7327_v13, %s9256_s4  ;;  %s7236_s4 = smov 24  }
  0x75   : > { %944 = vrot.lane.b32.xlu1 %v7316_v8, %s9254_s5 }
  0x77   : > { %942 = vrot.lane.b32.xlu0 %v7320_v10, %s9254_s5 }
  0x79   : > { %986 = vrot.lane.b32.xlu1 %v7316_v8, %s9250_s6 }
  0x7b   : > { %946 = vrot.lane.b32.xlu0 %v941_v32, %s9254_s5  ;;  %v1297_v32 = vrot.slane %v6921_v26, %v7302_v5  ;;  %s9258_s5 = smov 40  }
  0x7d   : > { %990 = vrot.lane.b32.xlu1 %v7310_v6, %s9250_s6 }
  0x7f   : > { %988 = vrot.lane.b32.xlu0 %v7327_v13, %s9250_s6  ;;  %s9322_s6 = smov 41  }
  0x81   : > { %1033 = vrot.lane.b32.xlu1 %v7316_v8, %s9306_s7 }
  0x83   : > { %1031 = vrot.lane.b32.xlu0 %v7320_v10, %s9306_s7 }
  0x85   : > { %1075 = vrot.lane.b32.xlu1 %v7316_v8, %s9300_s8 }
  0x87   : > { %v279_v35 = vpop.permute.xlu1 %278  ;;  %1035 = vrot.lane.b32.xlu0 %v1030_v34, %s9306_s7 }
  0x88   : > { %v282_v47 = vrot.slane %v279_v35, 4 }
  0x89   : > { %1079 = vrot.lane.b32.xlu1 %v7310_v6, %s9300_s8  ;;  %v232_v36 = vpop.permute.xlu0 %231 }
  0x8a   : > { %v236_v40 = vrot.slane %v232_v36, 4 }
  0x8b   : > { %v275_v37 = vpop.permute.xlu1 %274  ;;  %1077 = vrot.lane.b32.xlu0 %v7327_v13, %s9300_s8 }
  0x8c   : > { %v280_v48 = vrot.slane %v275_v37, 4 }
  0x8d   : > { %1122 = vrot.lane.b32.xlu1 %v7316_v8, %s9305_s13  ;;  %v230_v39 = vpop.permute.xlu0 %229 }
  0x8e   : > { %v235_v41 = vrot.slane %v230_v39, 4 }
  0x8f   : > { %v322_v42 = vpop.permute.xlu1 %321  ;;  %1120 = vrot.lane.b32.xlu0 %v7320_v10, %s9305_s13 }
  0x90   : > { %v239_v44 = vsel %vm238_vm0, %v235_v41, %v236_v40  ;;  %v326_v57 = vrot.slane %v322_v42, 4 }
  0x91   : > { %v241_v45 = vsel %vm240_vm1, %v230_v39, %v239_v44  ;;  %1164 = vrot.lane.b32.xlu1 %v7316_v8, %s7214_s14  ;;  %v277_v46 = vpop.permute.xlu0 %276 }
  0x92   : > { %246 = vst [vmem:[#allocation2] sm:$0xcc] %v241_v45  ;;  %v281_v49 = vrot.slane %v277_v46, 4 }
  0x93   : > { %v234_v50 = vpop.permute.xlu1 %233  ;;  %1124 = vrot.lane.b32.xlu0 %v1119_v43, %s9305_s13 }
  0x94   : > { %v283_v51 = vsel %vm238_vm0, %v280_v48, %v281_v49  ;;  %v286_v52 = vsel %vm238_vm0, %v281_v49, %v282_v47  ;;  %v237_v53 = vrot.slane %v234_v50, 4  ;;  %v6922_v48 = vld [vmem:[%s7307_s16 + $0x8] ss:$0 sps:$4 sm:$0x33]  }
  0x95   : > { %v285_v54 = vsel %vm9241_vm2, %v275_v37, %v283_v51  ;;  %v287_v55 = vsel %vm9241_vm2, %v277_v46, %v286_v52  ;;  %1168 = vrot.lane.b32.xlu1 %v7310_v6, %s7214_s14  ;;  %v320_v56 = vpop.permute.xlu0 %319  ;;  %vm9286_vm2 = vcmask 769024  }
  0x96   : > { %290 = vst [vmem:[#allocation2 + $0x10] sm:$0x33] %v285_v54  ;;  %291 = vst [vmem:[#allocation2 + $0x18] sm:$0x33] %v287_v55  ;;  %v242_v58 = vsel %vm238_vm0, %v236_v40, %v237_v53  ;;  %v325_v59 = vrot.slane %v320_v56, 4  ;;  %v1386_v54 = vrot.slane %v6922_v48, %v7302_v5 }
  0x97   : > { %v243_v60 = vsel %vm240_vm1, %v232_v36, %v242_v58  ;;  %v364_v61 = vpop.permute.xlu1 %363  ;;  %1166 = vrot.lane.b32.xlu0 %v7327_v13, %s7214_s14  ;;  %s9314_s14 = smov 71   ;;  %vm9282_vm1 = vcmask 793600  }
  0x98   : > { %247 = vst [vmem:[#allocation2 + $0x8] sm:$0xcc] %v243_v60  ;;  %v328_v63 = vsel %vm238_vm0, %v325_v59, %v326_v57  ;;  %v369_v15 = vrot.slane %v364_v61, 4 }
  0x99   : > { %v330_v0 = vsel %vm9253_vm3, %v320_v56, %v328_v63  ;;  %1211 = vrot.lane.b32.xlu1 %v7316_v8, %s7215_s15  ;;  %v324_v1 = vpop.permute.xlu0 %323 }
  0x9a   : > { %335 = vst [vmem:[#allocation2 + $0x10] sm:$0xcc] %v330_v0  ;;  %v327_v2 = vrot.slane %v324_v1, 4 }
  0x9b   : > { %v368_v4 = vpop.permute.xlu1 %367  ;;  %1209 = vrot.lane.b32.xlu0 %v7320_v10, %s7215_s15 }
  0x9c   : > { %v331_v9 = vsel %vm238_vm0, %v326_v57, %v327_v2  ;;  %v371_v11 = vrot.slane %v368_v4, 4 }
  0x9d   : > { %v332_v12 = vsel %vm9253_vm3, %v322_v42, %v331_v9  ;;  %1253 = vrot.lane.b32.xlu1 %v7316_v8, %s9308_s18  ;;  %v366_v14 = vpop.permute.xlu0 %365  ;;  %vm1219_vm3 = vcmask 613376  }
  0x9e   : > { %336 = vst [vmem:[#allocation2 + $0x18] sm:$0xcc] %v332_v12  ;;  %v370_v16 = vrot.slane %v366_v14, 4 }
  0x9f   : > { %v411_v17 = vpop.permute.xlu1 %410  ;;  %1213 = vrot.lane.b32.xlu0 %v1208_v7, %s7215_s15  ;;  %s9294_s15 = smov 70  }
  0xa0   : > { %v372_v18 = vsel %vm238_vm0, %v369_v15, %v370_v16  ;;  %v375_v19 = vsel %vm238_vm0, %v370_v16, %v371_v11  ;;  %v415_v20 = vrot.slane %v411_v17, 4  ;;  %v6923_v11 = vld [vmem:[%s7307_s16 + $0x8] ss:$0 sps:$4 sm:$0x33]  }
  0xa1   : > { %v374_v21 = vsel %vm9252_vm4, %v364_v61, %v372_v18  ;;  %v376_v22 = vsel %vm9252_vm4, %v366_v14, %v375_v19  ;;  %1257 = vrot.lane.b32.xlu1 %v7310_v6, %s9308_s18  ;;  %v409_v23 = vpop.permute.xlu0 %408  ;;  %v1475_v18 = vrot.slane %v6923_v11, %v7302_v5  ;;  %vm1174_vm4 = vcmask 621568  }
  0xa2   : > { %379 = vst [vmem:[#allocation2 + $0x20] sm:$0x33] %v374_v21  ;;  %380 = vst [vmem:[#allocation2 + $0x28] sm:$0x33] %v376_v22  ;;  %v414_v24 = vrot.slane %v409_v23, 4 }
  0xa3   : > { %v453_v25 = vpop.permute.xlu1 %452  ;;  %1255 = vrot.lane.b32.xlu0 %v7327_v13, %s9308_s18 }
  0xa4   : > { %v417_v27 = vsel %vm238_vm0, %v414_v24, %v415_v20  ;;  %v458_v37 = vrot.slane %v453_v25, 4 }
  0xa5   : > { %v419_v28 = vsel %vm9247_vm5, %v409_v23, %v417_v27  ;;  %1300 = vrot.lane.b32.xlu1 %v7316_v8, %s9309_s27  ;;  %v413_v29 = vpop.permute.xlu0 %412 }
  0xa6   : > { %424 = vst [vmem:[#allocation2 + $0x20] sm:$0xcc] %v419_v28  ;;  %v416_v30 = vrot.slane %v413_v29, 4 }
  0xa7   : > { %v457_v31 = vpop.permute.xlu1 %456  ;;  %1298 = vrot.lane.b32.xlu0 %v7320_v10, %s9309_s27 }
  0xa8   : > { %v420_v33 = vsel %vm238_vm0, %v415_v20, %v416_v30  ;;  %v460_v34 = vrot.slane %v457_v31, 4 }
  0xa9   : > { %v421_v35 = vsel %vm9247_vm5, %v411_v17, %v420_v33  ;;  %1342 = vrot.lane.b32.xlu1 %v7316_v8, %s9297_s28  ;;  %v455_v36 = vpop.permute.xlu0 %454  ;;  %vm9284_vm5 = vcmask 752640  }
  0xaa   : > { %425 = vst [vmem:[#allocation2 + $0x28] sm:$0xcc] %v421_v35  ;;  %v459_v38 = vrot.slane %v455_v36, 4 }
  0xab   : > { %v500_v39 = vpop.permute.xlu1 %499  ;;  %1302 = vrot.lane.b32.xlu0 %v1297_v32, %s9309_s27 }
  0xac   : > { %v461_v40 = vsel %vm238_vm0, %v458_v37, %v459_v38  ;;  %v464_v41 = vsel %vm238_vm0, %v459_v38, %v460_v34  ;;  %v504_v42 = vrot.slane %v500_v39, 4  ;;  %v6924_v34 = vld [vmem:[%s7307_s16 + $0x8] ss:$0 sps:$4 sm:$0x33]  }
  0xad   : > { %v463_v43 = vsel %vm9246_vm6, %v453_v25, %v461_v40  ;;  %v465_v44 = vsel %vm9246_vm6, %v455_v36, %v464_v41  ;;  %1346 = vrot.lane.b32.xlu1 %v7310_v6, %s9297_s28  ;;  %v498_v45 = vpop.permute.xlu0 %497  ;;  %v1564_v40 = vrot.slane %v6924_v34, %v7302_v5  ;;  %vm9285_vm6 = vcmask 760832  }
  0xae   : > { %468 = vst [vmem:[#allocation2 + $0x30] sm:$0x33] %v463_v43  ;;  %469 = vst [vmem:[#allocation2 + $0x38] sm:$0x33] %v465_v44  ;;  %v503_v46 = vrot.slane %v498_v45, 4 }
  0xaf   : > { %v542_v47 = vpop.permute.xlu1 %541  ;;  %1344 = vrot.lane.b32.xlu0 %v7327_v13, %s9297_s28 }
  0xb0   : > { %v506_v49 = vsel %vm238_vm0, %v503_v46, %v504_v42  ;;  %v547_v59 = vrot.slane %v542_v47, 4 }
  0xb1   : > { %v508_v50 = vsel %vm9265_vm7, %v498_v45, %v506_v49  ;;  %1389 = vrot.lane.b32.xlu1 %v7316_v8, %s9314_s14  ;;  %v502_v51 = vpop.permute.xlu0 %501 }
  0xb2   : > { %513 = vst [vmem:[#allocation2 + $0x30] sm:$0xcc] %v508_v50  ;;  %v505_v52 = vrot.slane %v502_v51, 4 }
  0xb3   : > { %v546_v53 = vpop.permute.xlu1 %545  ;;  %1387 = vrot.lane.b32.xlu0 %v7320_v10, %s9314_s14 }
  0xb4   : > { %v509_v55 = vsel %vm238_vm0, %v504_v42, %v505_v52  ;;  %v549_v56 = vrot.slane %v546_v53, 4 }
  0xb5   : > { %v510_v57 = vsel %vm9265_vm7, %v500_v39, %v509_v55  ;;  %1431 = vrot.lane.b32.xlu1 %v7316_v8, %s9294_s15  ;;  %v544_v58 = vpop.permute.xlu0 %543  ;;  %vm9358_vm7 = vcmask 564224  }
  0xb6   : > { %514 = vst [vmem:[#allocation2 + $0x38] sm:$0xcc] %v510_v57  ;;  %v548_v60 = vrot.slane %v544_v58, 4 }
  0xb7   : > { %v589_v61 = vpop.permute.xlu1 %588  ;;  %1391 = vrot.lane.b32.xlu0 %v1386_v54, %s9314_s14 }
  0xb8   : > { %v550_v62 = vsel %vm238_vm0, %v547_v59, %v548_v60  ;;  %v553_v63 = vsel %vm238_vm0, %v548_v60, %v549_v56  ;;  %v593_v0 = vrot.slane %v589_v61, 4  ;;  %v6925_v56 = vld [vmem:[%s7307_s16 + $0x8] ss:$0 sps:$4 sm:$0x33]  }
  0xb9   : > { %v552_v1 = vsel %vm9264_vm8, %v542_v47, %v550_v62  ;;  %v554_v2 = vsel %vm9264_vm8, %v544_v58, %v553_v63  ;;  %1435 = vrot.lane.b32.xlu1 %v7310_v6, %s9294_s15  ;;  %v587_v4 = vpop.permute.xlu0 %586  ;;  %vm9324_vm8 = vcmask 572416  }
  0xba   : > { %557 = vst [vmem:[#allocation2 + $0x40] sm:$0x33] %v552_v1  ;;  %558 = vst [vmem:[#allocation2 + $0x48] sm:$0x33] %v554_v2  ;;  %v592_v7 = vrot.slane %v587_v4, 4 }
  0xbb   : > { %v631_v9 = vpop.permute.xlu1 %630  ;;  %1433 = vrot.lane.b32.xlu0 %v7327_v13, %s9294_s15 }
  0xbc   : > { %v595_v12 = vsel %vm238_vm0, %v592_v7, %v593_v0  ;;  %v636_v23 = vrot.slane %v631_v9, 4 }
  0xbd   : > { %v597_v14 = vsel %vm9261_vm9, %v587_v4, %v595_v12  ;;  %1478 = vrot.lane.b32.xlu1 %v7316_v8, %s9312_s17  ;;  %v591_v15 = vpop.permute.xlu0 %590 }
  0xbe   : > { %602 = vst [vmem:[#allocation2 + $0x40] sm:$0xcc] %v597_v14  ;;  %v594_v16 = vrot.slane %v591_v15, 4 }
  0xbf   : > { %v635_v17 = vpop.permute.xlu1 %634  ;;  %1476 = vrot.lane.b32.xlu0 %v7320_v10, %s9312_s17 }
  0xc0   : > { %v598_v19 = vsel %vm238_vm0, %v593_v0, %v594_v16  ;;  %v638_v20 = vrot.slane %v635_v17, 4  ;;  %v1716_v0 = vld [vmem:[%s7307_s16] sm:$0xff] }
  0xc1   : > { %v599_v21 = vsel %vm9261_vm9, %v589_v61, %v598_v19  ;;  %1520 = vrot.lane.b32.xlu1 %v7316_v8, %s9310_s22  ;;  %v633_v22 = vpop.permute.xlu0 %632  ;;  %v1653_v61 = vrot.slane %v6925_v56, %v7302_v5  ;;  %vm1397_vm9 = vcmask 580608  }
  0xc2   : > { %603 = vst [vmem:[#allocation2 + $0x48] sm:$0xcc] %v599_v21  ;;  %v637_v24 = vrot.slane %v633_v22, 4 }
  0xc3   : > { %v678_v25 = vpop.permute.xlu1 %677  ;;  %1480 = vrot.lane.b32.xlu0 %v1475_v18, %s9312_s17  ;;  %v7581_v18 = vrot.slane %v1716_v0, %v7302_v5 }
  0xc4   : > { %v639_v26 = vsel %vm238_vm0, %v636_v23, %v637_v24  ;;  %v642_v27 = vsel %vm238_vm0, %v637_v24, %v638_v20  ;;  %v682_v28 = vrot.slane %v678_v25, 4 }
  0xc5   : > { %v641_v29 = vsel %vm9260_vm10, %v631_v9, %v639_v26  ;;  %v643_v30 = vsel %vm9260_vm10, %v633_v22, %v642_v27  ;;  %1524 = vrot.lane.b32.xlu1 %v7310_v6, %s9310_s22  ;;  %v676_v31 = vpop.permute.xlu0 %675  ;;  %v7573_v9 = vld.sshfl [vmem:[%s7307_s16 + $0x8] sm:$0x3 pattern:$0x76325410]  ;;  %vm9287_vm10 = vcmask 588800  }
  0xc6   : > { %646 = vst [vmem:[#allocation2 + $0x50] sm:$0x33] %v641_v29  ;;  %647 = vst [vmem:[#allocation2 + $0x58] sm:$0x33] %v643_v30  ;;  %v681_v32 = vrot.slane %v676_v31, 4 }
  0xc7   : > { %v720_v33 = vpop.permute.xlu1 %719  ;;  %1522 = vrot.lane.b32.xlu0 %v7327_v13, %s9310_s22  ;;  %v6928_v22 = vld [vmem:[%s7307_s16 + $0x8] ss:$0 sps:$4 sm:$0x33]  }
  0xc8   : > { %v684_v35 = vsel %vm238_vm0, %v681_v32, %v682_v28  ;;  %v725_v45 = vrot.slane %v720_v33, 4 }
  0xc9   : > { %v686_v36 = vsel %vm685_vm11, %v676_v31, %v684_v35  ;;  %1567 = vrot.lane.b32.xlu1 %v7316_v8, %s9289_s21  ;;  %v680_v37 = vpop.permute.xlu0 %679 }
  0xca   : > { %691 = vst [vmem:[#allocation2 + $0x50] sm:$0xcc] %v686_v36  ;;  %v683_v38 = vrot.slane %v680_v37, 4 }
  0xcb   : > { %v724_v39 = vpop.permute.xlu1 %723  ;;  %1565 = vrot.lane.b32.xlu0 %v7320_v10, %s9289_s21 }
  0xcc   : > { %v687_v41 = vsel %vm238_vm0, %v682_v28, %v683_v38  ;;  %v727_v42 = vrot.slane %v724_v39, 4  ;;  %v1765_v28 = vcombine.high %v1716_v0, %v1716_v0 }
  0xcd   : > { %v688_v43 = vsel %vm685_vm11, %v678_v25, %v687_v41  ;;  %1609 = vrot.lane.b32.xlu1 %v7316_v8, %s9315_s20  ;;  %v722_v44 = vpop.permute.xlu0 %721  ;;  %vm9277_vm11 = vcmask 785408  }
  0xce   : > { %692 = vst [vmem:[#allocation2 + $0x58] sm:$0xcc] %v688_v43  ;;  %v726_v46 = vrot.slane %v722_v44, 4  ;;  %v7601_v36 = vrot.slane %v1765_v28, %v7302_v5 }
  0xcf   : > { %v767_v47 = vpop.permute.xlu1 %766  ;;  %1569 = vrot.lane.b32.xlu0 %v1564_v40, %s9289_s21 }
  0xd0   : > { %v728_v48 = vsel %vm238_vm0, %v725_v45, %v726_v46  ;;  %v731_v49 = vsel %vm238_vm0, %v726_v46, %v727_v42  ;;  %v771_v50 = vrot.slane %v767_v47, 4  ;;  %v6930_v45 = vld [vmem:[%s7307_s16 + $0x8] ss:$0 sps:$4 sm:$0x33]  }
  0xd1   : > { %v730_v51 = vsel %vm729_vm12, %v720_v33, %v728_v48  ;;  %v732_v52 = vsel %vm729_vm12, %v722_v44, %v731_v49  ;;  %1613 = vrot.lane.b32.xlu1 %v7310_v6, %s9315_s20  ;;  %v765_v53 = vpop.permute.xlu0 %764  ;;  %vm9276_vm12 = vcmask 777216  }
  0xd2   : > { %735 = vst [vmem:[#allocation2 + $0x60] sm:$0x33] %v730_v51  ;;  %736 = vst [vmem:[#allocation2 + $0x68] sm:$0x33] %v732_v52  ;;  %v770_v54 = vrot.slane %v765_v53, 4  ;;  %v1831_v51 = vrot.slane %v6930_v45, %v7302_v5 }
  0xd3   : > { %v809_v55 = vpop.permute.xlu1 %808  ;;  %1611 = vrot.lane.b32.xlu0 %v7327_v13, %s9315_s20 }
  0xd4   : > { %v773_v57 = vsel %vm238_vm0, %v770_v54, %v771_v50  ;;  %v814_v4 = vrot.slane %v809_v55, 4 }
  0xd5   : > { %v775_v58 = vsel %vm9271_vm13, %v765_v53, %v773_v57  ;;  %1656 = vrot.lane.b32.xlu1 %v7316_v8, %s7225_s19  ;;  %v769_v59 = vpop.permute.xlu0 %768 }
  0xd6   : > { %780 = vst [vmem:[#allocation2 + $0x60] sm:$0xcc] %v775_v58  ;;  %v772_v6 = vrot.slane %v769_v59, 4 }
  0xd7   : > { %v813_v60 = vpop.permute.xlu1 %812  ;;  %1654 = vrot.lane.b32.xlu0 %v7320_v10, %s7225_s19  ;;  %v1720_v10 = vcombine.low %v1716_v0, %v1716_v0 }
  0xd8   : > { %v776_v62 = vsel %vm238_vm0, %v771_v50, %v772_v6  ;;  %v816_v63 = vrot.slane %v813_v60, 4 }
  0xd9   : > { %v777_v1 = vsel %vm9271_vm13, %v767_v47, %v776_v62  ;;  %1698 = vrot.lane.b32.xlu1 %v7316_v8, %s7226_s26  ;;  %v811_v2 = vpop.permute.xlu0 %810  ;;  %v7585_v21 = vrot.slane %v1720_v10, %v7302_v5  ;;  %vm9320_vm13 = vcmask 547840  }
  0xda   : > { %781 = vst [vmem:[#allocation2 + $0x68] sm:$0xcc] %v777_v1  ;;  %v815_v7 = vrot.slane %v811_v2, 4 }
  0xdb   : > { %v856_v11 = vpop.permute.xlu1 %855  ;;  %1658 = vrot.lane.b32.xlu0 %v1653_v61, %s7225_s19  ;;  %s9359_s19 = smov 48  }
  0xdc   : > { %v817_v12 = vsel %vm238_vm0, %v814_v4, %v815_v7  ;;  %v820_v14 = vsel %vm238_vm0, %v815_v7, %v816_v63  ;;  %v860_v15 = vrot.slane %v856_v11, 4 }
  0xdd   : > { %v819_v16 = vsel %vm9270_vm14, %v809_v55, %v817_v12  ;;  %v821_v8 = vsel %vm9270_vm14, %v811_v2, %v820_v14  ;;  %1702 = vrot.lane.b32.xlu1 %v7573_v9, %s7226_s26  ;;  %v854_v17 = vpop.permute.xlu0 %853  ;;  %v6931_v2 = vld [vmem:[%s7307_s16 + $0x8] ss:$0 sps:$4 sm:$0x33]   ;;  %vm9292_vm14 = vcmask 556032  }
  0xde   : > { %824 = vst [vmem:[#allocation2 + $0x70] sm:$0x33] %v819_v16  ;;  %825 = vst [vmem:[#allocation2 + $0x78] sm:$0x33] %v821_v8  ;;  %v859_v19 = vrot.slane %v854_v17, 4  ;;  %v1920_v14 = vrot.slane %v6931_v2, %v7302_v5 }
  0xdf   : > { %v898_v20 = vpop.permute.xlu1 %897  ;;  %1700 = vrot.lane.b32.xlu0 %v7327_v13, %s7226_s26  ;;  %v1742_v13 = vrot.slane %v6928_v22, %v7302_v5  ;;  %s9318_s26 = smov 47  }
  0xe0   : > { %v862_v23 = vsel %vm238_vm0, %v859_v19, %v860_v15  ;;  %v903_v33 = vrot.slane %v898_v20, 4 }
  0xe1   : > { %v864_v24 = vsel %vm9283_vm15, %v854_v17, %v862_v23  ;;  %1745 = vrot.lane.b32.xlu1 %v7581_v18, %s9359_s19  ;;  %v858_v25 = vpop.permute.xlu0 %857 }
  0xe2   : > { %869 = vst [vmem:[#allocation2 + $0x70] sm:$0xcc] %v864_v24  ;;  %v861_v26 = vrot.slane %v858_v25, 4 }
  0xe3   : > { %v902_v27 = vpop.permute.xlu1 %901  ;;  %1743 = vrot.lane.b32.xlu0 %v7585_v21, %s9359_s19 }
  0xe4   : > { %v865_v29 = vsel %vm238_vm0, %v860_v15, %v861_v26  ;;  %v905_v30 = vrot.slane %v902_v27, 4 }
  0xe5   : > { %v866_v31 = vsel %vm9283_vm15, %v856_v11, %v865_v29  ;;  %1787 = vrot.lane.b32.xlu1 %v7581_v18, %s9318_s26  ;;  %v900_v32 = vpop.permute.xlu0 %899  ;;  %vm1842_vm15 = vcmask 375808  }
  0xe6   : > { %870 = vst [vmem:[#allocation2 + $0x78] sm:$0xcc] %v866_v31  ;;  %v904_v34 = vrot.slane %v900_v32, 4 }
  0xe7   : > { %v945_v35 = vpop.permute.xlu1 %944  ;;  %1747 = vrot.lane.b32.xlu0 %v1742_v13, %s9359_s19 }
  0xe8   : > { %v906_v37 = vsel %vm238_vm0, %v903_v33, %v904_v34  ;;  %v909_v38 = vsel %vm238_vm0, %v904_v34, %v905_v30  ;;  %v949_v39 = vrot.slane %v945_v35, 4  ;;  %v6932_v30 = vld [vmem:[%s7307_s16 + $0x8] ss:$0 sps:$4 sm:$0x33]  }
  0xe9   : > { %v908_v40 = vsel %vm9282_vm1, %v898_v20, %v906_v37  ;;  %v910_v41 = vsel %vm9282_vm1, %v900_v32, %v909_v38  ;;  %1791 = vrot.lane.b32.xlu1 %v7573_v9, %s9318_s26  ;;  %v943_v42 = vpop.permute.xlu0 %942  ;;  %v2009_v37 = vrot.slane %v6932_v30, %v7302_v5  ;;  %vm1708_vm1 = vcmask 400384  }
  0xea   : > { %913 = vst [vmem:[#allocation2 + $0x80] sm:$0x33] %v908_v40  ;;  %914 = vst [vmem:[#allocation2 + $0x88] sm:$0x33] %v910_v41  ;;  %v948_v43 = vrot.slane %v943_v42, 4 }
  0xeb   : > { %v987_v44 = vpop.permute.xlu1 %986  ;;  %1789 = vrot.lane.b32.xlu0 %v7601_v36, %s9318_s26 }
  0xec   : > { %v951_v46 = vsel %vm238_vm0, %v948_v43, %v949_v39  ;;  %v992_v56 = vrot.slane %v987_v44, 4 }
  0xed   : > { %v953_v47 = vsel %vm9277_vm11, %v943_v42, %v951_v46  ;;  %1834 = vrot.lane.b32.xlu1 %v7581_v18, %s9321_s25  ;;  %v947_v48 = vpop.permute.xlu0 %946 }
  0xee   : > { %958 = vst [vmem:[#allocation2 + $0x80] sm:$0xcc] %v953_v47  ;;  %v950_v49 = vrot.slane %v947_v48, 4 }
  0xef   : > { %v991_v50 = vpop.permute.xlu1 %990  ;;  %1832 = vrot.lane.b32.xlu0 %v7585_v21, %s9321_s25 }
  0xf0   : > { %v954_v52 = vsel %vm238_vm0, %v949_v39, %v950_v49  ;;  %v994_v53 = vrot.slane %v991_v50, 4 }
  0xf1   : > { %v955_v54 = vsel %vm9277_vm11, %v945_v35, %v954_v52  ;;  %1876 = vrot.lane.b32.xlu1 %v7581_v18, %s9288_s24  ;;  %v989_v55 = vpop.permute.xlu0 %988  ;;  %vm1664_vm11 = vcmask 408576  }
  0xf2   : > { %959 = vst [vmem:[#allocation2 + $0x88] sm:$0xcc] %v955_v54  ;;  %v993_v57 = vrot.slane %v989_v55, 4 }
  0xf3   : > { %v1034_v58 = vpop.permute.xlu1 %1033  ;;  %1836 = vrot.lane.b32.xlu0 %v1831_v51, %s9321_s25 }
  0xf4   : > { %v995_v59 = vsel %vm238_vm0, %v992_v56, %v993_v57  ;;  %v998_v6 = vsel %vm238_vm0, %v993_v57, %v994_v53  ;;  %v1038_v60 = vrot.slane %v1034_v58, 4  ;;  %v6933_v53 = vld [vmem:[%s7307_s16 + $0x8] ss:$0 sps:$4 sm:$0x33]  }
  0xf5   : > { %v997_v61 = vsel %vm9276_vm12, %v987_v44, %v995_v59  ;;  %v999_v62 = vsel %vm9276_vm12, %v989_v55, %v998_v6  ;;  %1880 = vrot.lane.b32.xlu1 %v7573_v9, %s9288_s24  ;;  %v1032_v63 = vpop.permute.xlu0 %1031  ;;  %v2098_v59 = vrot.slane %v6933_v53, %v7302_v5  ;;  %vm1619_vm12 = vcmask 539648  }
  0xf6   : > { %1002 = vst [vmem:[#allocation2 + $0x90] sm:$0x33] %v997_v61  ;;  %1003 = vst [vmem:[#allocation2 + $0x98] sm:$0x33] %v999_v62  ;;  %v1037_v0 = vrot.slane %v1032_v63, 4 }
  0xf7   : > { %v1076_v1 = vpop.permute.xlu1 %1075  ;;  %1878 = vrot.lane.b32.xlu0 %v7601_v36, %s9288_s24 }
  0xf8   : > { %v1040_v4 = vsel %vm238_vm0, %v1037_v0, %v1038_v60  ;;  %v1081_v19 = vrot.slane %v1076_v1, 4 }
  0xf9   : > { %v1042_v7 = vsel %vm9286_vm2, %v1032_v63, %v1040_v4  ;;  %1923 = vrot.lane.b32.xlu1 %v7581_v18, %s9367_s23  ;;  %v1036_v11 = vpop.permute.xlu0 %1035 }
  0xfa   : > { %1047 = vst [vmem:[#allocation2 + $0x90] sm:$0xcc] %v1042_v7  ;;  %v1039_v10 = vrot.slane %v1036_v11, 4 }
  0xfb   : > { %v1080_v12 = vpop.permute.xlu1 %1079  ;;  %1921 = vrot.lane.b32.xlu0 %v7585_v21, %s9367_s23 }
  0xfc   : > { %v1043_v15 = vsel %vm238_vm0, %v1038_v60, %v1039_v10  ;;  %v1083_v16 = vrot.slane %v1080_v12, 4 }
  0xfd   : > { %v1044_v8 = vsel %vm9286_vm2, %v1034_v58, %v1043_v15  ;;  %1965 = vrot.lane.b32.xlu1 %v7581_v18, %s9363_s30  ;;  %v1078_v17 = vpop.permute.xlu0 %1077  ;;  %vm1975_vm2 = vcmask 351232  }
  0xfe   : > { %1048 = vst [vmem:[#allocation2 + $0x98] sm:$0xcc] %v1044_v8  ;;  %v1082_v20 = vrot.slane %v1078_v17, 4 }
  0xff   : > { %v1123_v22 = vpop.permute.xlu1 %1122  ;;  %1925 = vrot.lane.b32.xlu0 %v1920_v14, %s9367_s23 }
 0x100   : > { %v1084_v23 = vsel %vm238_vm0, %v1081_v19, %v1082_v20  ;;  %v1087_v24 = vsel %vm238_vm0, %v1082_v20, %v1083_v16  ;;  %v1127_v25 = vrot.slane %v1123_v22, 4  ;;  %v6934_v16 = vld [vmem:[%s7307_s16 + $0x8] ss:$0 sps:$4 sm:$0x33]  }
 0x101   : > { %v1086_v26 = vsel %vm9285_vm6, %v1076_v1, %v1084_v23  ;;  %v1088_v27 = vsel %vm9285_vm6, %v1078_v17, %v1087_v24  ;;  %1969 = vrot.lane.b32.xlu1 %v7573_v9, %s9363_s30  ;;  %v1121_v13 = vpop.permute.xlu0 %1120  ;;  %v2187_v23 = vrot.slane %v6934_v16, %v7302_v5  ;;  %vm1931_vm6 = vcmask 359424  }
 0x102   : > { %1091 = vst [vmem:[#allocation2 + $0xa0] sm:$0x33] %v1086_v26  ;;  %1092 = vst [vmem:[#allocation2 + $0xa8] sm:$0x33] %v1088_v27  ;;  %v1126_v28 = vrot.slane %v1121_v13, 4 }
 0x103   : > { %v1165_v29 = vpop.permute.xlu1 %1164  ;;  %1967 = vrot.lane.b32.xlu0 %v7601_v36, %s9363_s30 }
 0x104   : > { %v1129_v31 = vsel %vm238_vm0, %v1126_v28, %v1127_v25  ;;  %v1170_v42 = vrot.slane %v1165_v29, 4 }
 0x105   : > { %v1131_v32 = vsel %vm9284_vm5, %v1121_v13, %v1129_v31  ;;  %2012 = vrot.lane.b32.xlu1 %v7581_v18, %s9365_s29  ;;  %v1125_v33 = vpop.permute.xlu0 %1124 }
 0x106   : > { %1136 = vst [vmem:[#allocation2 + $0xa0] sm:$0xcc] %v1131_v32  ;;  %v1128_v34 = vrot.slane %v1125_v33, 4 }
 0x107   : > { %v1169_v35 = vpop.permute.xlu1 %1168  ;;  %2010 = vrot.lane.b32.xlu0 %v7585_v21, %s9365_s29 }
 0x108   : > { %v1132_v38 = vsel %vm238_vm0, %v1127_v25, %v1128_v34  ;;  %v1172_v39 = vrot.slane %v1169_v35, 4 }
 0x109   : > { %v1133_v40 = vsel %vm9284_vm5, %v1123_v22, %v1132_v38  ;;  %2054 = vrot.lane.b32.xlu1 %v7581_v18, %s9322_s6  ;;  %v1167_v41 = vpop.permute.xlu0 %1166  ;;  %vm9319_vm5 = vcmask 367616  }
 0x10a   : > { %1137 = vst [vmem:[#allocation2 + $0xa8] sm:$0xcc] %v1133_v40  ;;  %v1171_v43 = vrot.slane %v1167_v41, 4 }
 0x10b   : > { %v1212_v44 = vpop.permute.xlu1 %1211  ;;  %2014 = vrot.lane.b32.xlu0 %v2009_v37, %s9365_s29 }
 0x10c   : > { %v1173_v45 = vsel %vm238_vm0, %v1170_v42, %v1171_v43  ;;  %v1176_v46 = vsel %vm238_vm0, %v1171_v43, %v1172_v39  ;;  %v1216_v47 = vrot.slane %v1212_v44, 4  ;;  %v6935_v39 = vld [vmem:[%s7307_s16 + $0x8] ss:$0 sps:$4 sm:$0x33]  }
 0x10d   : > { %v1175_v48 = vsel %vm1174_vm4, %v1165_v29, %v1173_v45  ;;  %v1177_v49 = vsel %vm1174_vm4, %v1167_v41, %v1176_v46  ;;  %2058 = vrot.lane.b32.xlu1 %v7573_v9, %s9322_s6  ;;  %v1210_v50 = vpop.permute.xlu0 %1209  ;;  %vm9291_vm4 = vcmask 605184   ;;  %v2276_v45 = vrot.slane %v6935_v39, %v7302_v5 }
 0x10e   : > { %1180 = vst [vmem:[#allocation2 + $0xb0] sm:$0x33] %v1175_v48  ;;  %1181 = vst [vmem:[#allocation2 + $0xb8] sm:$0x33] %v1177_v49  ;;  %v1215_v51 = vrot.slane %v1210_v50, 4 }
 0x10f   : > { %v1254_v52 = vpop.permute.xlu1 %1253  ;;  %2056 = vrot.lane.b32.xlu0 %v7601_v36, %s9322_s6 }
 0x110   : > { %v1218_v54 = vsel %vm238_vm0, %v1215_v51, %v1216_v47  ;;  %v1259_v63 = vrot.slane %v1254_v52, 4 }
 0x111   : > { %v1220_v55 = vsel %vm1219_vm3, %v1210_v50, %v1218_v54  ;;  %2101 = vrot.lane.b32.xlu1 %v7581_v18, %s9258_s5  ;;  %v1214_v56 = vpop.permute.xlu0 %1213 }
 0x112   : > { %1225 = vst [vmem:[#allocation2 + $0xb0] sm:$0xcc] %v1220_v55  ;;  %v1217_v57 = vrot.slane %v1214_v56, 4 }
 0x113   : > { %v1258_v58 = vpop.permute.xlu1 %1257  ;;  %2099 = vrot.lane.b32.xlu0 %v7585_v21, %s9258_s5 }
 0x114   : > { %v1221_v6 = vsel %vm238_vm0, %v1216_v47, %v1217_v57  ;;  %v1261_v60 = vrot.slane %v1258_v58, 4 }
 0x115   : > { %v1222_v61 = vsel %vm1219_vm3, %v1212_v44, %v1221_v6  ;;  %2143 = vrot.lane.b32.xlu1 %v7581_v18, %s7236_s4  ;;  %v1256_v62 = vpop.permute.xlu0 %1255  ;;  %vm9290_vm3 = vcmask 596992  }
 0x116   : > { %1226 = vst [vmem:[#allocation2 + $0xb8] sm:$0xcc] %v1222_v61  ;;  %v1260_v0 = vrot.slane %v1256_v62, 4 }
 0x117   : > { %v1301_v1 = vpop.permute.xlu1 %1300  ;;  %2103 = vrot.lane.b32.xlu0 %v2098_v59, %s9258_s5  ;;  %s7237_s5 = smov 23  }
 0x118   : > { %v1262_v2 = vsel %vm238_vm0, %v1259_v63, %v1260_v0  ;;  %v1265_v4 = vsel %vm238_vm0, %v1260_v0, %v1261_v60  ;;  %v1305_v7 = vrot.slane %v1301_v1, 4  ;;  %v6936_v60 = vld [vmem:[%s7307_s16 + $0x8] ss:$0 sps:$4 sm:$0x33]  }
 0x119   : > { %v1264_v11 = vsel %vm9291_vm4, %v1254_v52, %v1262_v2  ;;  %v1266_v10 = vsel %vm9291_vm4, %v1256_v62, %v1265_v4  ;;  %2147 = vrot.lane.b32.xlu1 %v7573_v9, %s7236_s4  ;;  %v1299_v12 = vpop.permute.xlu0 %1298  ;;  %v2365_v2 = vrot.slane %v6936_v60, %v7302_v5  ;;  %vm9293_vm4 = vcmask 326656  }
 0x11a   : > { %1269 = vst [vmem:[#allocation2 + $0xc0] sm:$0x33] %v1264_v11  ;;  %1270 = vst [vmem:[#allocation2 + $0xc8] sm:$0x33] %v1266_v10  ;;  %v1304_v14 = vrot.slane %v1299_v12, 4 }
 0x11b   : > { %v1343_v15 = vpop.permute.xlu1 %1342  ;;  %2145 = vrot.lane.b32.xlu0 %v7601_v36, %s7236_s4  ;;  %s9262_s4 = smov 22  }
 0x11c   : > { %v1307_v8 = vsel %vm238_vm0, %v1304_v14, %v1305_v7  ;;  %v1348_v13 = vrot.slane %v1343_v15, 4 }
 0x11d   : > { %v1309_v17 = vsel %vm9290_vm3, %v1299_v12, %v1307_v8  ;;  %2190 = vrot.lane.b32.xlu1 %v7581_v18, %s7237_s5  ;;  %v1303_v19 = vpop.permute.xlu0 %1302 }
 0x11e   : > { %1314 = vst [vmem:[#allocation2 + $0xc0] sm:$0xcc] %v1309_v17  ;;  %v1306_v20 = vrot.slane %v1303_v19, 4 }
 0x11f   : > { %v1347_v22 = vpop.permute.xlu1 %1346  ;;  %2188 = vrot.lane.b32.xlu0 %v7585_v21, %s7237_s5 }
 0x120   : > { %v1310_v24 = vsel %vm238_vm0, %v1305_v7, %v1306_v20  ;;  %v1350_v25 = vrot.slane %v1347_v22, 4 }
 0x121   : > { %v1311_v26 = vsel %vm9290_vm3, %v1301_v1, %v1310_v24  ;;  %2232 = vrot.lane.b32.xlu1 %v7581_v18, %s9262_s4  ;;  %v1345_v27 = vpop.permute.xlu0 %1344  ;;  %vm2064_vm3 = vcmask 334848  }
 0x122   : > { %1315 = vst [vmem:[#allocation2 + $0xc8] sm:$0xcc] %v1311_v26  ;;  %v1349_v28 = vrot.slane %v1345_v27, 4 }
 0x123   : > { %v1390_v29 = vpop.permute.xlu1 %1389  ;;  %2192 = vrot.lane.b32.xlu0 %v2187_v23, %s7237_s5  ;;  %s9266_s5 = smov 21  }
 0x124   : > { %v1351_v30 = vsel %vm238_vm0, %v1348_v13, %v1349_v28  ;;  %v1354_v31 = vsel %vm238_vm0, %v1349_v28, %v1350_v25  ;;  %v1394_v32 = vrot.slane %v1390_v29, 4  ;;  %v6937_v25 = vld [vmem:[%s7307_s16 + $0x8] ss:$0 sps:$4 sm:$0x33]  }
 0x125   : > { %v1353_v33 = vsel %vm9287_vm10, %v1343_v15, %v1351_v30  ;;  %v1355_v34 = vsel %vm9287_vm10, %v1345_v27, %v1354_v31  ;;  %2236 = vrot.lane.b32.xlu1 %v7573_v9, %s9262_s4  ;;  %v1388_v35 = vpop.permute.xlu0 %1387  ;;  %v2454_v30 = vrot.slane %v6937_v25, %v7302_v5  ;;  %vm2020_vm10 = vcmask 343040  }
 0x126   : > { %1358 = vst [vmem:[#allocation2 + $0xd0] sm:$0x33] %v1353_v33  ;;  %1359 = vst [vmem:[#allocation2 + $0xd8] sm:$0x33] %v1355_v34  ;;  %v1393_v37 = vrot.slane %v1388_v35, 4 }
 0x127   : > { %v1432_v38 = vpop.permute.xlu1 %1431  ;;  %2234 = vrot.lane.b32.xlu0 %v7601_v36, %s9262_s4  ;;  %s9268_s4 = smov 20  }
 0x128   : > { %v1396_v40 = vsel %vm238_vm0, %v1393_v37, %v1394_v32  ;;  %v1437_v50 = vrot.slane %v1432_v38, 4 }
 0x129   : > { %v1398_v41 = vsel %vm1397_vm9, %v1388_v35, %v1396_v40  ;;  %2279 = vrot.lane.b32.xlu1 %v7581_v18, %s9266_s5  ;;  %v1392_v42 = vpop.permute.xlu0 %1391 }
 0x12a   : > { %1403 = vst [vmem:[#allocation2 + $0xd0] sm:$0xcc] %v1398_v41  ;;  %v1395_v43 = vrot.slane %v1392_v42, 4 }
 0x12b   : > { %v1436_v44 = vpop.permute.xlu1 %1435  ;;  %2277 = vrot.lane.b32.xlu0 %v7585_v21, %s9266_s5 }
 0x12c   : > { %v1399_v46 = vsel %vm238_vm0, %v1394_v32, %v1395_v43  ;;  %v1439_v47 = vrot.slane %v1436_v44, 4 }
 0x12d   : > { %v1400_v48 = vsel %vm1397_vm9, %v1390_v29, %v1399_v46  ;;  %2321 = vrot.lane.b32.xlu1 %v7581_v18, %s9268_s4  ;;  %v1434_v49 = vpop.permute.xlu0 %1433 }
 0x12e   : > { %1404 = vst [vmem:[#allocation2 + $0xd8] sm:$0xcc] %v1400_v48  ;;  %v1438_v51 = vrot.slane %v1434_v49, 4 }
 0x12f   : > { %v1479_v52 = vpop.permute.xlu1 %1478  ;;  %2281 = vrot.lane.b32.xlu0 %v2276_v45, %s9266_s5  ;;  %s9272_s5 = smov 19  }
 0x130   : > { %v1440_v53 = vsel %vm238_vm0, %v1437_v50, %v1438_v51  ;;  %v1443_v54 = vsel %vm238_vm0, %v1438_v51, %v1439_v47  ;;  %v1483_v55 = vrot.slane %v1479_v52, 4  ;;  %v6946_v50 = vld [vmem:[%s7307_s16 + $0x8] ss:$0 sps:$4 sm:$0x33]  }
 0x131   : > { %v1442_v56 = vsel %vm9324_vm8, %v1432_v38, %v1440_v53  ;;  %v1444_v57 = vsel %vm9324_vm8, %v1434_v49, %v1443_v54  ;;  %2325 = vrot.lane.b32.xlu1 %v7573_v9, %s9268_s4  ;;  %v1477_v58 = vpop.permute.xlu0 %1476  ;;  %v6941_v49 = vld [vmem:[#allocation2 + $0xc4] ss:$16 sps:$4 sm:$0xff]   ;;  %v6943_v54 = vld [vmem:[#allocation2 + $0xc0] ss:$16 sps:$4 sm:$0xff]  }
 0x132   : > { %1447 = vst [vmem:[#allocation2 + $0xe0] sm:$0x33] %v1442_v56  ;;  %1448 = vst [vmem:[#allocation2 + $0xe8] sm:$0x33] %v1444_v57  ;;  %v1482_v59 = vrot.slane %v1477_v58, 4 }
 0x133   : > { %v1521_v6 = vpop.permute.xlu1 %1520  ;;  %2323 = vrot.lane.b32.xlu0 %v7601_v36, %s9268_s4  ;;  %s9274_s4 = smov 18   ;;  %v6944_v57 = vld [vmem:[#allocation2 + $0xa4] ss:$16 sps:$4 sm:$0xff]  }
 0x134   : > { %v1485_v61 = vsel %vm238_vm0, %v1482_v59, %v1483_v55  ;;  %v1526_v12 = vrot.slane %v1521_v6, 4 }
 0x135   : > { %v1487_v62 = vsel %vm9358_vm7, %v1477_v58, %v1485_v61  ;;  %2368 = vrot.lane.b32.xlu1 %v7581_v18, %s9272_s5  ;;  %v1481_v63 = vpop.permute.xlu0 %1480  ;;  %v2543_v58 = vrot.slane %v6946_v50, %v7302_v5 }
 0x136   : > { %1492 = vst [vmem:[#allocation2 + $0xe0] sm:$0xcc] %v1487_v62  ;;  %v1484_v0 = vrot.slane %v1481_v63, 4 }
 0x137   : > { %v1525_v1 = vpop.permute.xlu1 %1524  ;;  %2366 = vrot.lane.b32.xlu0 %v7585_v21, %s9272_s5 }
 0x138   : > { %v1488_v4 = vsel %vm238_vm0, %v1483_v55, %v1484_v0  ;;  %v1528_v7 = vrot.slane %v1525_v1, 4  ;;  %v4222_v55 = vld [vmem:[%s7307_s16 + $0x2] sm:$0xff] }
 0x139   : > { %v1489_v11 = vsel %vm9358_vm7, %v1479_v52, %v1488_v4  ;;  %2410 = vrot.lane.b32.xlu1 %v7581_v18, %s9274_s4  ;;  %v1523_v10 = vpop.permute.xlu0 %1522  ;;  %v7785_v62 = vrot.slane %v4222_v55, %v7302_v5  ;;  %v4269_v63 = vcombine.low %v4222_v55, %v4222_v55  ;;  %v6947_v1 = vld [vmem:[#allocation2 + $0xa0] ss:$16 sps:$4 sm:$0xff]   ;;  %v6948_v4 = vld [vmem:[#allocation2 + $0x84] ss:$16 sps:$4 sm:$0xff]  }
 0x13a   : > { %1493 = vst [vmem:[#allocation2 + $0xe8] sm:$0xcc] %v1489_v11  ;;  %v1527_v14 = vrot.slane %v1523_v10, 4 }
 0x13b   : > { %v1568_v15 = vpop.permute.xlu1 %1567  ;;  %2370 = vrot.lane.b32.xlu0 %v2365_v2, %s9272_s5  ;;  %s9278_s5 = smov 17  }
 0x13c   : > { %v1529_v16 = vsel %vm238_vm0, %v1526_v12, %v1527_v14  ;;  %v1532_v8 = vsel %vm238_vm0, %v1527_v14, %v1528_v7  ;;  %v1572_v17 = vrot.slane %v1568_v15, 4  ;;  %v4226_v7 = vcombine.high %v4222_v55, %v4222_v55 }
 0x13d   : > { %v1531_v19 = vsel %vm9292_vm14, %v1521_v6, %v1529_v16  ;;  %v1533_v20 = vsel %vm9292_vm14, %v1523_v10, %v1532_v8  ;;  %2414 = vrot.lane.b32.xlu1 %v7573_v9, %s9274_s4  ;;  %v1566_v22 = vpop.permute.xlu0 %1565  ;;  %v7793_v16 = vrot.slane %v4269_v63, %v7302_v5  ;;  %vm2153_vm14 = vcmask 195584  }
 0x13e   : > { %1536 = vst [vmem:[#allocation2 + $0xf0] sm:$0x33] %v1531_v19  ;;  %1537 = vst [vmem:[#allocation2 + $0xf8] sm:$0x33] %v1533_v20  ;;  %v1571_v23 = vrot.slane %v1566_v22, 4 }
 0x13f   : > { %v1610_v24 = vpop.permute.xlu1 %1609  ;;  %2412 = vrot.lane.b32.xlu0 %v7601_v36, %s9274_s4  ;;  %s9280_s4 = smov 16   ;;  %v6952_v20 = vld [vmem:[#allocation2 + $0x64] ss:$16 sps:$4 sm:$0xff]  }
 0x140   : > { %v1574_v26 = vsel %vm238_vm0, %v1571_v23, %v1572_v17  ;;  %v1615_v35 = vrot.slane %v1610_v24, 4 }
 0x141   : > { %v1576_v27 = vsel %vm9320_vm13, %v1566_v22, %v1574_v26  ;;  %2457 = vrot.lane.b32.xlu1 %v7581_v18, %s9278_s5  ;;  %v1570_v13 = vpop.permute.xlu0 %1569  ;;  %v7798_v22 = vrot.slane %v4226_v7, %v7302_v5 }
 0x142   : > { %1581 = vst [vmem:[#allocation2 + $0xf0] sm:$0xcc] %v1576_v27  ;;  %v1573_v28 = vrot.slane %v1570_v13, 4  ;;  %v6955_v27 = vld [vmem:[#allocation2 + $0x60] ss:$16 sps:$4 sm:$0xff]  }
 0x143   : > { %v1614_v29 = vpop.permute.xlu1 %1613  ;;  %2455 = vrot.lane.b32.xlu0 %v7585_v21, %s9278_s5 }
 0x144   : > { %v1577_v31 = vsel %vm238_vm0, %v1572_v17, %v1573_v28  ;;  %v1617_v32 = vrot.slane %v1614_v29, 4  ;;  %v6951_v17 = vld [vmem:[#allocation2 + $0x80] ss:$16 sps:$4 sm:$0xff]  }
 0x145   : > { %v1578_v33 = vsel %vm9320_vm13, %v1568_v15, %v1577_v31  ;;  %2499 = vrot.lane.b32.xlu1 %v7581_v18, %s9280_s4  ;;  %v1612_v34 = vpop.permute.xlu0 %1611 }
 0x146   : > { %1582 = vst [vmem:[#allocation2 + $0xf8] sm:$0xcc] %v1578_v33  ;;  %v1616_v37 = vrot.slane %v1612_v34, 4 }
 0x147   : > { %v1657_v38 = vpop.permute.xlu1 %1656  ;;  %2459 = vrot.lane.b32.xlu0 %v2454_v30, %s9278_s5  ;;  %s9349_s5 = smov 15  }
 0x148   : > { %v1618_v39 = vsel %vm238_vm0, %v1615_v35, %v1616_v37  ;;  %v1621_v40 = vsel %vm238_vm0, %v1616_v37, %v1617_v32  ;;  %v1661_v41 = vrot.slane %v1657_v38, 4  ;;  %v6959_v37 = vld [vmem:[#allocation2 + $0x24] ss:$16 sps:$4 sm:$0xff]  }
 0x149   : > { %v1620_v42 = vsel %vm1619_vm12, %v1610_v24, %v1618_v39  ;;  %v1622_v43 = vsel %vm1619_vm12, %v1612_v34, %v1621_v40  ;;  %2503 = vrot.lane.b32.xlu1 %v7573_v9, %s9280_s4  ;;  %v1655_v44 = vpop.permute.xlu0 %1654  ;;  %v6938_v45 = vld [vmem:[#allocation2 + $0xe4] ss:$16 sps:$4 sm:$0xff]   ;;  %v6940_v46 = vld [vmem:[#allocation2 + $0xe0] ss:$16 sps:$4 sm:$0xff]  }
 0x14a   : > { %1625 = vst [vmem:[#allocation2 + $0x100] sm:$0x33] %v1620_v42  ;;  %1626 = vst [vmem:[#allocation2 + $0x108] sm:$0x33] %v1622_v43  ;;  %v1660_v47 = vrot.slane %v1655_v44, 4  ;;  %6347 = vmatprep.subr.bf16.mxu0 %v6938_v45 }
 0x14b   : > { %v1699_v48 = vpop.permute.xlu1 %1698  ;;  %2501 = vrot.lane.b32.xlu0 %v7601_v36, %s9280_s4  ;;  %6348 = vmatpush1.bf16.msra.mxu0 %v6940_v46  ;;  %s9352_s4 = smov 14   ;;  %v6958_v34 = vld [vmem:[#allocation2 + $0x40] ss:$16 sps:$4 sm:$0xff]  }
 0x14c   : > { %v1663_v51 = vsel %vm238_vm0, %v1660_v47, %v1661_v41  ;;  %6349 = vmatprep.subr.bf16.mxu0 %v6941_v49  ;;  %v6961_v45 = vld [vmem:[#allocation2 + $0x20] ss:$16 sps:$4 sm:$0xff]   ;;  %v6962_v47 = vld [vmem:[#allocation2 + $0x4] ss:$16 sps:$4 sm:$0xff]  }
 0x14d   : > { %v1665_v9 = vsel %vm1664_vm11, %v1655_v44, %v1663_v51  ;;  %2546 = vrot.lane.b32.xlu1 %v7581_v18, %s9349_s5  ;;  %v1659_v52 = vpop.permute.xlu0 %1658 }
 0x14e   : > { %1670 = vst [vmem:[#allocation2 + $0x100] sm:$0xcc] %v1665_v9  ;;  %v1662_v53 = vrot.slane %v1659_v52, 4  ;;  %v6964_v9 = vld [vmem:[#allocation2] ss:$16 sps:$4 sm:$0xff]  }
 0x14f   : > { %v1703_v56 = vpop.permute.xlu1 %1702  ;;  %2544 = vrot.lane.b32.xlu0 %v7585_v21, %s9349_s5  ;;  %6350 = vmatpush1.bf16.msra.mxu0 %v6943_v54  ;;  %v1704_v21 = vrot.slane %v1699_v48, 4 }
 0x150   : > { %v1666_v59 = vsel %vm238_vm0, %v1661_v41, %v1662_v53  ;;  %v1706_v6 = vrot.slane %v1703_v56, 4  ;;  %6351 = vmatprep.subr.bf16.mxu0 %v6944_v57 }
 0x151   : > { %v1667_v60 = vsel %vm1664_vm11, %v1657_v38, %v1666_v59  ;;  %2588 = vrot.lane.b32.xlu1 %v7581_v18, %s9352_s4  ;;  %v1701_v61 = vpop.permute.xlu0 %1700  ;;  %vm1753_vm11 = vcmask 392192  }
 0x152   : > { %1671 = vst [vmem:[#allocation2 + $0x108] sm:$0xcc] %v1667_v60  ;;  %v1705_v0 = vrot.slane %v1701_v61, 4 }
 0x153   : > { %v1746_v2 = vpop.permute.xlu1 %1745  ;;  %2548 = vrot.lane.b32.xlu0 %v2543_v58, %s9349_s5  ;;  %6352 = vmatpush1.bf16.msra.mxu0 %v6947_v1 }
 0x154   : > { %v1707_v11 = vsel %vm238_vm0, %v1704_v21, %v1705_v0  ;;  %v1710_v18 = vsel %vm238_vm0, %v1705_v0, %v1706_v6  ;;  %v1750_v10 = vrot.slane %v1746_v2, 4  ;;  %6353 = vmatprep.subr.bf16.mxu0 %v6948_v4 }
 0x155   : > { %v1709_v12 = vsel %vm1708_vm1, %v1699_v48, %v1707_v11  ;;  %v1711_v14 = vsel %vm1708_vm1, %v1701_v61, %v1710_v18  ;;  %4248 = vrot.lane.b32.xlu1 %v7785_v62, %s9367_s23  ;;  %v1744_v15 = vpop.permute.xlu0 %1743  ;;  %vm9316_vm1 = vcmask 384000  }
 0x156   : > { %1714 = vst [vmem:[#allocation2 + $0x110] sm:$0x33] %v1709_v12  ;;  %1715 = vst [vmem:[#allocation2 + $0x118] sm:$0x33] %v1711_v14  ;;  %v1749_v8 = vrot.slane %v1744_v15, 4 }
 0x157   : > { %v1788_v19 = vpop.permute.xlu1 %1787  ;;  %2590 = vrot.lane.b32.xlu0 %v7601_v36, %s9352_s4  ;;  %6354 = vmatpush1.bf16.msra.mxu0 %v6951_v17  ;;  %v6956_v36 = vld [vmem:[#allocation2 + $0x44] ss:$16 sps:$4 sm:$0xff]  }
 0x158   : > { %v1752_v23 = vsel %vm238_vm0, %v1749_v8, %v1750_v10  ;;  %6355 = vmatprep.subr.bf16.mxu0 %v6952_v20  ;;  %v1793_v32 = vrot.slane %v1788_v19, 4 }
 0x159   : > { %v1754_v24 = vsel %vm1753_vm11, %v1744_v15, %v1752_v23  ;;  %4292 = vrot.lane.b32.xlu1 %v7793_v16, %s9363_s30  ;;  %v1748_v25 = vpop.permute.xlu0 %1747 }
 0x15a   : > { %1759 = vst [vmem:[#allocation2 + $0x110] sm:$0xcc] %v1754_v24  ;;  %v1751_v26 = vrot.slane %v1748_v25, 4 }
 0x15b   : > { %v1792_v13 = vpop.permute.xlu1 %1791  ;;  %4250 = vrot.lane.b32.xlu0 %v7798_v22, %s9367_s23  ;;  %6356 = vmatpush1.bf16.msra.mxu0 %v6955_v27  ;;  %s9372_s23 = smov 38  }
 0x15c   : > { %v1755_v28 = vsel %vm238_vm0, %v1750_v10, %v1751_v26  ;;  %v1795_v29 = vrot.slane %v1792_v13, 4  ;;  %6357 = vmatprep.subr.bf16.mxu0 %v6956_v36 }
 0x15d   : > { %v1756_v30 = vsel %vm1753_vm11, %v1746_v2, %v1755_v28  ;;  %4335 = vrot.lane.b32.xlu1 %v7785_v62, %s9365_s29  ;;  %v1790_v31 = vpop.permute.xlu0 %1789 }
 0x15e   : > { %1760 = vst [vmem:[#allocation2 + $0x118] sm:$0xcc] %v1756_v30  ;;  %v1794_v33 = vrot.slane %v1790_v31, 4 }
 0x15f   : > { %v1835_v35 = vpop.permute.xlu1 %1834  ;;  %4294 = vrot.lane.b32.xlu0 %v7785_v62, %s9363_s30  ;;  %6358 = vmatpush1.bf16.msra.mxu0 %v6958_v34  ;;  %s9506_s30 = smov 40  }
 0x160   : > { %v1796_v38 = vsel %vm238_vm0, %v1793_v32, %v1794_v33  ;;  %v1799_v39 = vsel %vm238_vm0, %v1794_v33, %v1795_v29  ;;  %v1839_v40 = vrot.slane %v1835_v35, 4  ;;  %6359 = vmatprep.subr.bf16.mxu0 %v6959_v37 }
 0x161   : > { %v1798_v41 = vsel %vm9316_vm1, %v1788_v19, %v1796_v38  ;;  %v1800_v42 = vsel %vm9316_vm1, %v1790_v31, %v1799_v39  ;;  %4379 = vrot.lane.b32.xlu1 %v7793_v16, %s9322_s6  ;;  %v1833_v43 = vpop.permute.xlu0 %1832 }
 0x162   : > { %1803 = vst [vmem:[#allocation2 + $0x120] sm:$0x33] %v1798_v41  ;;  %1804 = vst [vmem:[#allocation2 + $0x128] sm:$0x33] %v1800_v42  ;;  %v1838_v44 = vrot.slane %v1833_v43, 4 }
 0x163   : > { %v1877_v46 = vpop.permute.xlu1 %1876  ;;  %4337 = vrot.lane.b32.xlu0 %v7798_v22, %s9365_s29  ;;  %6360 = vmatpush1.bf16.msra.mxu0 %v6961_v45  ;;  %s9375_s29 = smov 39  }
 0x164   : > { %v1841_v48 = vsel %vm238_vm0, %v1838_v44, %v1839_v40  ;;  %6361 = vmatprep.subr.bf16.mxu0 %v6962_v47  ;;  %v1882_v57 = vrot.slane %v1877_v46, 4 }
 0x165   : > { %v1843_v49 = vsel %vm1842_vm15, %v1833_v43, %v1841_v48  ;;  %4074 = vrot.lane.b32.xlu1 %v7785_v62, %s9359_s19  ;;  %v1837_v50 = vpop.permute.xlu0 %1836 }
 0x166   : > { %1848 = vst [vmem:[#allocation2 + $0x120] sm:$0xcc] %v1843_v49  ;;  %v1840_v51 = vrot.slane %v1837_v50, 4 }
 0x167   : > { %v1881_v52 = vpop.permute.xlu1 %1880  ;;  %4381 = vrot.lane.b32.xlu0 %v7785_v62, %s9322_s6  ;;  %6362 = vmatpush1.bf16.msra.mxu0 %v6964_v9  ;;  %s9486_s6 = smov 126  }
 0x168   : > { %v1844_v53 = vsel %vm238_vm0, %v1839_v40, %v1840_v51  ;;  %v1884_v54 = vrot.slane %v1881_v52, 4 }
 0x169   : > { %v1845_v55 = vsel %vm1842_vm15, %v1835_v35, %v1844_v53  ;;  %4118 = vrot.lane.b32.xlu1 %v7793_v16, %s9318_s26  ;;  %v1879_v56 = vpop.permute.xlu0 %1878 }
 0x16a   : > { %1849 = vst [vmem:[#allocation2 + $0x128] sm:$0xcc] %v1845_v55  ;;  %v1883_v58 = vrot.slane %v1879_v56, 4 }
 0x16b   : > { %v1924_v59 = vpop.permute.xlu1 %1923  ;;  %4076 = vrot.lane.b32.xlu0 %v7798_v22, %s9359_s19  ;;  %s9504_s19 = smov 18  }
 0x16c   : > { %v1885_v6 = vsel %vm238_vm0, %v1882_v57, %v1883_v58  ;;  %v1888_v60 = vsel %vm238_vm0, %v1883_v58, %v1884_v54  ;;  %v1928_v61 = vrot.slane %v1924_v59, 4 }
 0x16d   : > { %v1887_v63 = vsel %vm9319_vm5, %v1877_v46, %v1885_v6  ;;  %v1889_v21 = vsel %vm9319_vm5, %v1879_v56, %v1888_v60  ;;  %4161 = vrot.lane.b32.xlu1 %v7785_v62, %s9321_s25  ;;  %v1922_v0 = vpop.permute.xlu0 %1921 }
 0x16e   : > { %1892 = vst [vmem:[#allocation2 + $0x130] sm:$0x33] %v1887_v63  ;;  %1893 = vst [vmem:[#allocation2 + $0x138] sm:$0x33] %v1889_v21  ;;  %v1927_v1 = vrot.slane %v1922_v0, 4 }
 0x16f   : > { %v1966_v2 = vpop.permute.xlu1 %1965  ;;  %4120 = vrot.lane.b32.xlu0 %v7785_v62, %s9318_s26  ;;  %s9483_s26 = smov 122  }
 0x170   : > { %v1930_v4 = vsel %vm238_vm0, %v1927_v1, %v1928_v61  ;;  %v1971_v17 = vrot.slane %v1966_v2, 4 }
 0x171   : > { %v1932_v7 = vsel %vm1931_vm6, %v1922_v0, %v1930_v4  ;;  %4205 = vrot.lane.b32.xlu1 %v7793_v16, %s9288_s24  ;;  %v1926_v11 = vpop.permute.xlu0 %1925 }
 0x172   : > { %1937 = vst [vmem:[#allocation2 + $0x130] sm:$0xcc] %v1932_v7  ;;  %v1929_v18 = vrot.slane %v1926_v11, 4 }
 0x173   : > { %v1970_v10 = vpop.permute.xlu1 %1969  ;;  %4163 = vrot.lane.b32.xlu0 %v7798_v22, %s9321_s25  ;;  %s9323_s25 = smov 114  }
 0x174   : > { %v1933_v12 = vsel %vm238_vm0, %v1928_v61, %v1929_v18  ;;  %v1973_v14 = vrot.slane %v1970_v10, 4 }
 0x175   : > { %v1934_v15 = vsel %vm1931_vm6, %v1924_v59, %v1933_v12  ;;  %3898 = vrot.lane.b32.xlu1 %v7785_v62, %s9289_s21  ;;  %v1968_v8 = vpop.permute.xlu0 %1967 }
 0x176   : > { %1938 = vst [vmem:[#allocation2 + $0x138] sm:$0xcc] %v1934_v15  ;;  %v1972_v19 = vrot.slane %v1968_v8, 4 }
 0x177   : > { %v2013_v20 = vpop.permute.xlu1 %2012  ;;  %4207 = vrot.lane.b32.xlu0 %v7785_v62, %s9288_s24  ;;  %s9317_s24 = smov 65  }
 0x178   : > { %v1974_v23 = vsel %vm238_vm0, %v1971_v17, %v1972_v19  ;;  %v1977_v24 = vsel %vm238_vm0, %v1972_v19, %v1973_v14  ;;  %v2017_v25 = vrot.slane %v2013_v20, 4 }
 0x179   : > { %v1976_v26 = vsel %vm1975_vm2, %v1966_v2, %v1974_v23  ;;  %v1978_v27 = vsel %vm1975_vm2, %v1968_v8, %v1977_v24  ;;  %3942 = vrot.lane.b32.xlu1 %v7793_v16, %s9315_s20  ;;  %v2011_v13 = vpop.permute.xlu0 %2010 }
 0x17a   : > { %1981 = vst [vmem:[#allocation2 + $0x140] sm:$0x33] %v1976_v26  ;;  %1982 = vst [vmem:[#allocation2 + $0x148] sm:$0x33] %v1978_v27  ;;  %v2016_v36 = vrot.slane %v2011_v13, 4 }
 0x17b   : > { %v2055_v28 = vpop.permute.xlu1 %2054  ;;  %3900 = vrot.lane.b32.xlu0 %v7798_v22, %s9289_s21  ;;  %s9313_s21 = smov 64  }
 0x17c   : > { %v2019_v29 = vsel %vm238_vm0, %v2016_v36, %v2017_v25  ;;  %v2060_v39 = vrot.slane %v2055_v28, 4 }
 0x17d   : > { %v2021_v30 = vsel %vm2020_vm10, %v2011_v13, %v2019_v29  ;;  %3985 = vrot.lane.b32.xlu1 %v7785_v62, %s9317_s24  ;;  %v2015_v31 = vpop.permute.xlu0 %2014 }
 0x17e   : > { %2026 = vst [vmem:[#allocation2 + $0x140] sm:$0xcc] %v2021_v30  ;;  %v2018_v32 = vrot.slane %v2015_v31, 4 }
 0x17f   : > { %v2059_v33 = vpop.permute.xlu1 %2058  ;;  %3944 = vrot.lane.b32.xlu0 %v7785_v62, %s9315_s20  ;;  %s9481_s20 = smov 124  }
 0x180   : > { %v2022_v34 = vsel %vm238_vm0, %v2017_v25, %v2018_v32  ;;  %v2062_v35 = vrot.slane %v2059_v33, 4 }
 0x181   : > { %v2023_v37 = vsel %vm2020_vm10, %v2013_v20, %v2022_v34  ;;  %4030 = vrot.lane.b32.xlu1 %v7793_v16, %s9313_s21  ;;  %v2057_v38 = vpop.permute.xlu0 %2056 }
 0x182   : > { %2027 = vst [vmem:[#allocation2 + $0x148] sm:$0xcc] %v2023_v37  ;;  %v2061_v40 = vrot.slane %v2057_v38, 4 }
 0x183   : > { %v2102_v41 = vpop.permute.xlu1 %2101  ;;  %3987 = vrot.lane.b32.xlu0 %v7798_v22, %s9317_s24  ;;  %s9482_s24 = smov 123  }
 0x184   : > { %v2063_v42 = vsel %vm238_vm0, %v2060_v39, %v2061_v40  ;;  %v2066_v43 = vsel %vm238_vm0, %v2061_v40, %v2062_v35  ;;  %v2106_v44 = vrot.slane %v2102_v41, 4 }
 0x185   : > { %v2065_v45 = vsel %vm2064_vm3, %v2055_v28, %v2063_v42  ;;  %v2067_v46 = vsel %vm2064_vm3, %v2057_v38, %v2066_v43  ;;  %3724 = vrot.lane.b32.xlu1 %v7785_v62, %s9314_s14  ;;  %v2100_v47 = vpop.permute.xlu0 %2099 }
 0x186   : > { %2070 = vst [vmem:[#allocation2 + $0x150] sm:$0x33] %v2065_v45  ;;  %2071 = vst [vmem:[#allocation2 + $0x158] sm:$0x33] %v2067_v46  ;;  %v2105_v48 = vrot.slane %v2100_v47, 4 }
 0x187   : > { %v2144_v49 = vpop.permute.xlu1 %2143  ;;  %4032 = vrot.lane.b32.xlu0 %v7785_v62, %s9313_s21  ;;  %s9479_s21 = smov 118  }
 0x188   : > { %v2108_v50 = vsel %vm238_vm0, %v2105_v48, %v2106_v44  ;;  %v2149_v58 = vrot.slane %v2144_v49, 4 }
 0x189   : > { %v2110_v51 = vsel %vm9293_vm4, %v2100_v47, %v2108_v50  ;;  %3768 = vrot.lane.b32.xlu1 %v7793_v16, %s9294_s15  ;;  %v2104_v9 = vpop.permute.xlu0 %2103 }
 0x18a   : > { %2115 = vst [vmem:[#allocation2 + $0x150] sm:$0xcc] %v2110_v51  ;;  %v2107_v52 = vrot.slane %v2104_v9, 4 }
 0x18b   : > { %v2148_v53 = vpop.permute.xlu1 %2147  ;;  %3726 = vrot.lane.b32.xlu0 %v7798_v22, %s9314_s14  ;;  %s9480_s14 = smov 125  }
 0x18c   : > { %v2111_v54 = vsel %vm238_vm0, %v2106_v44, %v2107_v52  ;;  %v2151_v55 = vrot.slane %v2148_v53, 4 }
 0x18d   : > { %v2112_v56 = vsel %vm9293_vm4, %v2102_v41, %v2111_v54  ;;  %3811 = vrot.lane.b32.xlu1 %v7785_v62, %s9312_s17  ;;  %v2146_v57 = vpop.permute.xlu0 %2145  ;;  %vm2198_vm4 = vcmask 187392  }
 0x18e   : > { %2116 = vst [vmem:[#allocation2 + $0x158] sm:$0xcc] %v2112_v56  ;;  %v2150_v59 = vrot.slane %v2146_v57, 4 }
 0x18f   : > { %v2191_v6 = vpop.permute.xlu1 %2190  ;;  %3770 = vrot.lane.b32.xlu0 %v7785_v62, %s9294_s15  ;;  %s9311_s15 = smov 90  }
 0x190   : > { %v2152_v60 = vsel %vm238_vm0, %v2149_v58, %v2150_v59  ;;  %v2155_v61 = vsel %vm238_vm0, %v2150_v59, %v2151_v55  ;;  %v2195_v63 = vrot.slane %v2191_v6, 4 }
 0x191   : > { %v2154_v21 = vsel %vm2153_vm14, %v2144_v49, %v2152_v60  ;;  %v2156_v0 = vsel %vm2153_vm14, %v2146_v57, %v2155_v61  ;;  %3855 = vrot.lane.b32.xlu1 %v7793_v16, %s9310_s22  ;;  %v2189_v1 = vpop.permute.xlu0 %2188  ;;  %vm9295_vm14 = vcmask 179200  }
 0x192   : > { %2159 = vst [vmem:[#allocation2 + $0x160] sm:$0x33] %v2154_v21  ;;  %2160 = vst [vmem:[#allocation2 + $0x168] sm:$0x33] %v2156_v0  ;;  %v2194_v2 = vrot.slane %v2189_v1, 4 }
 0x193   : > { %v2233_v4 = vpop.permute.xlu1 %2232  ;;  %3813 = vrot.lane.b32.xlu0 %v7798_v22, %s9312_s17  ;;  %s9478_s17 = smov 119  }
 0x194   : > { %v2197_v7 = vsel %vm238_vm0, %v2194_v2, %v2195_v63  ;;  %v2238_v19 = vrot.slane %v2233_v4, 4 }
 0x195   : > { %v2199_v11 = vsel %vm2198_vm4, %v2189_v1, %v2197_v7  ;;  %3549 = vrot.lane.b32.xlu1 %v7785_v62, %s9311_s15  ;;  %v2193_v18 = vpop.permute.xlu0 %2192 }
 0x196   : > { %2204 = vst [vmem:[#allocation2 + $0x160] sm:$0xcc] %v2199_v11  ;;  %v2196_v10 = vrot.slane %v2193_v18, 4 }
 0x197   : > { %v2237_v12 = vpop.permute.xlu1 %2236  ;;  %3857 = vrot.lane.b32.xlu0 %v7785_v62, %s9310_s22  ;;  %s9476_s22 = smov 121  }
 0x198   : > { %v2200_v14 = vsel %vm238_vm0, %v2195_v63, %v2196_v10  ;;  %v2240_v15 = vrot.slane %v2237_v12, 4 }
 0x199   : > { %v2201_v8 = vsel %vm2198_vm4, %v2191_v6, %v2200_v14  ;;  %3594 = vrot.lane.b32.xlu1 %v7793_v16, %s9308_s18  ;;  %v2235_v17 = vpop.permute.xlu0 %2234  ;;  %vm9296_vm4 = vcmask 171008  }
 0x19a   : > { %2205 = vst [vmem:[#allocation2 + $0x168] sm:$0xcc] %v2201_v8  ;;  %v2239_v20 = vrot.slane %v2235_v17, 4 }
 0x19b   : > { %v2280_v23 = vpop.permute.xlu1 %2279  ;;  %3551 = vrot.lane.b32.xlu0 %v7798_v22, %s9311_s15  ;;  %s9477_s15 = smov 120  }
 0x19c   : > { %v2241_v24 = vsel %vm238_vm0, %v2238_v19, %v2239_v20  ;;  %v2244_v25 = vsel %vm238_vm0, %v2239_v20, %v2240_v15  ;;  %v2284_v26 = vrot.slane %v2280_v23, 4 }
 0x19d   : > { %v2243_v27 = vsel %vm9295_vm14, %v2233_v4, %v2241_v24  ;;  %v2245_v13 = vsel %vm9295_vm14, %v2235_v17, %v2244_v25  ;;  %3637 = vrot.lane.b32.xlu1 %v7785_v62, %s9309_s27  ;;  %v2278_v36 = vpop.permute.xlu0 %2277  ;;  %vm9298_vm14 = vcmask 162816  }
 0x19e   : > { %2248 = vst [vmem:[#allocation2 + $0x170] sm:$0x33] %v2243_v27  ;;  %2249 = vst [vmem:[#allocation2 + $0x178] sm:$0x33] %v2245_v13  ;;  %v2283_v28 = vrot.slane %v2278_v36, 4 }
 0x19f   : > { %v2322_v29 = vpop.permute.xlu1 %2321  ;;  %3596 = vrot.lane.b32.xlu0 %v7785_v62, %s9308_s18  ;;  %s9474_s18 = smov 100  }
 0x1a0   : > { %v2286_v30 = vsel %vm238_vm0, %v2283_v28, %v2284_v26  ;;  %v2327_v40 = vrot.slane %v2322_v29, 4 }
 0x1a1   : > { %v2288_v31 = vsel %vm9296_vm4, %v2278_v36, %v2286_v30  ;;  %3681 = vrot.lane.b32.xlu1 %v7793_v16, %s9297_s28  ;;  %v2282_v32 = vpop.permute.xlu0 %2281 }
 0x1a2   : > { %2293 = vst [vmem:[#allocation2 + $0x170] sm:$0xcc] %v2288_v31  ;;  %v2285_v33 = vrot.slane %v2282_v32, 4 }
 0x1a3   : > { %v2326_v34 = vpop.permute.xlu1 %2325  ;;  %3639 = vrot.lane.b32.xlu0 %v7798_v22, %s9309_s27  ;;  %s9475_s27 = smov 99  }
 0x1a4   : > { %v2289_v35 = vsel %vm238_vm0, %v2284_v26, %v2285_v33  ;;  %v2329_v37 = vrot.slane %v2326_v34, 4 }
 0x1a5   : > { %v2290_v38 = vsel %vm9296_vm4, %v2280_v23, %v2289_v35  ;;  %3374 = vrot.lane.b32.xlu1 %v7785_v62, %s9306_s7  ;;  %v2324_v39 = vpop.permute.xlu0 %2323  ;;  %vm9299_vm4 = vcmask 154624  }
 0x1a6   : > { %2294 = vst [vmem:[#allocation2 + $0x178] sm:$0xcc] %v2290_v38  ;;  %v2328_v41 = vrot.slane %v2324_v39, 4 }
 0x1a7   : > { %v2369_v42 = vpop.permute.xlu1 %2368  ;;  %3683 = vrot.lane.b32.xlu0 %v7785_v62, %s9297_s28  ;;  %s9301_s28 = smov 91  }
 0x1a8   : > { %v2330_v43 = vsel %vm238_vm0, %v2327_v40, %v2328_v41  ;;  %v2333_v44 = vsel %vm238_vm0, %v2328_v41, %v2329_v37  ;;  %v2373_v45 = vrot.slane %v2369_v42, 4 }
 0x1a9   : > { %v2332_v46 = vsel %vm9298_vm14, %v2322_v29, %v2330_v43  ;;  %v2334_v47 = vsel %vm9298_vm14, %v2324_v39, %v2333_v44  ;;  %3418 = vrot.lane.b32.xlu1 %v7793_v16, %s9300_s8  ;;  %v2367_v48 = vpop.permute.xlu0 %2366  ;;  %vm9302_vm14 = vcmask 146432  }
 0x1aa   : > { %2337 = vst [vmem:[#allocation2 + $0x180] sm:$0x33] %v2332_v46  ;;  %2338 = vst [vmem:[#allocation2 + $0x188] sm:$0x33] %v2334_v47  ;;  %v2372_v49 = vrot.slane %v2367_v48, 4 }
 0x1ab   : > { %v2411_v50 = vpop.permute.xlu1 %2410  ;;  %3376 = vrot.lane.b32.xlu0 %v7798_v22, %s9306_s7  ;;  %s9326_s7 = smov 116  }
 0x1ac   : > { %v2375_v51 = vsel %vm238_vm0, %v2372_v49, %v2373_v45  ;;  %v2416_v59 = vrot.slane %v2411_v50, 4 }
 0x1ad   : > { %v2377_v9 = vsel %vm9299_vm4, %v2367_v48, %v2375_v51  ;;  %3461 = vrot.lane.b32.xlu1 %v7785_v62, %s9305_s13  ;;  %v2371_v52 = vpop.permute.xlu0 %2370  ;;  %v2867_v48 = vld [vmem:[%s7307_s16 + $0x2] sm:$0xff] }
 0x1ae   : > { %2382 = vst [vmem:[#allocation2 + $0x180] sm:$0xcc] %v2377_v9  ;;  %v2374_v53 = vrot.slane %v2371_v52, 4  ;;  %v2871_v52 = vcombine.low %v2867_v48, %v2867_v48 }
 0x1af   : > { %v2415_v54 = vpop.permute.xlu1 %2414  ;;  %3420 = vrot.lane.b32.xlu0 %v7785_v62, %s9300_s8  ;;  %s9470_s8 = smov 97  }
 0x1b0   : > { %v2378_v55 = vsel %vm238_vm0, %v2373_v45, %v2374_v53  ;;  %v2418_v56 = vrot.slane %v2415_v54, 4 }
 0x1b1   : > { %v2379_v57 = vsel %vm9299_vm4, %v2369_v42, %v2378_v55  ;;  %3505 = vrot.lane.b32.xlu1 %v7793_v16, %s9301_s28  ;;  %v2413_v58 = vpop.permute.xlu0 %2412  ;;  %vm9304_vm4 = vcmask 138240  }
 0x1b2   : > { %2383 = vst [vmem:[#allocation2 + $0x188] sm:$0xcc] %v2379_v57  ;;  %v2417_v6 = vrot.slane %v2413_v58, 4 }
 0x1b3   : > { %v2458_v60 = vpop.permute.xlu1 %2457  ;;  %3463 = vrot.lane.b32.xlu0 %v7798_v22, %s9305_s13  ;;  %s9347_s13 = smov 117  }
 0x1b4   : > { %v2419_v61 = vsel %vm238_vm0, %v2416_v59, %v2417_v6  ;;  %v2422_v63 = vsel %vm238_vm0, %v2417_v6, %v2418_v56  ;;  %v2462_v21 = vrot.slane %v2458_v60, 4 }
 0x1b5   : > { %v2421_v0 = vsel %vm9302_vm14, %v2411_v50, %v2419_v61  ;;  %v2423_v1 = vsel %vm9302_vm14, %v2413_v58, %v2422_v63  ;;  %3200 = vrot.lane.b32.xlu1 %v7785_v62, %s9303_s3  ;;  %v2456_v2 = vpop.permute.xlu0 %2455  ;;  %vm9307_vm14 = vcmask 130048   ;;  %v8023_v58 = vrot.slane %v2871_v52, %v7302_v5 }
 0x1b6   : > { %2426 = vst [vmem:[#allocation2 + $0x190] sm:$0x33] %v2421_v0  ;;  %2427 = vst [vmem:[#allocation2 + $0x198] sm:$0x33] %v2423_v1  ;;  %v2461_v4 = vrot.slane %v2456_v2, 4  ;;  %v8037_v0 = vrot.slane %v2867_v48, %v7302_v5 }
 0x1b7   : > { %v2500_v7 = vpop.permute.xlu1 %2499  ;;  %3507 = vrot.lane.b32.xlu0 %v7785_v62, %s9301_s28  ;;  %s9471_s28 = smov 96  }
 0x1b8   : > { %v2464_v11 = vsel %vm238_vm0, %v2461_v4, %v2462_v21  ;;  %v2505_v20 = vrot.slane %v2500_v7, 4 }
 0x1b9   : > { %v2466_v18 = vsel %vm9304_vm4, %v2456_v2, %v2464_v11  ;;  %3244 = vrot.lane.b32.xlu1 %v7793_v16, %s9470_s8  ;;  %v2460_v10 = vpop.permute.xlu0 %2459 }
 0x1ba   : > { %2471 = vst [vmem:[#allocation2 + $0x190] sm:$0xcc] %v2466_v18  ;;  %v2463_v12 = vrot.slane %v2460_v10, 4 }
 0x1bb   : > { %v2504_v14 = vpop.permute.xlu1 %2503  ;;  %3202 = vrot.lane.b32.xlu0 %v7798_v22, %s9303_s3  ;;  %s9472_s3 = smov 95  }
 0x1bc   : > { %v2467_v15 = vsel %vm238_vm0, %v2462_v21, %v2463_v12  ;;  %v2507_v8 = vrot.slane %v2504_v14, 4 }
 0x1bd   : > { %v2468_v17 = vsel %vm9304_vm4, %v2458_v60, %v2467_v15  ;;  %3287 = vrot.lane.b32.xlu1 %v7785_v62, %s9471_s28  ;;  %v2502_v19 = vpop.permute.xlu0 %2501  ;;  %vm9452_vm4 = vcmask 121856  }
 0x1be   : > { %2472 = vst [vmem:[#allocation2 + $0x198] sm:$0xcc] %v2468_v17  ;;  %v2506_v23 = vrot.slane %v2502_v19, 4 }
 0x1bf   : > { %v2547_v24 = vpop.permute.xlu1 %2546  ;;  %3246 = vrot.lane.b32.xlu0 %v7785_v62, %s9470_s8 }
 0x1c0   : > { %v2508_v25 = vsel %vm238_vm0, %v2505_v20, %v2506_v23  ;;  %v2511_v26 = vsel %vm238_vm0, %v2506_v23, %v2507_v8  ;;  %v2551_v27 = vrot.slane %v2547_v24, 4 }
 0x1c1   : > { %v2510_v13 = vsel %vm9307_vm14, %v2500_v7, %v2508_v25  ;;  %v2512_v36 = vsel %vm9307_vm14, %v2502_v19, %v2511_v26  ;;  %3331 = vrot.lane.b32.xlu1 %v7793_v16, %s9472_s3  ;;  %v2545_v28 = vpop.permute.xlu0 %2544  ;;  %vm2598_vm14 = vcmask 113664  }
 0x1c2   : > { %2515 = vst [vmem:[#allocation2 + $0x1a0] sm:$0x33] %v2510_v13  ;;  %2516 = vst [vmem:[#allocation2 + $0x1a8] sm:$0x33] %v2512_v36  ;;  %v2550_v29 = vrot.slane %v2545_v28, 4 }
 0x1c3   : > { %v2589_v30 = vpop.permute.xlu1 %2588  ;;  %3289 = vrot.lane.b32.xlu0 %v7798_v22, %s9471_s28 }
 0x1c4   : > { %v2553_v31 = vsel %vm238_vm0, %v2550_v29, %v2551_v27  ;;  %v2594_v40 = vrot.slane %v2589_v30, 4 }
 0x1c5   : > { %v2555_v32 = vsel %vm9452_vm4, %v2545_v28, %v2553_v31  ;;  %3024 = vrot.lane.b32.xlu1 %v7785_v62, %s9347_s13  ;;  %v2549_v33 = vpop.permute.xlu0 %2548  ;;  %v7253_v31 = vmov 839922192  }
 0x1c6   : > { %2560 = vst [vmem:[#allocation2 + $0x1a0] sm:$0xcc] %v2555_v32  ;;  %v2552_v34 = vrot.slane %v2549_v33, 4  ;;  %v5511_v32 = vunpack.c.l.s4 %v7253_v31 }
 0x1c7   : > { %v4249_v35 = vpop.permute.xlu1 %4248  ;;  %3333 = vrot.lane.b32.xlu0 %v7785_v62, %s9472_s3 }
 0x1c8   : > { %v2556_v37 = vsel %vm238_vm0, %v2551_v27, %v2552_v34  ;;  %v4254_v46 = vrot.slane %v4249_v35, 4 }
 0x1c9   : > { %v2557_v38 = vsel %vm9452_vm4, %v2547_v24, %v2556_v37  ;;  %3069 = vrot.lane.b32.xlu1 %v7793_v16, %s9326_s7  ;;  %v7986_v39 = vpop.permute.xlu0 %2590  ;;  %v7254_v37 = vmov 1985246804  }
 0x1ca   : > { %9473 = vst [vmem:[#allocation6_spill] sm:$0xff] %v7986_v39  ;;  %2561 = vst [vmem:[#allocation2 + $0x1a8] sm:$0xcc] %v2557_v38  ;;  %v9328_v41 = vrot.slane %v7986_v39, 4  ;;  %v5518_v38 = vunpack.c.l.s4 %v7254_v37 }
 0x1cb   : > { %v4293_v42 = vpop.permute.xlu1 %4292  ;;  %3026 = vrot.lane.b32.xlu0 %v7798_v22, %s9347_s13 }
 0x1cc   : > { %v2597_v43 = vsel %vm238_vm0, %v2594_v40, %v9328_v41  ;;  %v4298_v53 = vrot.slane %v4293_v42, 4 }
 0x1cd   : > { %v2599_v44 = vsel %vm2598_vm14, %v2589_v30, %v2597_v43  ;;  %3113 = vrot.lane.b32.xlu1 %v7785_v62, %s9474_s18  ;;  %v7997_v45 = vpop.permute.xlu0 %4250 }
 0x1ce   : > { %2604 = vst [vmem:[#allocation2 + $0x1b0] sm:$0x33] %v2599_v44  ;;  %v9388_v47 = vrot.slane %v7997_v45, 4  ;;  %v7255_v44 = vmov 0.0  }
 0x1cf   : > { %v4336_v49 = vpop.permute.xlu1 %4335  ;;  %3071 = vrot.lane.b32.xlu0 %v7785_v62, %s9326_s7 }
 0x1d0   : > { %v4257_v50 = vsel %vm238_vm0, %v4254_v46, %v9388_v47  ;;  %v4341_v59 = vrot.slane %v4336_v49, 4 }
 0x1d1   : > { %v4258_v51 = vsel %vm1931_vm6, %v4249_v35, %v4257_v50  ;;  %3157 = vrot.lane.b32.xlu1 %v7793_v16, %s9475_s27  ;;  %v8009_v9 = vpop.permute.xlu0 %4294 }
 0x1d2   : > { %4263 = vst [vmem:[#allocation2 + $0x2e0] sm:$0x33] %v4258_v51  ;;  %v9385_v54 = vrot.slane %v8009_v9, 4 }
 0x1d3   : > { %v4380_v55 = vpop.permute.xlu1 %4379  ;;  %3115 = vrot.lane.b32.xlu0 %v7798_v22, %s9474_s18 }
 0x1d4   : > { %v4301_v56 = vsel %vm238_vm0, %v4298_v53, %v9385_v54  ;;  %v4385_v1 = vrot.slane %v4380_v55, 4 }
 0x1d5   : > { %v4302_v57 = vsel %vm1975_vm2, %v4293_v42, %v4301_v56  ;;  %2850 = vrot.lane.b32.xlu1 %v7785_v62, %s9476_s22  ;;  %v8020_v16 = vpop.permute.xlu0 %4337  ;;  %v5512_v42 = vunpack.c.0.s8 %v5511_v32 }
 0x1d6   : > { %4307 = vst [vmem:[#allocation2 + $0x2e0] sm:$0xcc] %v4302_v57  ;;  %v9386_v6 = vrot.slane %v8020_v16, 4 }
 0x1d7   : > { %v4075_v60 = vpop.permute.xlu1 %4074  ;;  %3159 = vrot.lane.b32.xlu0 %v7785_v62, %s9475_s27  ;;  %v2915_v62 = vcombine.high %v2867_v48, %v2867_v48  ;;  %v5519_v48 = vunpack.c.0.s8 %v5518_v38  ;;  %v5515_v51 = vsub.s32 %v5512_v42, %v7298_v3 }
 0x1d8   : > { %v4344_v61 = vsel %vm238_vm0, %v4341_v59, %v9386_v6  ;;  %v4080_v10 = vrot.slane %v4075_v60, 4  ;;  %v8102_v59 = vld [vmem:[%s7307_s16 + $0x4] sm:$0xff] }
 0x1d9   : > { %v4345_v63 = vsel %vm2020_vm10, %v4336_v49, %v4344_v61  ;;  %2894 = vrot.lane.b32.xlu1 %v8023_v58, %s9477_s15  ;;  %v8034_v21 = vpop.permute.xlu0 %4381  ;;  %v7001_v6 = vld [vmem:[%s7307_s16 + $0xa] ss:$0 sps:$4 sm:$0x33]  }
 0x1da   : > { %4350 = vst [vmem:[#allocation2 + $0x2f0] sm:$0x33] %v4345_v63  ;;  %v9382_v2 = vrot.slane %v8034_v21, 4 }
 0x1db   : > { %v4119_v4 = vpop.permute.xlu1 %4118  ;;  %2852 = vrot.lane.b32.xlu0 %v7798_v22, %s9476_s22  ;;  %v8054_v22 = vrot.slane %v2915_v62, %v7302_v5 }
 0x1dc   : > { %v4388_v7 = vsel %vm238_vm0, %v4385_v1, %v9382_v2  ;;  %v4124_v19 = vrot.slane %v4119_v4, 4  ;;  %v7256_v1 = vmov 0.0|0.0  }
 0x1dd   : > { %v4389_v11 = vsel %vm2064_vm3, %v4380_v55, %v4388_v7  ;;  %2937 = vrot.lane.b32.xlu1 %v8037_v0, %s9478_s17  ;;  %v8048_v18 = vpop.permute.xlu0 %4076  ;;  %v5522_v55 = vsub.s32 %v5519_v48, %v7298_v3 }
 0x1de   : > { %4394 = vst [vmem:[#allocation2 + $0x2f0] sm:$0xcc] %v4389_v11  ;;  %v9383_v12 = vrot.slane %v8048_v18, 4 }
 0x1df   : > { %v4162_v14 = vpop.permute.xlu1 %4161  ;;  %2896 = vrot.lane.b32.xlu0 %v8037_v0, %s9477_s15 }
 0x1e0   : > { %v4083_v15 = vsel %vm238_vm0, %v4080_v10, %v9383_v12  ;;  %v4167_v36 = vrot.slane %v4162_v14, 4  ;;  %v8116_v10 = vrot.slane %v8102_v59, %v7302_v5 }
 0x1e1   : > { %v4084_v8 = vsel %vm1753_vm11, %v4075_v60, %v4083_v15  ;;  %2981 = vrot.lane.b32.xlu1 %v8023_v58, %s9479_s21  ;;  %v8062_v17 = vpop.permute.xlu0 %4120 }
 0x1e2   : > { %4089 = vst [vmem:[#allocation2 + $0x2c0] sm:$0x33] %v4084_v8  ;;  %v9370_v20 = vrot.slane %v8062_v17, 4 }
 0x1e3   : > { %v4206_v23 = vpop.permute.xlu1 %4205  ;;  %2939 = vrot.lane.b32.xlu0 %v8054_v22, %s9478_s17 }
 0x1e4   : > { %v4127_v24 = vsel %vm238_vm0, %v4124_v19, %v9370_v20  ;;  %v4211_v33 = vrot.slane %v4206_v23, 4 }
 0x1e5   : > { %v4128_v25 = vsel %vm9316_vm1, %v4119_v4, %v4127_v24  ;;  %2676 = vrot.lane.b32.xlu1 %v8037_v0, %s9480_s14  ;;  %v8073_v26 = vpop.permute.xlu0 %4163  ;;  %v6967_v27 = vld [vmem:[#allocation2 + $0x2e4] ss:$16 sps:$4 sm:$0xff]   ;;  %v6969_v13 = vld [vmem:[#allocation2 + $0x2e0] ss:$16 sps:$4 sm:$0xff]   ;;  %vm5494_vm1 = vcmp.eq.s32.totalorder %v7298_v3, 0  ;;  %v5530_v4 = vrot.slane %v7256_v1, %v5515_v51 }
 0x1e6   : > { %4133 = vst [vmem:[#allocation2 + $0x2c0] sm:$0xcc] %v4128_v25  ;;  %v9371_v28 = vrot.slane %v8073_v26, 4  ;;  %6388 = vmatprep.subr.bf16.mxu1 %v6967_v27  ;;  %v6675_v46 = vsel %vm5494_vm1, 1.0, %v7255_v44  ;;  %v5449_v25 = vcombine.high %v8102_v59, %v8102_v59  ;;  %vm5538_vm1 = vcmask 1041408  }
 0x1e7   : > { %v3899_v29 = vpop.permute.xlu1 %3898  ;;  %2983 = vrot.lane.b32.xlu0 %v8037_v0, %s9479_s21  ;;  %6389 = vmatpush1.bf16.msra.mxu1 %v6969_v13  ;;  %v5506_v50 = vpack.c.bf16 %v7255_v44, %v6675_v46 }
 0x1e8   : > { %v4170_v30 = vsel %vm238_vm0, %v4167_v36, %v9371_v28  ;;  %v3904_v56 = vrot.slane %v3899_v29, 4  ;;  %v8148_v46 = vrot.slane %v5449_v25, %v7302_v5 }
 0x1e9   : > { %v4171_v34 = vsel %vm1842_vm15, %v4162_v14, %v4170_v30  ;;  %2720 = vrot.lane.b32.xlu1 %v8023_v58, %s9481_s20  ;;  %v8084_v35 = vpop.permute.xlu0 %4207  ;;  %v5516_v60 = vrot.slane %v5506_v50, %v5515_v51  ;;  %v5523_v63 = vrot.slane %v5506_v50, %v5522_v55  ;;  %v5537_v14 = vrot.slane %v7256_v1, %v5522_v55 }
 0x1ea   : > { %4176 = vst [vmem:[#allocation2 + $0x2d0] sm:$0x33] %v4171_v34  ;;  %v9361_v40 = vrot.slane %v8084_v35, 4 }
 0x1eb   : > { %v3943_v43 = vpop.permute.xlu1 %3942  ;;  %2678 = vrot.lane.b32.xlu0 %v8054_v22, %s9480_s14  ;;  %v5541_v7 = vrot.slane %v5516_v60, 6  ;;  %v5543_v15 = vrot.slane %v5523_v63, 6  ;;  %v5549_v30 = vrot.slane %v5537_v14, 6 }
 0x1ec   : > { %v4214_v49 = vsel %vm238_vm0, %v4211_v33, %v9361_v40  ;;  %v3948_v8 = vrot.slane %v3943_v43, 4 }
 0x1ed   : > { %v4215_v52 = vsel %vm9319_vm5, %v4206_v23, %v4214_v49  ;;  %2763 = vrot.lane.b32.xlu1 %v8037_v0, %s9482_s24  ;;  %v8097_v53 = vpop.permute.xlu0 %3900  ;;  %v5546_v23 = vrot.slane %v5530_v4, 6  ;;  %5555 = vst [vmem:[#allocation2 + $0x3c0] sm:$0xcc] %v5541_v7  ;;  %5556 = vst [vmem:[#allocation2 + $0x3c8] sm:$0xcc] %v5541_v7  ;;  %vm5539_vm5 = vcmask 1045508  }
 0x1ee   : > { %4220 = vst [vmem:[#allocation2 + $0x2d0] sm:$0xcc] %v4215_v52  ;;  %v9369_v57 = vrot.slane %v8097_v53, 4  ;;  %v5545_v27 = vrot.slane %v5543_v15, 4  ;;  %v5542_v50 = vrot.slane %v5541_v7, 4 }
 0x1ef   : > { %v3986_v61 = vpop.permute.xlu1 %3985  ;;  %2722 = vrot.lane.b32.xlu0 %v8037_v0, %s9481_s20 }
 0x1f0   : > { %v3907_v62 = vsel %vm238_vm0, %v3904_v56, %v9369_v57  ;;  %v3991_v38 = vrot.slane %v3986_v61, 4  ;;  %v5317_v56 = vcombine.low %v8102_v59, %v8102_v59 }
 0x1f1   : > { %v3908_v3 = vsel %vm9320_vm13, %v3899_v29, %v3907_v62  ;;  %2807 = vrot.lane.b32.xlu1 %v8023_v58, %s9483_s26  ;;  %v8112_v11 = vpop.permute.xlu0 %3944  ;;  %vm8126_vm13 = vmor %vm5538_vm1, %vm5539_vm5  ;;  %v5548_v29 = vrot.slane %v5546_v23, 4  ;;  %vm3995_vm5 = vcmask 531456   ;;  %vm9362_vm1 = vcmask 523264  }
 0x1f2   : > { %3913 = vst [vmem:[#allocation2 + $0x2a0] sm:$0x33] %v3908_v3  ;;  %v9356_v19 = vrot.slane %v8112_v11, 4  ;;  %v8137_v37 = vsel %vm8126_vm13, %v5545_v27, %v5546_v23  ;;  %v8167_v60 = vsel %vm8126_vm13, %v5542_v50, %v5543_v15  ;;  %v8182_v7 = vrot.slane %v5317_v56, %v7302_v5 }
 0x1f3   : > { %v4031_v24 = vpop.permute.xlu1 %4030  ;;  %2765 = vrot.lane.b32.xlu0 %v8054_v22, %s9482_s24  ;;  %5560 = vst [vmem:[#allocation2 + $0x3e8] sm:$0xff] %v8137_v37  ;;  %5558 = vst [vmem:[#allocation2 + $0x3d8] sm:$0xff] %v8167_v60 }
 0x1f4   : > { %v3951_v13 = vsel %vm238_vm0, %v3948_v8, %v9356_v19  ;;  %v4036_v63 = vrot.slane %v4031_v24, 4 }
 0x1f5   : > { %v3952_v31 = vsel %vm1619_vm12, %v3943_v43, %v3951_v13  ;;  %5471 = vrot.lane.b32.xlu1 %v8116_v10, %s9323_s25  ;;  %v8133_v32 = vpop.permute.xlu0 %3987  ;;  %v6970_v33 = vld [vmem:[#allocation2 + $0x2c4] ss:$16 sps:$4 sm:$0xff]   ;;  %v6972_v34 = vld [vmem:[#allocation2 + $0x2c0] ss:$16 sps:$4 sm:$0xff]   ;;  %v8142_v43 = vsel %vm8126_vm13, %v5548_v29, %v5549_v30  ;;  %vm9487_vm13 = vcmask 556032  }
 0x1f6   : > { %3957 = vst [vmem:[#allocation2 + $0x2a0] sm:$0xcc] %v3952_v31  ;;  %v9357_v42 = vrot.slane %v8133_v32, 4  ;;  %6390 = vmatprep.subr.bf16.mxu1 %v6970_v33  ;;  %v6805_v48 = vcombine.high %v8137_v37, %v8142_v43  ;;  %5562 = vst [vmem:[#allocation2 + $0x3f8] sm:$0xff] %v8142_v43  ;;  %v6804_v49 = vcombine.low %v8137_v37, %v8142_v43 }
 0x1f7   : > { %v3725_v44 = vpop.permute.xlu1 %3724  ;;  %2809 = vrot.lane.b32.xlu0 %v8037_v0, %s9483_s26  ;;  %6391 = vmatpush1.bf16.msra.mxu1 %v6972_v34  ;;  %v6994_v37 = vld [vmem:[%s7307_s16 + $0xa] ss:$0 sps:$4 sm:$0x33]  }
 0x1f8   : > { %v3994_v51 = vsel %vm238_vm0, %v3991_v38, %v9357_v42  ;;  %v3730_v3 = vrot.slane %v3725_v44, 4 }
 0x1f9   : > { %v3996_v52 = vsel %vm3995_vm5, %v3986_v61, %v3994_v51  ;;  %2633 = vrot.lane.b32.xlu1 %v8023_v58, %s9486_s6  ;;  %v8161_v55 = vpop.permute.xlu0 %4032 }
 0x1fa   : > { %4001 = vst [vmem:[#allocation2 + $0x2b0] sm:$0x33] %v3996_v52  ;;  %v9346_v1 = vrot.slane %v8161_v55, 4 }
 0x1fb   : > { %v3769_v61 = vpop.permute.xlu1 %3768  ;;  %5473 = vrot.lane.b32.xlu0 %v8148_v46, %s9323_s25  ;;  %s9325_s25 = smov 115  }
 0x1fc   : > { %v4039_v4 = vsel %vm238_vm0, %v4036_v63, %v9346_v1  ;;  %v3774_v25 = vrot.slane %v3769_v61, 4 }
 0x1fd   : > { %v4041_v59 = vsel %vm9362_vm1, %v4031_v24, %v4039_v4  ;;  %5296 = vrot.lane.b32.xlu1 %v8116_v10, %s9479_s21  ;;  %v8179_v62 = vpop.permute.xlu0 %3726  ;;  %vm9505_vm1 = vcmask 809984  }
 0x1fe   : > { %4046 = vst [vmem:[#allocation2 + $0x2b0] sm:$0xcc] %v4041_v59  ;;  %v9355_v14 = vrot.slane %v8179_v62, 4 }
 0x1ff   : > { %v3812_v15 = vpop.permute.xlu1 %3811  ;;  %2635 = vrot.lane.b32.xlu0 %v8037_v0, %s9486_s6 }
 0x200   : > { %v3733_v8 = vsel %vm238_vm0, %v3730_v3, %v9355_v14  ;;  %v3817_v34 = vrot.slane %v3812_v15, 4 }
 0x201   : > { %v3734_v23 = vsel %vm1397_vm9, %v3725_v44, %v3733_v8  ;;  %5340 = vrot.lane.b32.xlu1 %v8182_v7, %s9347_s13  ;;  %v8193_v24 = vpop.permute.xlu0 %3770 }
 0x202   : > { %3739 = vst [vmem:[#allocation2 + $0x280] sm:$0x33] %v3734_v23  ;;  %v9336_v27 = vrot.slane %v8193_v24, 4 }
 0x203   : > { %v3856_v13 = vpop.permute.xlu1 %3855  ;;  %5298 = vrot.lane.b32.xlu0 %v8148_v46, %s9479_s21 }
 0x204   : > { %v3777_v36 = vsel %vm238_vm0, %v3774_v25, %v9336_v27  ;;  %v3861_v56 = vrot.slane %v3856_v13, 4 }
 0x205   : > { %v3778_v29 = vsel %vm9324_vm8, %v3769_v61, %v3777_v36  ;;  %5383 = vrot.lane.b32.xlu1 %v8116_v10, %s9326_s7  ;;  %v8204_v30 = vpop.permute.xlu0 %3813  ;;  %v6975_v31 = vld [vmem:[#allocation2 + $0x2a4] ss:$16 sps:$4 sm:$0xff]   ;;  %v6977_v33 = vld [vmem:[#allocation2 + $0x2a0] ss:$16 sps:$4 sm:$0xff]   ;;  %vm9330_vm8 = vcmask 736256  }
 0x206   : > { %3783 = vst [vmem:[#allocation2 + $0x280] sm:$0xcc] %v3778_v29  ;;  %v9338_v38 = vrot.slane %v8204_v30, 4  ;;  %6392 = vmatprep.subr.bf16.mxu1 %v6975_v31 }
 0x207   : > { %v3550_v44 = vpop.permute.xlu1 %3549  ;;  %5342 = vrot.lane.b32.xlu0 %v8116_v10, %s9347_s13  ;;  %6393 = vmatpush1.bf16.msra.mxu1 %v6977_v33  ;;  %s9500_s13 = smov 21  }
 0x208   : > { %v3820_v50 = vsel %vm238_vm0, %v3817_v34, %v9338_v38 }
 0x209   : > { %v3821_v51 = vsel %vm9358_vm7, %v3812_v15, %v3820_v50  ;;  %5427 = vrot.lane.b32.xlu1 %v8182_v7, %s9325_s25  ;;  %v8215_v52 = vpop.permute.xlu0 %3857  ;;  %v3555_v15 = vrot.slane %v3550_v44, 4  ;;  %vm9503_vm7 = vcmask 818176  }
 0x20a   : > { %3826 = vst [vmem:[#allocation2 + $0x290] sm:$0x33] %v3821_v51  ;;  %v9334_v63 = vrot.slane %v8215_v52, 4 }
 0x20b   : > { %v3595_v61 = vpop.permute.xlu1 %3594  ;;  %5385 = vrot.lane.b32.xlu0 %v8148_v46, %s9326_s7  ;;  %s9340_s7 = smov 12  }
 0x20c   : > { %v3864_v4 = vsel %vm238_vm0, %v3861_v56, %v9334_v63  ;;  %v3600_v29 = vrot.slane %v3595_v61, 4 }
 0x20d   : > { %v3865_v59 = vsel %vm9487_vm13, %v3856_v13, %v3864_v4  ;;  %5122 = vrot.lane.b32.xlu1 %v8116_v10, %s9483_s26  ;;  %v8226_v3 = vpop.permute.xlu0 %3551  ;;  %vm9488_vm13 = vcmask 605184  }
 0x20e   : > { %3870 = vst [vmem:[#allocation2 + $0x290] sm:$0xcc] %v3865_v59  ;;  %v9335_v8 = vrot.slane %v8226_v3, 4 }
 0x20f   : > { %v3638_v23 = vpop.permute.xlu1 %3637  ;;  %5429 = vrot.lane.b32.xlu0 %v8116_v10, %s9325_s25  ;;  %s9339_s25 = smov 13  }
 0x210   : > { %v3558_v25 = vsel %vm238_vm0, %v3555_v15, %v9335_v8  ;;  %v3643_v15 = vrot.slane %v3638_v23, 4 }
 0x211   : > { %v3560_v13 = vsel %vm9330_vm8, %v3550_v44, %v3558_v25  ;;  %5166 = vrot.lane.b32.xlu1 %v8182_v7, %s9476_s22  ;;  %v8237_v36 = vpop.permute.xlu0 %3596  ;;  %v8248_v44 = vld [vmem:[%s9222_s0] sm:$0xff]  ;;  %vm9490_vm8 = vcmask 588800  }
 0x212   : > { %3565 = vst [vmem:[#allocation2 + $0x260] sm:$0x33] %v3560_v13  ;;  %v9329_v31 = vrot.slane %v8237_v36, 4  ;;  %v8257_v59 = vcombine.high %v8248_v44, %v8248_v44 }
 0x213   : > { %v3682_v33 = vpop.permute.xlu1 %3681  ;;  %5124 = vrot.lane.b32.xlu0 %v8148_v46, %s9483_s26 }
 0x214   : > { %v3603_v34 = vsel %vm238_vm0, %v3600_v29, %v9329_v31  ;;  %6379 = vmatprep.mubr.bf16.mxu0 %v8257_v59 }
 0x215   : > { %v3604_v50 = vsel %vm9488_vm13, %v3595_v61, %v3603_v34  ;;  %5209 = vrot.lane.b32.xlu1 %v8116_v10, %s9477_s15  ;;  %v8253_v51 = vpop.permute.xlu0 %3639  ;;  %v6978_v56 = vld [vmem:[#allocation2 + $0x284] ss:$16 sps:$4 sm:$0xff]   ;;  %v6980_v4 = vld [vmem:[#allocation2 + $0x280] ss:$16 sps:$4 sm:$0xff]   ;;  %vm9489_vm13 = vcmask 596992  }
 0x216   : > { %3609 = vst [vmem:[#allocation2 + $0x260] sm:$0xcc] %v3604_v50  ;;  %v9332_v25 = vrot.slane %v8253_v51, 4  ;;  %6394 = vmatprep.subr.bf16.mxu1 %v6978_v56  ;;  %v3687_v50 = vrot.slane %v3682_v33, 4 }
 0x217   : > { %v3375_v13 = vpop.permute.xlu1 %3374  ;;  %5168 = vrot.lane.b32.xlu0 %v8116_v10, %s9476_s22  ;;  %6395 = vmatpush1.bf16.msra.mxu1 %v6980_v4 }
 0x218   : > { %v3646_v61 = vsel %vm238_vm0, %v3643_v15, %v9332_v25  ;;  %v3380_v15 = vrot.slane %v3375_v13, 4 }
 0x219   : > { %v3647_v29 = vsel %vm9489_vm13, %v3638_v23, %v3646_v61  ;;  %5253 = vrot.lane.b32.xlu1 %v8182_v7, %s9478_s17  ;;  %v8269_v34 = vpop.permute.xlu0 %3683  ;;  %vm9491_vm13 = vcmask 769024  }
 0x21a   : > { %3652 = vst [vmem:[#allocation2 + $0x270] sm:$0x33] %v3647_v29  ;;  %v9331_v41 = vrot.slane %v8269_v34, 4 }
 0x21b   : > { %v3419_v31 = vpop.permute.xlu1 %3418  ;;  %5211 = vrot.lane.b32.xlu0 %v8148_v46, %s9477_s15 }
 0x21c   : > { %v3690_v56 = vsel %vm238_vm0, %v3687_v50, %v9331_v41  ;;  %v3424_v41 = vrot.slane %v3419_v31, 4 }
 0x21d   : > { %v3691_v4 = vsel %vm9490_vm8, %v3682_v33, %v3690_v56  ;;  %4946 = vrot.lane.b32.xlu1 %v8037_v0, %s9339_s25  ;;  %v8280_v23 = vpop.permute.xlu0 %3376  ;;  %vm9492_vm8 = vcmask 760832  }
 0x21e   : > { %3696 = vst [vmem:[#allocation2 + $0x270] sm:$0xcc] %v3691_v4  ;;  %v9333_v61 = vrot.slane %v8280_v23, 4 }
 0x21f   : > { %v3462_v29 = vpop.permute.xlu1 %3461  ;;  %5255 = vrot.lane.b32.xlu0 %v8116_v10, %s9478_s17 }
 0x220   : > { %v3383_v50 = vsel %vm238_vm0, %v3380_v15, %v9333_v61 }
 0x221   : > { %v3384_v33 = vsel %vm9491_vm13, %v3375_v13, %v3383_v50  ;;  %4991 = vrot.lane.b32.xlu1 %v8023_v58, %s9340_s7  ;;  %v8291_v56 = vpop.permute.xlu0 %3420  ;;  %vm9493_vm13 = vcmask 752640  }
 0x222   : > { %3389 = vst [vmem:[#allocation2 + $0x240] sm:$0x33] %v3384_v33  ;;  %v9337_v4 = vrot.slane %v8291_v56, 4  ;;  %v3467_v33 = vrot.slane %v3462_v29, 4 }
 0x223   : > { %v3506_v25 = vpop.permute.xlu1 %3505  ;;  %4948 = vrot.lane.b32.xlu0 %v8054_v22, %s9339_s25  ;;  %s9494_s25 = smov 17  }
 0x224   : > { %v3427_v15 = vsel %vm238_vm0, %v3424_v41, %v9337_v4 }
 0x225   : > { %v3428_v13 = vsel %vm9492_vm8, %v3419_v31, %v3427_v15  ;;  %5035 = vrot.lane.b32.xlu1 %v8116_v10, %s9481_s20  ;;  %v8302_v50 = vpop.permute.xlu0 %3463  ;;  %v6981_v61 = vld [vmem:[#allocation2 + $0x264] ss:$16 sps:$4 sm:$0xff]   ;;  %v6983_v63 = vld [vmem:[#allocation2 + $0x260] ss:$16 sps:$4 sm:$0xff]   ;;  %vm9341_vm8 = vcmask 744448  }
 0x226   : > { %3433 = vst [vmem:[#allocation2 + $0x240] sm:$0xcc] %v3428_v13  ;;  %v9344_v8 = vrot.slane %v8302_v50, 4  ;;  %6396 = vmatprep.subr.bf16.mxu1 %v6981_v61  ;;  %v3511_v13 = vrot.slane %v3506_v25, 4 }
 0x227   : > { %v3201_v27 = vpop.permute.xlu1 %3200  ;;  %4993 = vrot.lane.b32.xlu0 %v8037_v0, %s9340_s7  ;;  %6397 = vmatpush1.bf16.msra.mxu1 %v6983_v63  ;;  %s9496_s7 = smov 16  }
 0x228   : > { %v3470_v41 = vsel %vm238_vm0, %v3467_v33, %v9344_v8 }
 0x229   : > { %v3471_v31 = vsel %vm9493_vm13, %v3462_v29, %v3470_v41  ;;  %5079 = vrot.lane.b32.xlu1 %v8182_v7, %s9482_s24  ;;  %v8313_v15 = vpop.permute.xlu0 %3507  ;;  %v3206_v29 = vrot.slane %v3201_v27, 4  ;;  %vm9495_vm13 = vcmask 801792  }
 0x22a   : > { %3476 = vst [vmem:[#allocation2 + $0x250] sm:$0x33] %v3471_v31  ;;  %v9342_v4 = vrot.slane %v8313_v15, 4 }
 0x22b   : > { %v3245_v38 = vpop.permute.xlu1 %3244  ;;  %5037 = vrot.lane.b32.xlu0 %v8148_v46, %s9481_s20 }
 0x22c   : > { %v3514_v63 = vsel %vm238_vm0, %v3511_v13, %v9342_v4  ;;  %v3250_v13 = vrot.slane %v3245_v38, 4 }
 0x22d   : > { %v3516_v61 = vsel %vm9341_vm8, %v3506_v25, %v3514_v63  ;;  %4772 = vrot.lane.b32.xlu1 %v8037_v0, %s9494_s25  ;;  %v8324_v7 = vpop.permute.xlu0 %3202  ;;  %vm9497_vm8 = vcmask 793600  }
 0x22e   : > { %3521 = vst [vmem:[#allocation2 + $0x250] sm:$0xcc] %v3516_v61  ;;  %v9343_v33 = vrot.slane %v8324_v7, 4 }
 0x22f   : > { %v3288_v41 = vpop.permute.xlu1 %3287  ;;  %5081 = vrot.lane.b32.xlu0 %v8116_v10, %s9482_s24 }
 0x230   : > { %v3209_v46 = vsel %vm238_vm0, %v3206_v29, %v9343_v33 }
 0x231   : > { %v3210_v31 = vsel %vm9495_vm13, %v3201_v27, %v3209_v46  ;;  %4816 = vrot.lane.b32.xlu1 %v8023_v58, %s9496_s7  ;;  %v8335_v25 = vpop.permute.xlu0 %3246  ;;  %vm9499_vm13 = vcmask 777216  }
 0x232   : > { %3215 = vst [vmem:[#allocation2 + $0x220] sm:$0x33] %v3210_v31  ;;  %v9345_v63 = vrot.slane %v8335_v25, 4  ;;  %v3293_v31 = vrot.slane %v3288_v41, 4 }
 0x233   : > { %v3332_v61 = vpop.permute.xlu1 %3331  ;;  %4774 = vrot.lane.b32.xlu0 %v8054_v22, %s9494_s25 }
 0x234   : > { %v3253_v10 = vsel %vm238_vm0, %v3250_v13, %v9345_v63 }
 0x235   : > { %v3254_v29 = vsel %vm9497_vm8, %v3245_v38, %v3253_v10  ;;  %4859 = vrot.lane.b32.xlu1 %v8037_v0, %s9349_s5  ;;  %v8346_v27 = vpop.permute.xlu0 %3289  ;;  %v6984_v46 = vld [vmem:[#allocation2 + $0x244] ss:$16 sps:$4 sm:$0xff]   ;;  %v6986_v4 = vld [vmem:[#allocation2 + $0x240] ss:$16 sps:$4 sm:$0xff]   ;;  %vm9498_vm8 = vcmask 785408  }
 0x236   : > { %3259 = vst [vmem:[#allocation2 + $0x220] sm:$0xcc] %v3254_v29  ;;  %v9351_v33 = vrot.slane %v8346_v27, 4  ;;  %6398 = vmatprep.subr.bf16.mxu1 %v6984_v46  ;;  %v3337_v29 = vrot.slane %v3332_v61, 4 }
 0x237   : > { %v3025_v8 = vpop.permute.xlu1 %3024  ;;  %4818 = vrot.lane.b32.xlu0 %v8037_v0, %s9496_s7  ;;  %6399 = vmatpush1.bf16.msra.mxu1 %v6986_v4 }
 0x238   : > { %v3296_v38 = vsel %vm238_vm0, %v3293_v31, %v9351_v33  ;;  %v3030_v31 = vrot.slane %v3025_v8, 4 }
 0x239   : > { %v3297_v13 = vsel %vm9498_vm8, %v3288_v41, %v3296_v38  ;;  %4903 = vrot.lane.b32.xlu1 %v8023_v58, %s9352_s4  ;;  %v8357_v10 = vpop.permute.xlu0 %3333  ;;  %vm3034_vm8 = vcmask 957440  }
 0x23a   : > { %3302 = vst [vmem:[#allocation2 + $0x230] sm:$0x33] %v3297_v13  ;;  %v9350_v63 = vrot.slane %v8357_v10, 4 }
 0x23b   : > { %v3070_v1 = vpop.permute.xlu1 %3069  ;;  %4861 = vrot.lane.b32.xlu0 %v8054_v22, %s9349_s5  ;;  %s9501_s5 = smov 20  }
 0x23c   : > { %v3340_v46 = vsel %vm238_vm0, %v3337_v29, %v9350_v63  ;;  %v3075_v63 = vrot.slane %v3070_v1, 4 }
 0x23d   : > { %v3341_v4 = vsel %vm9499_vm13, %v3332_v61, %v3340_v46  ;;  %4598 = vrot.lane.b32.xlu1 %v8037_v0, %s9500_s13  ;;  %v8368_v41 = vpop.permute.xlu0 %3026  ;;  %vm3079_vm13 = vcmask 949248  }
 0x23e   : > { %3346 = vst [vmem:[#allocation2 + $0x230] sm:$0xcc] %v3341_v4  ;;  %v9354_v38 = vrot.slane %v8368_v41, 4 }
 0x23f   : > { %v3114_v13 = vpop.permute.xlu1 %3113  ;;  %4905 = vrot.lane.b32.xlu0 %v8037_v0, %s9352_s4  ;;  %s9502_s4 = smov 19  }
 0x240   : > { %v3033_v29 = vsel %vm238_vm0, %v3030_v31, %v9354_v38  ;;  %v3119_v14 = vrot.slane %v3114_v13, 4 }
 0x241   : > { %v3035_v61 = vsel %vm3034_vm8, %v3025_v8, %v3033_v29  ;;  %4642 = vrot.lane.b32.xlu1 %v8023_v58, %s9501_s5  ;;  %v8379_v46 = vpop.permute.xlu0 %3071 }
 0x242   : > { %3040 = vst [vmem:[#allocation2 + $0x200] sm:$0x33] %v3035_v61  ;;  %v9360_v4 = vrot.slane %v8379_v46, 4 }
 0x243   : > { %v3158_v33 = vpop.permute.xlu1 %3157  ;;  %4600 = vrot.lane.b32.xlu0 %v8054_v22, %s9500_s13 }
 0x244   : > { %v3078_v31 = vsel %vm238_vm0, %v3075_v63, %v9360_v4 }
 0x245   : > { %v3080_v8 = vsel %vm3079_vm13, %v3070_v1, %v3078_v31  ;;  %4685 = vrot.lane.b32.xlu1 %v8037_v0, %s9502_s4  ;;  %v8390_v29 = vpop.permute.xlu0 %3115  ;;  %v6987_v38 = vld [vmem:[#allocation2 + $0x224] ss:$16 sps:$4 sm:$0xff]   ;;  %v6989_v61 = vld [vmem:[#allocation2 + $0x220] ss:$16 sps:$4 sm:$0xff]  }
 0x246   : > { %3085 = vst [vmem:[#allocation2 + $0x200] sm:$0xcc] %v3080_v8  ;;  %v9364_v19 = vrot.slane %v8390_v29, 4  ;;  %6400 = vmatprep.subr.bf16.mxu1 %v6987_v38  ;;  %v3163_v8 = vrot.slane %v3158_v33, 4 }
 0x247   : > { %v2851_v42 = vpop.permute.xlu1 %2850  ;;  %4644 = vrot.lane.b32.xlu0 %v8037_v0, %s9501_s5  ;;  %6401 = vmatpush1.bf16.msra.mxu1 %v6989_v61 }
 0x248   : > { %v3122_v1 = vsel %vm238_vm0, %v3119_v14, %v9364_v19  ;;  %v2856_v61 = vrot.slane %v2851_v42, 4 }
 0x249   : > { %v3123_v63 = vsel %vm9503_vm7, %v3114_v13, %v3122_v1  ;;  %4729 = vrot.lane.b32.xlu1 %v8023_v58, %s9504_s19  ;;  %v8401_v31 = vpop.permute.xlu0 %3159  ;;  %vm9507_vm7 = vcmask 990208  }
 0x24a   : > { %3128 = vst [vmem:[#allocation2 + $0x210] sm:$0x33] %v3123_v63  ;;  %v9366_v4 = vrot.slane %v8401_v31, 4 }
 0x24b   : > { %v2895_v40 = vpop.permute.xlu1 %2894  ;;  %4687 = vrot.lane.b32.xlu0 %v8054_v22, %s9502_s4 }
 0x24c   : > { %v3166_v14 = vsel %vm238_vm0, %v3163_v8, %v9366_v4 }
 0x24d   : > { %v3167_v38 = vsel %vm9505_vm1, %v3158_v33, %v3166_v14  ;;  %4422 = vrot.lane.b32.xlu1 %v8037_v0, %s9506_s30  ;;  %v8412_v13 = vpop.permute.xlu0 %2852  ;;  %v2900_v14 = vrot.slane %v2895_v40, 4  ;;  %vm9508_vm1 = vcmask 982016  }
 0x24e   : > { %3172 = vst [vmem:[#allocation2 + $0x210] sm:$0xcc] %v3167_v38  ;;  %v9368_v1 = vrot.slane %v8412_v13, 4 }
 0x24f   : > { %v2938_v63 = vpop.permute.xlu1 %2937  ;;  %4731 = vrot.lane.b32.xlu0 %v8037_v0, %s9504_s19 }
 0x250   : > { %v2859_v19 = vsel %vm238_vm0, %v2856_v61, %v9368_v1  ;;  %v2943_v57 = vrot.slane %v2938_v63, 4 }
 0x251   : > { %v2860_v8 = vsel %vm9507_vm7, %v2851_v42, %v2859_v19  ;;  %4466 = vrot.lane.b32.xlu1 %v8023_v58, %s9375_s29  ;;  %v8423_v33 = vpop.permute.xlu0 %2896  ;;  %vm9509_vm7 = vcmask 973824  }
 0x252   : > { %2865 = vst [vmem:[#allocation2 + $0x1e0] sm:$0x33] %v2860_v8  ;;  %v9374_v38 = vrot.slane %v8423_v33, 4 }
 0x253   : > { %v2982_v4 = vpop.permute.xlu1 %2981  ;;  %4424 = vrot.lane.b32.xlu0 %v8054_v22, %s9506_s30 }
 0x254   : > { %v2903_v61 = vsel %vm238_vm0, %v2900_v14, %v9374_v38  ;;  %v8452_v38 = vld.sshfl [vmem:[%s7307_s16 + $0xa] sm:$0x3 pattern:$0x76325410] }
 0x255   : > { %v2904_v19 = vsel %vm9508_vm1, %v2895_v40, %v2903_v61  ;;  %4510 = vrot.lane.b32.xlu1 %v8037_v0, %s9372_s23  ;;  %v8434_v42 = vpop.permute.xlu0 %2939  ;;  %v6990_v1 = vld [vmem:[#allocation2 + $0x204] ss:$16 sps:$4 sm:$0xff]   ;;  %v6992_v8 = vld [vmem:[#allocation2 + $0x200] ss:$16 sps:$4 sm:$0xff]   ;;  %s9510_s23 = smov 22   ;;  %vm9512_vm1 = vcmask 965632  }
 0x256   : > { %2909 = vst [vmem:[#allocation2 + $0x1e0] sm:$0xcc] %v2904_v19  ;;  %v9380_v20 = vrot.slane %v8434_v42, 4  ;;  %6402 = vmatprep.subr.bf16.mxu1 %v6990_v1  ;;  %v2987_v19 = vrot.slane %v2982_v4, 4 }
 0x257   : > { %v2677_v28 = vpop.permute.xlu1 %2676  ;;  %4468 = vrot.lane.b32.xlu0 %v8037_v0, %s9375_s29  ;;  %6403 = vmatpush1.bf16.msra.mxu1 %v6992_v8  ;;  %s9511_s29 = smov 38  }
 0x258   : > { %v2946_v40 = vsel %vm238_vm0, %v2943_v57, %v9380_v20  ;;  %6404 = vmatprep.subr.bf16.mxu1 %v6805_v48 }
 0x259   : > { %v2947_v14 = vsel %vm9509_vm7, %v2938_v63, %v2946_v40  ;;  %4555 = vrot.lane.b32.xlu1 %v8023_v58, %s9510_s23  ;;  %v8445_v61 = vpop.permute.xlu0 %2983  ;;  %v6993_v63 = vld [vmem:[%s7307_s16 + $0xa] ss:$0 sps:$4 sm:$0x33]   ;;  %v2682_v40 = vrot.slane %v2677_v28, 4  ;;  %vm9514_vm7 = vcmask 1022976  }
 0x25a   : > { %2952 = vst [vmem:[#allocation2 + $0x1f0] sm:$0x33] %v2947_v14  ;;  %v9376_v1 = vrot.slane %v8445_v61, 4 }
 0x25b   : > { %v2721_v57 = vpop.permute.xlu1 %2720  ;;  %4512 = vrot.lane.b32.xlu0 %v8054_v22, %s9511_s29  ;;  %6405 = vmatpush2.bf16.msra.mxu1 %v6804_v49 }
 0x25c   : > { %v2990_v58 = vsel %vm238_vm0, %v2987_v19, %v9376_v1  ;;  %v4291_v19 = vrot.slane %v6993_v63, %v7302_v5  ;;  %v6998_v63 = vld [vmem:[%s7307_s16 + $0xa] ss:$0 sps:$4 sm:$0x33]  }
 0x25d   : > { %v2991_v48 = vsel %vm9512_vm1, %v2982_v4, %v2990_v58  ;;  %4252 = vrot.lane.b32.xlu1 %v8452_v38, %s9513_s1  ;;  %v8466_v8 = vpop.permute.xlu0 %2678  ;;  %s9515_s1 = smov 42   ;;  %v2726_v58 = vrot.slane %v2721_v57, 4  ;;  %vm9517_vm1 = vcmask 1014784  }
 0x25e   : > { %2996 = vst [vmem:[#allocation2 + $0x1f0] sm:$0xcc] %v2991_v48  ;;  %v9379_v22 = vrot.slane %v8466_v8, 4 }
 0x25f   : > { %v2764_v14 = vpop.permute.xlu1 %2763  ;;  %4557 = vrot.lane.b32.xlu0 %v8037_v0, %s9510_s23  ;;  %v4378_v0 = vrot.slane %v6994_v37, %v7302_v5 }
 0x260   : > { %v2685_v43 = vsel %vm238_vm0, %v2682_v40, %v9379_v22  ;;  %v8491_v40 = vld [vmem:[%s9222_s0 + $0x8] sm:$0xff]  ;;  %v2769_v20 = vrot.slane %v2764_v14, 4 }
 0x261   : > { %v2686_v49 = vsel %vm9514_vm7, %v2677_v28, %v2685_v43  ;;  %4339 = vrot.lane.b32.xlu1 %v8452_v38, %s9515_s1  ;;  %v8479_v4 = vpop.permute.xlu0 %2722  ;;  %s9518_s1 = smov 48   ;;  %v8500_v22 = vcombine.high %v8491_v40, %v8491_v40  ;;  %vm9520_vm7 = vcmask 1006592  }
 0x262   : > { %2691 = vst [vmem:[#allocation2 + $0x1c0] sm:$0x33] %v2686_v49  ;;  %v9381_v48 = vrot.slane %v8479_v4, 4 }
 0x263   : > { %v2808_v1 = vpop.permute.xlu1 %2807  ;;  %4296 = vrot.lane.b32.xlu0 %v4291_v19, %s9516_s12  ;;  %6420 = vmatprep.mubr.bf16.mxu1 %v8500_v22  ;;  %s9523_s12 = smov 47  }
 0x264   : > { %v2729_v28 = vsel %vm238_vm0, %v2726_v58, %v9381_v48 }
 0x265   : > { %v2730_v43 = vsel %vm9517_vm1, %v2721_v57, %v2729_v28  ;;  %4078 = vrot.lane.b32.xlu1 %v8452_v38, %s9518_s1  ;;  %v8496_v49 = vpop.permute.xlu0 %2765  ;;  %v6995_v19 = vld [vmem:[#allocation2 + $0x1e4] ss:$16 sps:$4 sm:$0xff]   ;;  %v6997_v37 = vld [vmem:[#allocation2 + $0x1e0] ss:$16 sps:$4 sm:$0xff]   ;;  %v4117_v57 = vrot.slane %v6998_v63, %v7302_v5  ;;  %vm9524_vm1 = vcmask 998400   ;;  %s9525_s1 = smov 67  }
 0x266   : > { %2735 = vst [vmem:[#allocation2 + $0x1c0] sm:$0xcc] %v2730_v43  ;;  %v9384_v58 = vrot.slane %v8496_v49, 4  ;;  %6363 = vmatprep.subr.bf16.mxu0 %v6995_v19  ;;  %v6999_v28 = vld [vmem:[%s7307_s16 + $0xa] ss:$0 sps:$4 sm:$0x33]  }
 0x267   : > { %v5472_v48 = vpop.permute.xlu1 %5471  ;;  %4383 = vrot.lane.b32.xlu0 %v4378_v0, %s9519_s10  ;;  %6364 = vmatpush2.bf16.msra.mxu0 %v6997_v37  ;;  %v2813_v0 = vrot.slane %v2808_v1, 4  ;;  %v7000_v37 = vld [vmem:[%s7307_s16 + $0xa] ss:$0 sps:$4 sm:$0x33]   ;;  %s9526_s10 = smov 45  }
 0x268   : > { %v2772_v2 = vsel %vm238_vm0, %v2769_v20, %v9384_v58  ;;  %v4204_v20 = vrot.slane %v6999_v28, %v7302_v5  ;;  %v3941_v28 = vrot.slane %v7000_v37, %v7302_v5  ;;  %v7005_v37 = vld [vmem:[%s7307_s16 + $0xa] ss:$0 sps:$4 sm:$0x33]  }
 0x269   : > { %v2773_v12 = vsel %vm9520_vm7, %v2764_v14, %v2772_v2  ;;  %4165 = vrot.lane.b32.xlu1 %v8452_v38, %s9521_s11  ;;  %v8513_v43 = vpop.permute.xlu0 %2809  ;;  %vm9416_vm7 = vcmask 932864   ;;  %s9527_s11 = smov 65  }
 0x26a   : > { %9522 = vst [vmem:[#allocation7_spill] sm:$0xff] %v8513_v43  ;;  %2778 = vst [vmem:[#allocation2 + $0x1d0] sm:$0x33] %v2773_v12  ;;  %v9387_v19 = vrot.slane %v8513_v43, 4  ;;  %v5477_v12 = vrot.slane %v5472_v48, 4 }
 0x26b   : > { %v2634_v63 = vpop.permute.xlu1 %2633  ;;  %4122 = vrot.lane.b32.xlu0 %v4117_v57, %s9523_s12  ;;  %s9529_s12 = smov 66  }
 0x26c   : > { %v2816_v2 = vsel %vm238_vm0, %v2813_v0, %v9387_v19 }
 0x26d   : > { %v2817_v14 = vsel %vm9524_vm1, %v2808_v1, %v2816_v2  ;;  %3902 = vrot.lane.b32.xlu1 %v8452_v38, %s9525_s1  ;;  %v8525_v58 = vpop.permute.xlu0 %5473  ;;  %vm9530_vm1 = vcmask 1031168   ;;  %s9531_s1 = smov 71  }
 0x26e   : > { %2822 = vst [vmem:[#allocation2 + $0x1d0] sm:$0xcc] %v2817_v14  ;;  %v9389_v57 = vrot.slane %v8525_v58, 4  ;;  %v2639_v14 = vrot.slane %v2634_v63, 4 }
 0x26f   : > { %v5297_v54 = vpop.permute.xlu1 %5296  ;;  %4209 = vrot.lane.b32.xlu0 %v4204_v20, %s9526_s10  ;;  %v4029_v20 = vrot.slane %v7001_v6, %v7302_v5  ;;  %s9533_s10 = smov 64   ;;  %v3767_v6 = vrot.slane %v7005_v37, %v7302_v5 }
 0x270   : > { %v5480_v1 = vsel %vm238_vm0, %v5477_v12, %v9389_v57  ;;  %v5302_v39 = vrot.slane %v5297_v54, 4 }
 0x271   : > { %v5482_v0 = vsel %vm9416_vm7, %v5472_v48, %v5480_v1  ;;  %3989 = vrot.lane.b32.xlu1 %v8452_v38, %s9527_s11  ;;  %v8537_v2 = vpop.permute.xlu0 %2635  ;;  %s9535_s11 = smov 69   ;;  %vm9425_vm7 = vcmask 105472  }
 0x272   : > { %9528 = vst [vmem:[#allocation8_spill] sm:$0xff] %v8537_v2  ;;  %5487 = vst [vmem:[#allocation2 + $0x3c0] sm:$0x33] %v5482_v0  ;;  %v9394_v19 = vrot.slane %v8537_v2, 4 }
 0x273   : > { %v5341_v47 = vpop.permute.xlu1 %5340  ;;  %3946 = vrot.lane.b32.xlu0 %v3941_v28, %s9529_s12  ;;  %s9537_s12 = smov 70  }
 0x274   : > { %v2642_v48 = vsel %vm238_vm0, %v2639_v14, %v9394_v19  ;;  %v7006_v14 = vld [vmem:[%s7307_s16 + $0xa] ss:$0 sps:$4 sm:$0x33]   ;;  %v5346_v2 = vrot.slane %v5341_v47, 4 }
 0x275   : > { %v2643_v12 = vsel %vm9530_vm1, %v2634_v63, %v2642_v48  ;;  %3728 = vrot.lane.b32.xlu1 %v8452_v38, %s9531_s1  ;;  %v8549_v1 = vpop.permute.xlu0 %5298  ;;  %v7002_v0 = vld [vmem:[#allocation2 + $0x1c4] ss:$16 sps:$4 sm:$0xff]   ;;  %v7004_v57 = vld [vmem:[#allocation2 + $0x1c0] ss:$16 sps:$4 sm:$0xff]   ;;  %vm9534_vm1 = vcmask 965632   ;;  %s9538_s1 = smov 90  }
 0x276   : > { %9532 = vst [vmem:[#allocation9_spill] sm:$0xff] %v8549_v1  ;;  %2648 = vst [vmem:[#allocation2 + $0x1b0] sm:$0xcc] %v2643_v12  ;;  %v9399_v28 = vrot.slane %v8549_v1, 4  ;;  %6365 = vmatprep.subr.bf16.mxu0 %v7002_v0 }
 0x277   : > { %v5384_v43 = vpop.permute.xlu1 %5383  ;;  %4034 = vrot.lane.b32.xlu0 %v4029_v20, %s9533_s10  ;;  %6366 = vmatpush2.bf16.msra.mxu0 %v7004_v57  ;;  %s9540_s10 = smov 68  }
 0x278   : > { %v5305_v63 = vsel %vm238_vm0, %v5302_v39, %v9399_v28  ;;  %v3854_v39 = vrot.slane %v7006_v14, %v7302_v5 }
 0x279   : > { %v5306_v48 = vsel %vm9534_vm1, %v5297_v54, %v5305_v63  ;;  %3815 = vrot.lane.b32.xlu1 %v8452_v38, %s9535_s11  ;;  %v8561_v12 = vpop.permute.xlu0 %5342  ;;  %v5685_v19 = vld [vmem:[#allocation2 + $0x3c0] sm:$0xff]  ;;  %v7012_v54 = vld [vmem:[%s7307_s16 + $0xa] ss:$0 sps:$4 sm:$0x33]   ;;  %s9541_s11 = smov 73   ;;  %vm9406_vm1 = vcmask 941056  }
 0x27a   : > { %9536 = vst [vmem:[#allocation10_spill] sm:$0xff] %v8561_v12  ;;  %5311 = vst [vmem:[#allocation2 + $0x3a0] sm:$0x33] %v5306_v48  ;;  %v9400_v20 = vrot.slane %v8561_v12, 4  ;;  %v6801_v37 = vcombine.high %v5685_v19, %v8167_v60  ;;  %v6800_v0 = vcombine.low %v5685_v19, %v8167_v60  ;;  %v7028_v12 = vld [vmem:[#allocation2 + $0x120] ss:$16 sps:$4 sm:$0xff]  }
 0x27b   : > { %v5428_v1 = vpop.permute.xlu1 %5427  ;;  %3772 = vrot.lane.b32.xlu0 %v3767_v6, %s9537_s12  ;;  %v5389_v6 = vrot.slane %v5384_v43, 4  ;;  %s9543_s12 = smov 74  }
 0x27c   : > { %v5349_v57 = vsel %vm238_vm0, %v5346_v2, %v9400_v20  ;;  %6406 = vmatprep.subr.bf16.mxu1 %v6801_v37  ;;  %v7010_v2 = vld [vmem:[#allocation2 + $0x184] ss:$16 sps:$4 sm:$0xff]   ;;  %v3593_v37 = vrot.slane %v7012_v54, %v7302_v5 }
 0x27d   : > { %v5350_v63 = vsel %vm3034_vm8, %v5341_v47, %v5349_v57  ;;  %3553 = vrot.lane.b32.xlu1 %v8452_v38, %s9538_s1  ;;  %6407 = vmatpush2.bf16.msra.mxu1 %v6800_v0  ;;  %v8575_v48 = vpop.permute.xlu0 %5385  ;;  %v7007_v60 = vld [vmem:[#allocation2 + $0x1a4] ss:$16 sps:$4 sm:$0xff]   ;;  %v7009_v19 = vld [vmem:[#allocation2 + $0x1a0] ss:$16 sps:$4 sm:$0xff]   ;;  %s9544_s1 = smov 94  }
 0x27e   : > { %9539 = vst [vmem:[#allocation11_spill] sm:$0xff] %v8575_v48  ;;  %5355 = vst [vmem:[#allocation2 + $0x3a0] sm:$0xcc] %v5350_v63  ;;  %v9403_v14 = vrot.slane %v8575_v48, 4  ;;  %6367 = vmatprep.subr.bf16.mxu0 %v7007_v60  ;;  %v7013_v60 = vld [vmem:[#allocation2 + $0x180] ss:$16 sps:$4 sm:$0xff]  }
 0x27f   : > { %v5123_v28 = vpop.permute.xlu1 %5122  ;;  %3859 = vrot.lane.b32.xlu0 %v3854_v39, %s9540_s10  ;;  %v7016_v47 = vld [vmem:[%s7307_s16 + $0xa] ss:$0 sps:$4 sm:$0x33]   ;;  %6368 = vmatpush2.bf16.msra.mxu0 %v7009_v19  ;;  %v5433_v39 = vrot.slane %v5428_v1, 4  ;;  %v7014_v48 = vld [vmem:[#allocation2 + $0x164] ss:$16 sps:$4 sm:$0xff]  }
 0x280   : > { %v5392_v0 = vsel %vm238_vm0, %v5389_v6, %v9403_v14  ;;  %6369 = vmatprep.subr.bf16.mxu0 %v7010_v2  ;;  %v3680_v19 = vrot.slane %v7016_v47, %v7302_v5  ;;  %v7017_v47 = vld [vmem:[#allocation2 + $0x160] ss:$16 sps:$4 sm:$0xff]   ;;  %s9546_s10 = smov 72  }
 0x281   : > { %v5393_v57 = vsel %vm3079_vm13, %v5384_v43, %v5392_v0  ;;  %3641 = vrot.lane.b32.xlu1 %v8452_v38, %s9541_s11  ;;  %v8587_v63 = vpop.permute.xlu0 %5429  ;;  %v7020_v43 = vld [vmem:[%s7307_s16 + $0xa] ss:$0 sps:$4 sm:$0x33]   ;;  %s9548_s11 = smov 92  }
 0x282   : > { %9542 = vst [vmem:[#allocation12_spill] sm:$0xff] %v8587_v63  ;;  %5398 = vst [vmem:[#allocation2 + $0x3b0] sm:$0x33] %v5393_v57  ;;  %v9407_v54 = vrot.slane %v8587_v63, 4  ;;  %v5128_v57 = vrot.slane %v5123_v28, 4 }
 0x283   : > { %v5167_v20 = vpop.permute.xlu1 %5166  ;;  %3598 = vrot.lane.b32.xlu0 %v3593_v37, %s9543_s12  ;;  %6370 = vmatpush2.bf16.msra.mxu0 %v7013_v60  ;;  %v7018_v63 = vld [vmem:[#allocation2 + $0x144] ss:$16 sps:$4 sm:$0xff]   ;;  %v7024_v60 = vld [vmem:[%s7307_s16 + $0xa] ss:$0 sps:$4 sm:$0x33]   ;;  %s9550_s12 = smov 93  }
 0x284   : > { %v5436_v6 = vsel %vm238_vm0, %v5433_v39, %v9407_v54  ;;  %6371 = vmatprep.subr.bf16.mxu0 %v7014_v48  ;;  %v3417_v39 = vrot.slane %v7020_v43, %v7302_v5  ;;  %v7021_v43 = vld [vmem:[#allocation2 + $0x140] ss:$16 sps:$4 sm:$0xff]  }
 0x285   : > { %v5438_v2 = vsel %vm9406_vm1, %v5428_v1, %v5436_v6  ;;  %3378 = vrot.lane.b32.xlu1 %v8452_v38, %s9544_s1  ;;  %v8599_v0 = vpop.permute.xlu0 %5124  ;;  %vm9547_vm1 = vcmask 998400   ;;  %s9552_s1 = smov 98  }
 0x286   : > { %9545 = vst [vmem:[#allocation13_spill] sm:$0xff] %v8599_v0  ;;  %5443 = vst [vmem:[#allocation2 + $0x3b0] sm:$0xcc] %v5438_v2  ;;  %v9410_v37 = vrot.slane %v8599_v0, 4  ;;  %v5172_v2 = vrot.slane %v5167_v20, 4 }
 0x287   : > { %v5210_v14 = vpop.permute.xlu1 %5209  ;;  %3685 = vrot.lane.b32.xlu0 %v3680_v19, %s9546_s10  ;;  %6372 = vmatpush2.bf16.msra.mxu0 %v7017_v47  ;;  %v7022_v0 = vld [vmem:[#allocation2 + $0x124] ss:$16 sps:$4 sm:$0xff]   ;;  %v7031_v47 = vld [vmem:[%s7307_s16 + $0xa] ss:$0 sps:$4 sm:$0x33]   ;;  %s9554_s10 = smov 91  }
 0x288   : > { %v5131_v1 = vsel %vm238_vm0, %v5128_v57, %v9410_v37  ;;  %6373 = vmatprep.subr.bf16.mxu0 %v7018_v63  ;;  %v3504_v57 = vrot.slane %v7024_v60, %v7302_v5  ;;  %v5215_v37 = vrot.slane %v5210_v14, 4 }
 0x289   : > { %v5132_v48 = vsel %vm9547_vm1, %v5123_v28, %v5131_v1  ;;  %3465 = vrot.lane.b32.xlu1 %v8452_v38, %s9548_s11  ;;  %v8611_v6 = vpop.permute.xlu0 %5168  ;;  %vm9551_vm1 = vcmask 990208  }
 0x28a   : > { %9549 = vst [vmem:[#allocation14_spill] sm:$0xff] %v8611_v6  ;;  %5137 = vst [vmem:[#allocation2 + $0x380] sm:$0x33] %v5132_v48  ;;  %v9415_v19 = vrot.slane %v8611_v6, 4 }
 0x28b   : > { %v5254_v54 = vpop.permute.xlu1 %5253  ;;  %3422 = vrot.lane.b32.xlu0 %v3417_v39, %s9550_s12  ;;  %6374 = vmatpush2.bf16.msra.mxu0 %v7021_v43  ;;  %v7036_v43 = vld [vmem:[%s7307_s16 + $0xa] ss:$0 sps:$4 sm:$0x33]  }
 0x28c   : > { %v5175_v28 = vsel %vm238_vm0, %v5172_v2, %v9415_v19  ;;  %6375 = vmatprep.subr.bf16.mxu0 %v7022_v0  ;;  %v7029_v2 = vld [vmem:[#allocation2 + $0x104] ss:$16 sps:$4 sm:$0xff]  }
 0x28d   : > { %v5176_v63 = vsel %vm9551_vm1, %v5167_v20, %v5175_v28  ;;  %3204 = vrot.lane.b32.xlu1 %v8452_v38, %s9552_s1  ;;  %v8623_v1 = vpop.permute.xlu0 %5211  ;;  %v7025_v48 = vld [vmem:[#allocation2 + $0x3a4] ss:$16 sps:$4 sm:$0xff]   ;;  %v7027_v39 = vld [vmem:[#allocation2 + $0x3a0] ss:$16 sps:$4 sm:$0xff]   ;;  %v3243_v20 = vrot.slane %v7031_v47, %v7302_v5  ;;  %vm9555_vm1 = vcmask 982016  }
 0x28e   : > { %9553 = vst [vmem:[#allocation15_spill] sm:$0xff] %v8623_v1  ;;  %5181 = vst [vmem:[#allocation2 + $0x380] sm:$0xcc] %v5176_v63  ;;  %v9417_v60 = vrot.slane %v8623_v1, 4  ;;  %6408 = vmatprep.subr.bf16.mxu1 %v7025_v48  ;;  %v7032_v48 = vld [vmem:[#allocation2 + $0x100] ss:$16 sps:$4 sm:$0xff]  }
 0x28f   : > { %v4947_v6 = vpop.permute.xlu1 %4946  ;;  %3509 = vrot.lane.b32.xlu0 %v3504_v57, %s9554_s10  ;;  %6409 = vmatpush2.bf16.msra.mxu1 %v7027_v39  ;;  %v5259_v57 = vrot.slane %v5254_v54, 4  ;;  %v3330_v39 = vrot.slane %v7036_v43, %v7302_v5  ;;  %v7070_v1 = vld [vmem:[#allocation2 + $0x8] ss:$16 sps:$4 sm:$0xff]  }
 0x290   : > { %v5218_v28 = vsel %vm238_vm0, %v5215_v37, %v9417_v60  ;;  %6376 = vmatpush2.bf16.msra.mxu0 %v7028_v12  ;;  %v7035_v37 = vld [vmem:[#allocation2 + $0xec] ss:$16 sps:$4 sm:$0xff]   ;;  %v8642_v12 = vcombine.low %v8248_v44, %v8248_v44  ;;  %v4952_v43 = vrot.slane %v4947_v6, 4 }
 0x291   : > { %v5219_v0 = vsel %vm9555_vm1, %v5210_v14, %v5218_v28  ;;  %3291 = vrot.lane.b32.xlu1 %v8452_v38, %s9471_s28  ;;  %v8635_v63 = vpop.permute.xlu0 %5255  ;;  %6377 = vmatprep.subr.bf16.mxu0 %v7029_v2  ;;  %v7042_v14 = vld [vmem:[%s7307_s16 + $0xa] ss:$0 sps:$4 sm:$0x33]   ;;  %vm9557_vm1 = vcmask 973824   ;;  %s9558_s28 = smov 117  }
 0x292   : > { %5224 = vst [vmem:[#allocation2 + $0x390] sm:$0x33] %v5219_v0  ;;  %v9418_v47 = vrot.slane %v8635_v63, 4  ;;  %9556 = vst [vmem:[#allocation16_spill] sm:$0xff] %v8642_v12  ;;  %v7033_v0 = vld [vmem:[#allocation2 + $0xe8] ss:$16 sps:$4 sm:$0xff]  }
 0x293   : > { %v4992_v19 = vpop.permute.xlu1 %4991  ;;  %3248 = vrot.lane.b32.xlu0 %v3243_v20, %s9470_s8  ;;  %s9570_s8 = smov 114  }
 0x294   : > { %v5262_v2 = vsel %vm238_vm0, %v5259_v57, %v9418_v47  ;;  %6378 = vmatpush2.bf16.msra.mxu0 %v7032_v48  ;;  %v7041_v57 = vld [vmem:[#allocation2 + $0xcc] ss:$16 sps:$4 sm:$0xff]   ;;  %v7046_v48 = vld [vmem:[%s7307_s16 + $0xa] ss:$0 sps:$4 sm:$0x33]  }
 0x295   : > { %v5263_v28 = vsel %vm9557_vm1, %v5254_v54, %v5262_v2  ;;  %3028 = vrot.lane.b32.xlu1 %v8452_v38, %s9558_s28  ;;  %v8651_v20 = vpop.permute.xlu0 %4948  ;;  %6429 = vmatprep.subr.bf16.mxu0 %v7035_v37  ;;  %v3068_v54 = vrot.slane %v7042_v14, %v7302_v5  ;;  %vm5001_vm1 = vcmask 97280   ;;  %v7039_v47 = vld [vmem:[#allocation2 + $0xc8] ss:$16 sps:$4 sm:$0xff]  }
 0x296   : > { %9559 = vst [vmem:[#allocation17_spill] sm:$0xff] %v8651_v20  ;;  %5268 = vst [vmem:[#allocation2 + $0x390] sm:$0xcc] %v5263_v28  ;;  %v9420_v44 = vrot.slane %v8651_v20, 4  ;;  %v4997_v28 = vrot.slane %v4992_v19, 4 }
 0x297   : > { %v5036_v60 = vpop.permute.xlu1 %5035  ;;  %3335 = vrot.lane.b32.xlu0 %v3330_v39, %s9472_s3  ;;  %6380 = vmatmul.mubr.bf16.vlgmr.msra.gmra.mxu0 %v8642_v12  ;;  %s9561_s3 = smov 116   ;;  %v7043_v20 = vld [vmem:[#allocation2 + $0xa8] ss:$16 sps:$4 sm:$0xff]  }
 0x298   : > { %v4955_v2 = vsel %vm238_vm0, %v4952_v43, %v9420_v44  ;;  %6430 = vmatpush1.bf16.msra.mxu0 %v7033_v0  ;;  %6461 = vmatprep.mubr.bf16.mxu0 %v8257_v59  ;;  %v7045_v43 = vld [vmem:[#allocation2 + $0xac] ss:$16 sps:$4 sm:$0xff]   ;;  %v3156_v59 = vrot.slane %v7046_v48, %v7302_v5  ;;  %v7053_v0 = vld [vmem:[%s7307_s16 + $0xa] ss:$0 sps:$4 sm:$0x33]   ;;  %v5041_v44 = vrot.slane %v5036_v60, 4 }
 0x299   : > { %v4957_v37 = vsel %vm9425_vm7, %v4947_v6, %v4955_v2  ;;  %3117 = vrot.lane.b32.xlu1 %v8452_v38, %s9474_s18  ;;  %v8665_v39 = vpop.permute.xlu0 %4993  ;;  %6431 = vmatprep.subr.bf16.mxu0 %v7041_v57  ;;  %vm9563_vm7 = vcmask 1014784   ;;  %s9572_s18 = smov 14  }
 0x29a   : > { %9560 = vst [vmem:[#allocation18_spill] sm:$0xff] %v8665_v39  ;;  %4962 = vst [vmem:[#allocation2 + $0x360] sm:$0x33] %v4957_v37  ;;  %v9426_v14 = vrot.slane %v8665_v39, 4 }
 0x29b   : > { %v5080_v12 = vpop.permute.xlu1 %5079  ;;  %3073 = vrot.lane.b32.xlu0 %v3068_v54, %s9561_s3 }
 0x29c   : > { %v5000_v6 = vsel %vm238_vm0, %v4997_v28, %v9426_v14  ;;  %6432 = vmatpush1.bf16.msra.mxu0 %v7039_v47  ;;  %v7052_v47 = vld [vmem:[#allocation2 + $0x8c] ss:$16 sps:$4 sm:$0xff]   ;;  %v7057_v28 = vld [vmem:[%s7307_s16 + $0xa] ss:$0 sps:$4 sm:$0x33]  }
 0x29d   : > { %v5002_v57 = vsel %vm5001_vm1, %v4992_v19, %v5000_v6  ;;  %2854 = vrot.lane.b32.xlu1 %v8452_v38, %s9476_s22  ;;  %v8677_v2 = vpop.permute.xlu0 %5037  ;;  %6433 = vmatprep.subr.bf16.mxu0 %v7045_v43  ;;  %v7047_v37 = vld [vmem:[#allocation2 + $0x384] ss:$16 sps:$4 sm:$0xff]   ;;  %v7049_v54 = vld [vmem:[#allocation2 + $0x380] ss:$16 sps:$4 sm:$0xff]   ;;  %v2893_v19 = vrot.slane %v7053_v0, %v7302_v5 }
 0x29e   : > { %9562 = vst [vmem:[#allocation19_spill] sm:$0xff] %v8677_v2  ;;  %5007 = vst [vmem:[#allocation2 + $0x360] sm:$0xcc] %v5002_v57  ;;  %v9429_v48 = vrot.slane %v8677_v2, 4  ;;  %6410 = vmatprep.subr.bf16.mxu1 %v7047_v37  ;;  %v7050_v37 = vld [vmem:[#allocation2 + $0x88] ss:$16 sps:$4 sm:$0xff]  }
 0x29f   : > { %v4773_v39 = vpop.permute.xlu1 %4772  ;;  %3161 = vrot.lane.b32.xlu0 %v3156_v59, %s9475_s27  ;;  %6411 = vmatpush2.bf16.msra.mxu1 %v7049_v54  ;;  %v5085_v59 = vrot.slane %v5080_v12, 4  ;;  %v7056_v2 = vld [vmem:[#allocation2 + $0x6c] ss:$16 sps:$4 sm:$0xff]  }
 0x2a0   : > { %v5044_v43 = vsel %vm238_vm0, %v5041_v44, %v9429_v48  ;;  %6434 = vmatpush1.bf16.msra.mxu0 %v7043_v20  ;;  %v2980_v44 = vrot.slane %v7057_v28, %v7302_v5  ;;  %v7061_v20 = vld [vmem:[%s7307_s16 + $0xa] ss:$0 sps:$4 sm:$0x33]  }
 0x2a1   : > { %v5045_v6 = vsel %vm9563_vm7, %v5036_v60, %v5044_v43  ;;  %2941 = vrot.lane.b32.xlu1 %v8452_v38, %s9478_s17  ;;  %v8689_v57 = vpop.permute.xlu0 %5081  ;;  %6435 = vmatprep.subr.bf16.mxu0 %v7052_v47  ;;  %vm9565_vm7 = vcmask 1006592   ;;  %v4778_v43 = vrot.slane %v4773_v39, 4  ;;  %v7054_v28 = vld [vmem:[#allocation2 + $0x68] ss:$16 sps:$4 sm:$0xff]  }
 0x2a2   : > { %9564 = vst [vmem:[#allocation20_spill] sm:$0xff] %v8689_v57  ;;  %5050 = vst [vmem:[#allocation2 + $0x370] sm:$0x33] %v5045_v6  ;;  %v9430_v0 = vrot.slane %v8689_v57, 4  ;;  %v7058_v48 = vld [vmem:[#allocation2 + $0x48] ss:$16 sps:$4 sm:$0xff]  }
 0x2a3   : > { %v4817_v14 = vpop.permute.xlu1 %4816  ;;  %2898 = vrot.lane.b32.xlu0 %v2893_v19, %s9477_s15  ;;  %v8718_v57 = vld.sshfl [vmem:[%s7307_s16 + $0xc] sm:$0x3 pattern:$0x76325410] }
 0x2a4   : > { %v5088_v60 = vsel %vm238_vm0, %v5085_v59, %v9430_v0  ;;  %6436 = vmatpush1.bf16.msra.mxu0 %v7050_v37  ;;  %v7060_v59 = vld [vmem:[#allocation2 + $0x4c] ss:$16 sps:$4 sm:$0xff]   ;;  %v2719_v37 = vrot.slane %v7061_v20, %v7302_v5  ;;  %v4822_v0 = vrot.slane %v4817_v14, 4 }
 0x2a5   : > { %v5089_v54 = vsel %vm9565_vm7, %v5080_v12, %v5088_v60  ;;  %2680 = vrot.lane.b32.xlu1 %v8452_v38, %s9480_s14  ;;  %v8701_v47 = vpop.permute.xlu0 %4774  ;;  %6437 = vmatprep.subr.bf16.mxu0 %v7056_v2  ;;  %v7065_v12 = vld [vmem:[%s7307_s16 + $0xa] ss:$0 sps:$4 sm:$0x33]   ;;  %vm9567_vm7 = vcmask 138240  }
 0x2a6   : > { %9566 = vst [vmem:[#allocation21_spill] sm:$0xff] %v8701_v47  ;;  %5094 = vst [vmem:[#allocation2 + $0x370] sm:$0xcc] %v5089_v54  ;;  %v9435_v19 = vrot.slane %v8701_v47, 4 }
 0x2a7   : > { %v4860_v6 = vpop.permute.xlu1 %4859  ;;  %2985 = vrot.lane.b32.xlu0 %v2980_v44, %s9479_s21  ;;  %v7068_v44 = vld [vmem:[%s7307_s16 + $0xa] ss:$0 sps:$4 sm:$0x33]  }
 0x2a8   : > { %v4781_v60 = vsel %vm238_vm0, %v4778_v43, %v9435_v19  ;;  %6438 = vmatpush1.bf16.msra.mxu0 %v7054_v28  ;;  %v7064_v43 = vld [vmem:[#allocation2 + $0x2c] ss:$16 sps:$4 sm:$0xff]  }
 0x2a9   : > { %v4782_v2 = vsel %vm9567_vm7, %v4773_v39, %v4781_v60  ;;  %2767 = vrot.lane.b32.xlu1 %v8452_v38, %s9482_s24  ;;  %v8713_v54 = vpop.permute.xlu0 %4818  ;;  %6439 = vmatprep.subr.bf16.mxu0 %v7060_v59  ;;  %v2806_v39 = vrot.slane %v7065_v12, %v7302_v5  ;;  %v7073_v28 = vld [vmem:[%s7307_s16 + $0xc] ss:$0 sps:$4 sm:$0x33]   ;;  %vm9569_vm7 = vcmask 130048   ;;  %v4865_v12 = vrot.slane %v4860_v6, 4 }
 0x2aa   : > { %9568 = vst [vmem:[#allocation22_spill] sm:$0xff] %v8713_v54  ;;  %4787 = vst [vmem:[#allocation2 + $0x340] sm:$0x33] %v4782_v2  ;;  %v9436_v20 = vrot.slane %v8713_v54, 4  ;;  %v5339_v54 = vrot.slane %v7073_v28, %v7302_v5 }
 0x2ab   : > { %v4904_v47 = vpop.permute.xlu1 %4903  ;;  %2724 = vrot.lane.b32.xlu0 %v2719_v37, %s9481_s20  ;;  %v2632_v37 = vrot.slane %v7068_v44, %v7302_v5 }
 0x2ac   : > { %v4825_v38 = vsel %vm238_vm0, %v4822_v0, %v9436_v20  ;;  %6440 = vmatpush1.bf16.msra.mxu0 %v7058_v48  ;;  %v7062_v48 = vld [vmem:[#allocation2 + $0x28] ss:$16 sps:$4 sm:$0xff]  }
 0x2ad   : > { %v4826_v59 = vsel %vm9569_vm7, %v4817_v14, %v4825_v38  ;;  %5475 = vrot.lane.b32.xlu1 %v8718_v57, %s9570_s8  ;;  %v8729_v60 = vpop.permute.xlu0 %4861  ;;  %6441 = vmatprep.subr.bf16.mxu0 %v7064_v43  ;;  %v7066_v2 = vld [vmem:[#allocation2 + $0x364] ss:$16 sps:$4 sm:$0xff]   ;;  %v7069_v19 = vld [vmem:[#allocation2 + $0x360] ss:$16 sps:$4 sm:$0xff]   ;;  %v7072_v14 = vld [vmem:[#allocation2 + $0xc] ss:$16 sps:$4 sm:$0xff]  }
 0x2ae   : > { %9571 = vst [vmem:[#allocation23_spill] sm:$0xff] %v8729_v60  ;;  %4831 = vst [vmem:[#allocation2 + $0x340] sm:$0xcc] %v4826_v59  ;;  %v9444_v0 = vrot.slane %v8729_v60, 4  ;;  %6412 = vmatprep.subr.bf16.mxu1 %v7066_v2  ;;  %v4909_v2 = vrot.slane %v4904_v47, 4  ;;  %vm9574_vm7 = vcmask 171008  }
 0x2af   : > { %v4599_v20 = vpop.permute.xlu1 %4598  ;;  %2811 = vrot.lane.b32.xlu0 %v2806_v39, %s9483_s26  ;;  %6413 = vmatpush2.bf16.msra.mxu1 %v7069_v19  ;;  %v6641_v43 = vld.sshfl [vmem:[%s7307_s16 + $0x8] sm:$0x3 pattern:$0x76325410] }
 0x2b0   : > { %v4868_v38 = vsel %vm238_vm0, %v4865_v12, %v9444_v0  ;;  %6442 = vmatpush1.bf16.msra.mxu0 %v7062_v48  ;;  %v7074_v39 = vld [vmem:[%s7307_s16 + $0xc] ss:$0 sps:$4 sm:$0x33]  }
 0x2b1   : > { %v4869_v44 = vsel %vm9452_vm4, %v4860_v6, %v4868_v38  ;;  %2637 = vrot.lane.b32.xlu1 %v2632_v37, %s9486_s6  ;;  %v8740_v59 = vpop.permute.xlu0 %4905  ;;  %6443 = vmatprep.subr.bf16.mxu0 %v7072_v14  ;;  %v5426_v37 = vrot.slane %v7074_v39, %v7302_v5  ;;  %v7075_v48 = vld [vmem:[%s7307_s16 + $0xc] ss:$0 sps:$4 sm:$0x33]   ;;  %v4604_v14 = vrot.slane %v4599_v20, 4  ;;  %s9575_s6 = smov 115   ;;  %vm4476_vm4 = vcmask 318464  }
 0x2b2   : > { %4874 = vst [vmem:[#allocation2 + $0x350] sm:$0x33] %v4869_v44  ;;  %v9445_v60 = vrot.slane %v8740_v59, 4  ;;  %v5165_v44 = vrot.slane %v7075_v48, %v7302_v5  ;;  %v7078_v39 = vld [vmem:[%s7307_s16 + $0xc] ss:$0 sps:$4 sm:$0x33]  }
 0x2b3   : > { %v4643_v12 = vpop.permute.xlu1 %4642  ;;  %2592 = vrot.lane.b32.xlu0 %v6641_v43, %s9572_s18 }
 0x2b4   : > { %v4912_v19 = vsel %vm238_vm0, %v4909_v2, %v9445_v60  ;;  %6444 = vmatpush1.bf16.msra.mxu0 %v7070_v1  ;;  %v4648_v2 = vrot.slane %v4643_v12, 4 }
 0x2b5   : > { %v4913_v6 = vsel %vm2598_vm14, %v4904_v47, %v4912_v19  ;;  %5344 = vrot.lane.b32.xlu1 %v5339_v54, %s9558_s28  ;;  %v8751_v28 = vpop.permute.xlu0 %4600 }
 0x2b6   : > { %9573 = vst [vmem:[#allocation24_spill] sm:$0xff] %v8751_v28  ;;  %4918 = vst [vmem:[#allocation2 + $0x350] sm:$0xcc] %v4913_v6  ;;  %v9443_v38 = vrot.slane %v8751_v28, 4 }
 0x2b7   : > { %v4686_v43 = vpop.permute.xlu1 %4685  ;;  %5300 = vrot.lane.b32.xlu0 %v8718_v57, %s9479_s21  ;;  %s9583_s21 = smov 13  }
 0x2b8   : > { %v4607_v1 = vsel %vm238_vm0, %v4604_v14, %v9443_v38  ;;  %v4691_v0 = vrot.slane %v4686_v43, 4 }
 0x2b9   : > { %v4608_v47 = vsel %vm9574_vm7, %v4599_v20, %v4607_v1  ;;  %5431 = vrot.lane.b32.xlu1 %v5426_v37, %s9575_s6  ;;  %v8763_v54 = vpop.permute.xlu0 %4644  ;;  %v7080_v20 = vld [vmem:[%s7307_s16 + $0xa] ss:$0 sps:$4 sm:$0x33]   ;;  %vm9576_vm7 = vcmask 162816  }
 0x2ba   : > { %4613 = vst [vmem:[#allocation2 + $0x320] sm:$0x33] %v4608_v47  ;;  %v9448_v19 = vrot.slane %v8763_v54, 4  ;;  %v5252_v47 = vrot.slane %v7078_v39, %v7302_v5 }
 0x2bb   : > { %v4730_v6 = vpop.permute.xlu1 %4729  ;;  %5387 = vrot.lane.b32.xlu0 %v8718_v57, %s9561_s3 }
 0x2bc   : > { %v4651_v14 = vsel %vm238_vm0, %v4648_v2, %v9448_v19  ;;  %v4990_v2 = vrot.slane %v7080_v20, %v7302_v5 }
 0x2bd   : > { %v4652_v37 = vsel %vm9576_vm7, %v4643_v12, %v4651_v14  ;;  %5170 = vrot.lane.b32.xlu1 %v5165_v44, %s9476_s22  ;;  %v8776_v1 = vpop.permute.xlu0 %4687  ;;  %v7076_v48 = vld [vmem:[#allocation2 + $0x344] ss:$16 sps:$4 sm:$0xff]   ;;  %v7079_v38 = vld [vmem:[#allocation2 + $0x340] ss:$16 sps:$4 sm:$0xff]   ;;  %vm9578_vm7 = vcmask 154624   ;;  %s6810_s22 = sshll.u32 %s9735_s9, 5 }
 0x2be   : > { %9577 = vst [vmem:[#allocation25_spill] sm:$0xff] %v8776_v1  ;;  %4657 = vst [vmem:[#allocation2 + $0x320] sm:$0xcc] %v4652_v37  ;;  %v9449_v60 = vrot.slane %v8776_v1, 4  ;;  %6414 = vmatprep.subr.bf16.mxu1 %v7076_v48  ;;  %v4735_v37 = vrot.slane %v4730_v6, 4 }
 0x2bf   : > { %v4423_v28 = vpop.permute.xlu1 %4422  ;;  %5126 = vrot.lane.b32.xlu0 %v8718_v57, %s9483_s26  ;;  %6415 = vmatpush2.bf16.msra.mxu1 %v7079_v38  ;;  %v7081_v14 = vld [vmem:[%s7307_s16 + $0xc] ss:$0 sps:$4 sm:$0x33]  }
 0x2c0   : > { %v4694_v12 = vsel %vm238_vm0, %v4691_v0, %v9449_v60  ;;  %v8798_v38 = vld.sshfl [vmem:[%s7307_s16 + $0xa] sm:$0x3 pattern:$0x76325410] }
 0x2c1   : > { %v4695_v44 = vsel %vm9578_vm7, %v4686_v43, %v4694_v12  ;;  %5257 = vrot.lane.b32.xlu1 %v5252_v47, %s9478_s17  ;;  %v8787_v39 = vpop.permute.xlu0 %4731  ;;  %vm9580_vm7 = vcmask 146432   ;;  %s9581_s17 = smov 12   ;;  %v5078_v47 = vrot.slane %v7081_v14, %v7302_v5  ;;  %v7082_v12 = vld [vmem:[%s7307_s16 + $0xa] ss:$0 sps:$4 sm:$0x33]  }
 0x2c2   : > { %9579 = vst [vmem:[#allocation26_spill] sm:$0xff] %v8787_v39  ;;  %4700 = vst [vmem:[#allocation2 + $0x330] sm:$0x33] %v4695_v44  ;;  %v9453_v19 = vrot.slane %v8787_v39, 4  ;;  %v4428_v44 = vrot.slane %v4423_v28, 4  ;;  %v4815_v14 = vrot.slane %v7082_v12, %v7302_v5 }
 0x2c3   : > { %v4467_v48 = vpop.permute.xlu1 %4466  ;;  %5213 = vrot.lane.b32.xlu0 %v8718_v57, %s9477_s15 }
 0x2c4   : > { %v4738_v0 = vsel %vm238_vm0, %v4735_v37, %v9453_v19 }
 0x2c5   : > { %v4739_v43 = vsel %vm9580_vm7, %v4730_v6, %v4738_v0  ;;  %4995 = vrot.lane.b32.xlu1 %v4990_v2, %s9581_s17  ;;  %v8802_v20 = vpop.permute.xlu0 %4424  ;;  %vm9584_vm7 = vcmask 326656   ;;  %v7085_v0 = vld [vmem:[%s7307_s16 + $0xa] ss:$0 sps:$4 sm:$0x33]  }
 0x2c6   : > { %9582 = vst [vmem:[#allocation27_spill] sm:$0xff] %v8802_v20  ;;  %4744 = vst [vmem:[#allocation2 + $0x330] sm:$0xcc] %v4739_v43  ;;  %v9456_v60 = vrot.slane %v8802_v20, 4  ;;  %v4472_v43 = vrot.slane %v4467_v48, 4 }
 0x2c7   : > { %v4511_v1 = vpop.permute.xlu1 %4510  ;;  %4950 = vrot.lane.b32.xlu0 %v8798_v38, %s9583_s21 }
 0x2c8   : > { %v4431_v6 = vsel %vm238_vm0, %v4428_v44, %v9456_v60  ;;  %v7087_v44 = vld [vmem:[%s7307_s16 + $0xa] ss:$0 sps:$4 sm:$0x33]   ;;  %v4516_v20 = vrot.slane %v4511_v1, 4 }
 0x2c9   : > { %v4432_v2 = vsel %vm9584_vm7, %v4423_v28, %v4431_v6  ;;  %5083 = vrot.lane.b32.xlu1 %v5078_v47, %s9482_s24  ;;  %v8814_v37 = vpop.permute.xlu0 %4468  ;;  %vm9464_vm7 = vcmask 310272  }
 0x2ca   : > { %9585 = vst [vmem:[#allocation28_spill] sm:$0xff] %v8814_v37  ;;  %4437 = vst [vmem:[#allocation2 + $0x300] sm:$0x33] %v4432_v2  ;;  %v9461_v19 = vrot.slane %v8814_v37, 4  ;;  %v4902_v2 = vrot.slane %v7085_v0, %v7302_v5 }
 0x2cb   : > { %v4556_v39 = vpop.permute.xlu1 %4555  ;;  %5039 = vrot.lane.b32.xlu0 %v8718_v57, %s9481_s20  ;;  %s9588_s20 = smov 15  }
 0x2cc   : > { %v4475_v28 = vsel %vm238_vm0, %v4472_v43, %v9461_v19  ;;  %v4561_v19 = vrot.slane %v4556_v39, 4 }
 0x2cd   : > { %v4477_v47 = vsel %vm4476_vm4, %v4467_v48, %v4475_v28  ;;  %4820 = vrot.lane.b32.xlu1 %v4815_v14, %s9496_s7  ;;  %v8827_v12 = vpop.permute.xlu0 %4512  ;;  %v7083_v6 = vld [vmem:[#allocation2 + $0x324] ss:$16 sps:$4 sm:$0xff]   ;;  %v7086_v60 = vld [vmem:[#allocation2 + $0x320] ss:$16 sps:$4 sm:$0xff]   ;;  %v4641_v28 = vrot.slane %v7087_v44, %v7302_v5 }
 0x2ce   : > { %9586 = vst [vmem:[#allocation29_spill] sm:$0xff] %v8827_v12  ;;  %4482 = vst [vmem:[#allocation2 + $0x300] sm:$0xcc] %v4477_v47  ;;  %v4517_v57 = vrot.slane %v8827_v12, 4  ;;  %6416 = vmatprep.subr.bf16.mxu1 %v7083_v6  ;;  %v9587_v6 = vrot.slane %v7997_v45, 4 }
 0x2cf   : > { %v4253_v37 = vpop.permute.xlu1 %4252  ;;  %4776 = vrot.lane.b32.xlu0 %v8798_v38, %s9494_s25  ;;  %6417 = vmatpush2.bf16.msra.mxu1 %v7086_v60  ;;  %v7088_v47 = vld [vmem:[%s7307_s16 + $0xa] ss:$0 sps:$4 sm:$0x33]  }
 0x2d0   : > { %v4519_v48 = vsel %vm238_vm0, %v4516_v20, %v4517_v57  ;;  %v4256_v14 = vrot.slane %v4253_v37, 4 }
 0x2d1   : > { %v4521_v0 = vsel %vm9464_vm7, %v4511_v1, %v4519_v48  ;;  %4907 = vrot.lane.b32.xlu1 %v4902_v2, %s9572_s18  ;;  %v8838_v43 = vpop.permute.xlu0 %4557  ;;  %vm9589_vm7 = vcmask 179200  }
 0x2d2   : > { %4526 = vst [vmem:[#allocation2 + $0x310] sm:$0x33] %v4521_v0  ;;  %v4259_v12 = vsel %vm238_vm0, %v9587_v6, %v4256_v14  ;;  %v4562_v20 = vrot.slane %v8838_v43, 4  ;;  %v4728_v14 = vrot.slane %v7088_v47, %v7302_v5  ;;  %v7089_v0 = vld [vmem:[%s7307_s16 + $0xa] ss:$0 sps:$4 sm:$0x33]  }
 0x2d3   : > { %v4260_v60 = vsel %vm1931_vm6, %v7997_v45, %v4259_v12  ;;  %v4340_v1 = vpop.permute.xlu1 %4339  ;;  %4863 = vrot.lane.b32.xlu0 %v8798_v38, %s9588_s20  ;;  %v9590_v45 = vrot.slane %v8020_v16, 4  ;;  %vm9599_vm6 = vcmask 547840  }
 0x2d4   : > { %4264 = vst [vmem:[#allocation2 + $0x2e8] sm:$0x33] %v4260_v60  ;;  %v4564_v37 = vsel %vm238_vm0, %v4561_v19, %v4562_v20  ;;  %v4343_v44 = vrot.slane %v4340_v1, 4 }
 0x2d5   : > { %v4565_v2 = vsel %vm9589_vm7, %v4556_v39, %v4564_v37  ;;  %4646 = vrot.lane.b32.xlu1 %v4641_v28, %s9501_s5  ;;  %v4297_v48 = vpop.permute.xlu0 %4296  ;;  %v9591_v39 = vrot.slane %v8009_v9, 4  ;;  %vm9618_vm7 = vcmask 605184  }
 0x2d6   : > { %4570 = vst [vmem:[#allocation2 + $0x310] sm:$0xcc] %v4565_v2  ;;  %v4346_v12 = vsel %vm238_vm0, %v9590_v45, %v4343_v44  ;;  %v4300_v6 = vrot.slane %v4297_v48, 4  ;;  %v4465_v44 = vrot.slane %v7089_v0, %v7302_v5  ;;  %v7092_v2 = vld [vmem:[%s7307_s16 + $0xa] ss:$0 sps:$4 sm:$0x33]  }
 0x2d7   : > { %v4347_v60 = vsel %vm2020_vm10, %v8020_v16, %v4346_v12  ;;  %v4079_v19 = vpop.permute.xlu1 %4078  ;;  %4602 = vrot.lane.b32.xlu0 %v8798_v38, %s9500_s13  ;;  %v9592_v16 = vrot.slane %v8048_v18, 4  ;;  %s9594_s16 = smov 39   ;;  %vm9601_vm10 = vcmask 367616  }
 0x2d8   : > { %4351 = vst [vmem:[#allocation2 + $0x2f8] sm:$0x33] %v4347_v60  ;;  %v4303_v28 = vsel %vm238_vm0, %v9591_v39, %v4300_v6  ;;  %v4082_v47 = vrot.slane %v4079_v19, 4 }
 0x2d9   : > { %v4304_v1 = vsel %vm1975_vm2, %v8009_v9, %v4303_v28  ;;  %4733 = vrot.lane.b32.xlu1 %v4728_v14, %s9504_s19  ;;  %v4384_v37 = vpop.permute.xlu0 %4383  ;;  %v9593_v9 = vrot.slane %v8034_v21, 4  ;;  %v4554_v28 = vrot.slane %v7092_v2, %v7302_v5  ;;  %v9596_v5 = vrot.slane %v8062_v17, 4 }
 0x2da   : > { %4308 = vst [vmem:[#allocation2 + $0x2e8] sm:$0xcc] %v4304_v1  ;;  %v4085_v48 = vsel %vm238_vm0, %v9592_v16, %v4082_v47  ;;  %v4387_v45 = vrot.slane %v4384_v37, 4  ;;  %v9595_v47 = vrot.slane %v8073_v26, 4  ;;  %vm9597_vm2 = vcmask 384000  }
 0x2db   : > { %v4086_v12 = vsel %vm1753_vm11, %v8048_v18, %v4085_v48  ;;  %v4166_v6 = vpop.permute.xlu1 %4165  ;;  %4689 = vrot.lane.b32.xlu0 %v8798_v38, %s9502_s4  ;;  %vm9614_vm11 = vcmask 556032  }
 0x2dc   : > { %4090 = vst [vmem:[#allocation2 + $0x2c8] sm:$0x33] %v4086_v12  ;;  %v4390_v14 = vsel %vm238_vm0, %v9593_v9, %v4387_v45  ;;  %v4169_v0 = vrot.slane %v4166_v6, 4  ;;  %v9598_v12 = vrot.slane %v8097_v53, 4 }
 0x2dd   : > { %v4391_v60 = vsel %vm2064_vm3, %v8034_v21, %v4390_v14  ;;  %4470 = vrot.lane.b32.xlu1 %v4465_v44, %s9594_s16  ;;  %v4123_v19 = vpop.permute.xlu0 %4122  ;;  %v7090_v39 = vld [vmem:[#allocation2 + $0x304] ss:$16 sps:$4 sm:$0xff]   ;;  %v7093_v18 = vld [vmem:[#allocation2 + $0x300] ss:$16 sps:$4 sm:$0xff]   ;;  %v8895_v21 = vcombine.low %v8491_v40, %v8491_v40  ;;  %vm9612_vm3 = vcmask 736256  }
 0x2de   : > { %4395 = vst [vmem:[#allocation2 + $0x2f8] sm:$0xcc] %v4391_v60  ;;  %v4172_v1 = vsel %vm238_vm0, %v9595_v47, %v4169_v0  ;;  %v4126_v37 = vrot.slane %v4123_v19, 4  ;;  %6418 = vmatprep.subr.bf16.mxu1 %v7090_v39 }
 0x2df   : > { %v4173_v16 = vsel %vm1842_vm15, %v8073_v26, %v4172_v1  ;;  %v3903_v48 = vpop.permute.xlu1 %3902  ;;  %4426 = vrot.lane.b32.xlu0 %v8798_v38, %s9506_s30  ;;  %6419 = vmatpush2.bf16.msra.mxu1 %v7093_v18  ;;  %v9602_v18 = vrot.slane %v8133_v32, 4  ;;  %vm9606_vm15 = vcmask 523264  }
 0x2e0   : > { %4177 = vst [vmem:[#allocation2 + $0x2d8] sm:$0x33] %v4173_v16  ;;  %v4129_v44 = vsel %vm238_vm0, %v9596_v5, %v4126_v37  ;;  %v3906_v2 = vrot.slane %v3903_v48, 4 }
 0x2e1   : > { %v4130_v45 = vsel %vm9597_vm2, %v8062_v17, %v4129_v44  ;;  %4559 = vrot.lane.b32.xlu1 %v4554_v28, %s9510_s23  ;;  %v4210_v26 = vpop.permute.xlu0 %4209  ;;  %v9600_v17 = vrot.slane %v8084_v35, 4  ;;  %v9604_v44 = vrot.slane %v8179_v62, 4  ;;  %vm9620_vm2 = vcmask 769024  }
 0x2e2   : > { %4134 = vst [vmem:[#allocation2 + $0x2c8] sm:$0xcc] %v4130_v45  ;;  %v3909_v6 = vsel %vm238_vm0, %v9598_v12, %v3906_v2  ;;  %v4213_v40 = vrot.slane %v4210_v26, 4  ;;  %6421 = vmatmul.mubr.bf16.vlgmr.msra.gmra.mxu1 %v8895_v21  ;;  %v9605_v12 = vrot.slane %v8161_v55, 4 }
 0x2e3   : > { %v3910_v9 = vsel %vm9599_vm6, %v8097_v53, %v3909_v6  ;;  %v3990_v14 = vpop.permute.xlu1 %3989  ;;  %4514 = vrot.lane.b32.xlu0 %v8798_v38, %s9511_s29  ;;  %6502 = vmatprep.mubr.bf16.mxu1 %v8500_v22  ;;  %v9603_v22 = vrot.slane %v8112_v11, 4  ;;  %vm9622_vm6 = vcmask 588800   ;;  %s179_s29 = scalar_lea.vmem %s9224_s2, %s6810_s22 }
 0x2e4   : > { %3914 = vst [vmem:[#allocation2 + $0x2a8] sm:$0x33] %v3910_v9  ;;  %v4216_v0 = vsel %vm238_vm0, %v9600_v17, %v4213_v40  ;;  %v3993_v60 = vrot.slane %v3990_v14, 4 }
 0x2e5   : > { %v4217_v19 = vsel %vm9601_vm10, %v8084_v35, %v4216_v0  ;;  %v3947_v39 = vpop.permute.xlu0 %3946  ;;  %v7096_v28 = vld [vmem:[#allocation2 + $0x2e8] ss:$16 sps:$4 sm:$0xff]   ;;  %v7098_v53 = vld [vmem:[#allocation2 + $0x2ec] ss:$16 sps:$4 sm:$0xff]   ;;  %v9607_v0 = vrot.slane %v8204_v30, 4  ;;  %vm9624_vm10 = vcmask 752640  }
 0x2e6   : > { %4221 = vst [vmem:[#allocation2 + $0x2d8] sm:$0xcc] %v4217_v19  ;;  %v3997_v38 = vsel %vm238_vm0, %v9602_v18, %v3993_v60  ;;  %v3950_v47 = vrot.slane %v3947_v39, 4  ;;  %6470 = vmatprep.subr.bf16.mxu1 %v7098_v53 }
 0x2e7   : > { %v3998_v1 = vsel %vm3995_vm5, %v8133_v32, %v3997_v38  ;;  %v3729_v37 = vpop.permute.xlu1 %3728  ;;  %6471 = vmatpush1.bf16.msra.mxu1 %v7096_v28  ;;  %v9609_v28 = vrot.slane %v8193_v24, 4  ;;  %vm9616_vm5 = vcmask 596992  }
 0x2e8   : > { %4002 = vst [vmem:[#allocation2 + $0x2b8] sm:$0x33] %v3998_v1  ;;  %v3953_v16 = vsel %vm238_vm0, %v9603_v22, %v3950_v47  ;;  %v3732_v35 = vrot.slane %v3729_v37, 4  ;;  %v9611_v47 = vrot.slane %v8226_v3, 4 }
 0x2e9   : > { %v3954_v48 = vsel %vm1619_vm12, %v8112_v11, %v3953_v16  ;;  %v4035_v5 = vpop.permute.xlu0 %4034  ;;  %vm9610_vm12 = vcmask 572416   ;;  %v9613_v16 = vrot.slane %v8215_v52, 4 }
 0x2ea   : > { %3958 = vst [vmem:[#allocation2 + $0x2a8] sm:$0xcc] %v3954_v48  ;;  %v3735_v2 = vsel %vm238_vm0, %v9604_v44, %v3732_v35  ;;  %v4038_v45 = vrot.slane %v4035_v5, 4 }
 0x2eb   : > { %v3736_v32 = vsel %vm1397_vm9, %v8179_v62, %v3735_v2  ;;  %v3816_v26 = vpop.permute.xlu1 %3815  ;;  %vm9608_vm9 = vcmask 564224  }
 0x2ec   : > { %3740 = vst [vmem:[#allocation2 + $0x288] sm:$0x33] %v3736_v32  ;;  %v4042_v6 = vsel %vm238_vm0, %v9605_v12, %v4038_v45  ;;  %v3819_v40 = vrot.slane %v3816_v26, 4  ;;  %v9615_v45 = vrot.slane %v8253_v51, 4 }
 0x2ed   : > { %v4043_v11 = vsel %vm9606_vm15, %v8161_v55, %v4042_v6  ;;  %v3773_v9 = vpop.permute.xlu0 %3772  ;;  %v7099_v14 = vld [vmem:[#allocation2 + $0x2c8] ss:$16 sps:$4 sm:$0xff]   ;;  %v7101_v17 = vld [vmem:[#allocation2 + $0x2cc] ss:$16 sps:$4 sm:$0xff]   ;;  %v9617_v6 = vrot.slane %v8237_v36, 4  ;;  %vm9626_vm15 = vcmask 760832  }
 0x2ee   : > { %4047 = vst [vmem:[#allocation2 + $0x2b8] sm:$0xcc] %v4043_v11  ;;  %v3822_v60 = vsel %vm238_vm0, %v9607_v0, %v3819_v40  ;;  %v3776_v19 = vrot.slane %v3773_v9, 4  ;;  %6472 = vmatprep.subr.bf16.mxu1 %v7101_v17 }
 0x2ef   : > { %v3823_v62 = vsel %vm9608_vm9, %v8204_v30, %v3822_v60  ;;  %v3554_v39 = vpop.permute.xlu1 %3553  ;;  %6473 = vmatpush1.bf16.msra.mxu1 %v7099_v14  ;;  %v9619_v14 = vrot.slane %v8280_v23, 4  ;;  %vm9628_vm9 = vcmask 801792  }
 0x2f0   : > { %3827 = vst [vmem:[#allocation2 + $0x298] sm:$0x33] %v3823_v62  ;;  %v3779_v53 = vsel %vm238_vm0, %v9609_v28, %v3776_v19  ;;  %v3557_v55 = vrot.slane %v3554_v39, 4  ;;  %v9621_v19 = vrot.slane %v8269_v34, 4 }
 0x2f1   : > { %v3780_v18 = vsel %vm9610_vm12, %v8193_v24, %v3779_v53  ;;  %v3860_v38 = vpop.permute.xlu0 %3859  ;;  %vm9630_vm12 = vcmask 744448  }
 0x2f2   : > { %3784 = vst [vmem:[#allocation2 + $0x288] sm:$0xcc] %v3780_v18  ;;  %v3561_v1 = vsel %vm238_vm0, %v9611_v47, %v3557_v55  ;;  %v3863_v37 = vrot.slane %v3860_v38, 4  ;;  %v9623_v18 = vrot.slane %v8302_v50, 4 }
 0x2f3   : > { %v3562_v30 = vsel %vm9612_vm3, %v8226_v3, %v3561_v1  ;;  %v3642_v22 = vpop.permute.xlu1 %3641  ;;  %vm9632_vm3 = vcmask 785408  }
 0x2f4   : > { %3566 = vst [vmem:[#allocation2 + $0x268] sm:$0x33] %v3562_v30  ;;  %v3866_v35 = vsel %vm238_vm0, %v9613_v16, %v3863_v37  ;;  %v3645_v48 = vrot.slane %v3642_v22, 4  ;;  %v9625_v37 = vrot.slane %v8291_v56, 4 }
 0x2f5   : > { %v3867_v24 = vsel %vm9614_vm11, %v8215_v52, %v3866_v35  ;;  %v3599_v5 = vpop.permute.xlu0 %3598  ;;  %v7102_v44 = vld [vmem:[#allocation2 + $0x2a8] ss:$16 sps:$4 sm:$0xff]   ;;  %v7104_v2 = vld [vmem:[#allocation2 + $0x2ac] ss:$16 sps:$4 sm:$0xff]   ;;  %v9627_v35 = vrot.slane %v8324_v7, 4  ;;  %vm9634_vm11 = vcmask 793600  }
 0x2f6   : > { %3871 = vst [vmem:[#allocation2 + $0x298] sm:$0xcc] %v3867_v24  ;;  %v3648_v32 = vsel %vm238_vm0, %v9615_v45, %v3645_v48  ;;  %v3602_v26 = vrot.slane %v3599_v5, 4  ;;  %6474 = vmatprep.subr.bf16.mxu1 %v7104_v2 }
 0x2f7   : > { %v3649_v3 = vsel %vm9616_vm5, %v8253_v51, %v3648_v32  ;;  %v3379_v12 = vpop.permute.xlu1 %3378  ;;  %6475 = vmatpush1.bf16.msra.mxu1 %v7102_v44  ;;  %v9629_v44 = vrot.slane %v8313_v15, 4  ;;  %vm9637_vm5 = vcmask 777216  }
 0x2f8   : > { %3653 = vst [vmem:[#allocation2 + $0x278] sm:$0x33] %v3649_v3  ;;  %v3605_v40 = vsel %vm238_vm0, %v9617_v6, %v3602_v26  ;;  %v3382_v52 = vrot.slane %v3379_v12, 4  ;;  %v9631_v12 = vrot.slane %v8346_v27, 4 }
 0x2f9   : > { %v3606_v11 = vsel %vm9618_vm7, %v8237_v36, %v3605_v40  ;;  %v3686_v9 = vpop.permute.xlu0 %3685  ;;  %vm9639_vm7 = vcmask 818176  }
 0x2fa   : > { %3610 = vst [vmem:[#allocation2 + $0x268] sm:$0xcc] %v3606_v11  ;;  %v3385_v17 = vsel %vm238_vm0, %v9619_v14, %v3382_v52  ;;  %v3689_v0 = vrot.slane %v3686_v9, 4  ;;  %v9633_v11 = vrot.slane %v8335_v25, 4 }
 0x2fb   : > { %v3386_v51 = vsel %vm9620_vm2, %v8280_v23, %v3385_v17  ;;  %v3466_v60 = vpop.permute.xlu1 %3465  ;;  %vm9642_vm2 = vcmask 990208  }
 0x2fc   : > { %3390 = vst [vmem:[#allocation2 + $0x248] sm:$0x33] %v3386_v51  ;;  %v3692_v62 = vsel %vm238_vm0, %v9621_v19, %v3689_v0  ;;  %v3469_v39 = vrot.slane %v3466_v60, 4  ;;  %v9635_v0 = vrot.slane %v8368_v41, 4 }
 0x2fd   : > { %v3693_v36 = vsel %vm9622_vm6, %v8269_v34, %v3692_v62  ;;  %v3423_v28 = vpop.permute.xlu0 %3422  ;;  %v7105_v53 = vld [vmem:[#allocation2 + $0x288] ss:$16 sps:$4 sm:$0xff]   ;;  %v7107_v55 = vld [vmem:[#allocation2 + $0x28c] ss:$16 sps:$4 sm:$0xff]   ;;  %v9636_v62 = vrot.slane %v8357_v10, 4  ;;  %vm9644_vm6 = vcmask 809984  }
 0x2fe   : > { %3697 = vst [vmem:[#allocation2 + $0x278] sm:$0xcc] %v3693_v36  ;;  %v3472_v38 = vsel %vm238_vm0, %v9623_v18, %v3469_v39  ;;  %v3426_v47 = vrot.slane %v3423_v28, 4  ;;  %6476 = vmatprep.subr.bf16.mxu1 %v7107_v55  ;;  %v9638_v18 = vrot.slane %v8390_v29, 4 }
 0x2ff   : > { %v3473_v23 = vsel %vm9624_vm10, %v8302_v50, %v3472_v38  ;;  %v3205_v1 = vpop.permute.xlu1 %3204  ;;  %6477 = vmatpush1.bf16.msra.mxu1 %v7105_v53  ;;  %vm9646_vm10 = vcmask 973824  }
 0x300   : > { %3477 = vst [vmem:[#allocation2 + $0x258] sm:$0x33] %v3473_v23  ;;  %v3429_v30 = vsel %vm238_vm0, %v9625_v37, %v3426_v47  ;;  %v3208_v34 = vrot.slane %v3205_v1, 4  ;;  %v9640_v1 = vrot.slane %v8379_v46, 4 }
 0x301   : > { %v3430_v22 = vsel %vm9626_vm15, %v8291_v56, %v3429_v30  ;;  %v3510_v16 = vpop.permute.xlu0 %3509  ;;  %vm9648_vm15 = vcmask 982016  }
 0x302   : > { %3434 = vst [vmem:[#allocation2 + $0x248] sm:$0xcc] %v3430_v22  ;;  %v3211_v48 = vsel %vm238_vm0, %v9627_v35, %v3208_v34  ;;  %v3513_v24 = vrot.slane %v3510_v16, 4  ;;  %v9641_v22 = vrot.slane %v8412_v13, 4 }
 0x303   : > { %v3212_v50 = vsel %vm9628_vm9, %v8324_v7, %v3211_v48  ;;  %v3292_v5 = vpop.permute.xlu1 %3291  ;;  %vm9650_vm9 = vcmask 1022976  }
 0x304   : > { %3216 = vst [vmem:[#allocation2 + $0x228] sm:$0x33] %v3212_v50  ;;  %v3517_v2 = vsel %vm238_vm0, %v9629_v44, %v3513_v24  ;;  %v3295_v45 = vrot.slane %v3292_v5, 4  ;;  %v9643_v24 = vrot.slane %v8401_v31, 4 }
 0x305   : > { %v3518_v56 = vsel %vm9630_vm12, %v8313_v15, %v3517_v2  ;;  %v3249_v32 = vpop.permute.xlu0 %3248  ;;  %v7108_v26 = vld [vmem:[#allocation2 + $0x268] ss:$16 sps:$4 sm:$0xff]   ;;  %v7110_v3 = vld [vmem:[#allocation2 + $0x26c] ss:$16 sps:$4 sm:$0xff]   ;;  %vm9652_vm12 = vcmask 965632  }
 0x306   : > { %3522 = vst [vmem:[#allocation2 + $0x258] sm:$0xcc] %v3518_v56  ;;  %v3298_v6 = vsel %vm238_vm0, %v9631_v12, %v3295_v45  ;;  %v3252_v40 = vrot.slane %v3249_v32, 4  ;;  %6478 = vmatprep.subr.bf16.mxu1 %v7110_v3  ;;  %v9645_v56 = vrot.slane %v8434_v42, 4  ;;  %v9647_v12 = vrot.slane %v8423_v33, 4 }
 0x307   : > { %v3299_v7 = vsel %vm9632_vm3, %v8346_v27, %v3298_v6  ;;  %v3029_v52 = vpop.permute.xlu1 %3028  ;;  %6479 = vmatpush1.bf16.msra.mxu1 %v7108_v26  ;;  %vm9654_vm3 = vcmask 1006592  }
 0x308   : > { %3303 = vst [vmem:[#allocation2 + $0x238] sm:$0x33] %v3299_v7  ;;  %v3255_v9 = vsel %vm238_vm0, %v9633_v11, %v3252_v40  ;;  %v3032_v15 = vrot.slane %v3029_v52, 4  ;;  %v9649_v52 = vrot.slane %v8466_v8, 4 }
 0x309   : > { %v3256_v14 = vsel %vm9634_vm11, %v8335_v25, %v3255_v9  ;;  %v3336_v17 = vpop.permute.xlu0 %3335  ;;  %vm9656_vm11 = vcmask 1014784  }
 0x30a   : > { %3260 = vst [vmem:[#allocation2 + $0x228] sm:$0xcc] %v3256_v14  ;;  %v3036_v51 = vsel %vm238_vm0, %v9635_v0, %v3032_v15  ;;  %v3339_v60 = vrot.slane %v3336_v17, 4  ;;  %v9651_v14 = vrot.slane %v8445_v61, 4 }
 0x30b   : > { %v3037_v27 = vsel %vm3034_vm8, %v8368_v41, %v3036_v51  ;;  %v3118_v19 = vpop.permute.xlu1 %3117  ;;  %v7125_v51 = vld [vmem:[#allocation2 + $0x3ec] ss:$16 sps:$4 sm:$0xff]  }
 0x30c   : > { %3041 = vst [vmem:[#allocation2 + $0x208] sm:$0x33] %v3037_v27  ;;  %v3342_v39 = vsel %vm238_vm0, %v9636_v62, %v3339_v60  ;;  %v3121_v36 = vrot.slane %v3118_v19, 4  ;;  %v9653_v62 = vrot.slane %v8496_v49, 4 }
 0x30d   : > { %v3343_v25 = vsel %vm9637_vm5, %v8357_v10, %v3342_v39  ;;  %v3074_v28 = vpop.permute.xlu0 %3073  ;;  %v7111_v53 = vld [vmem:[#allocation2 + $0x248] ss:$16 sps:$4 sm:$0xff]   ;;  %v7113_v55 = vld [vmem:[#allocation2 + $0x24c] ss:$16 sps:$4 sm:$0xff]   ;;  %vm9658_vm5 = vcmask 932864  }
 0x30e   : > { %3347 = vst [vmem:[#allocation2 + $0x238] sm:$0xcc] %v3343_v25  ;;  %v3124_v38 = vsel %vm238_vm0, %v9638_v18, %v3121_v36  ;;  %v3077_v47 = vrot.slane %v3074_v28, 4  ;;  %6480 = vmatprep.subr.bf16.mxu1 %v7113_v55  ;;  %v9655_v28 = vrot.slane %v8479_v4, 4  ;;  %v7123_v55 = vld [vmem:[#allocation2 + $0x3e8] ss:$16 sps:$4 sm:$0xff]  }
 0x30f   : > { %v3125_v41 = vsel %vm9639_vm7, %v8390_v29, %v3124_v38  ;;  %v2855_v23 = vpop.permute.xlu1 %2854  ;;  %6481 = vmatpush1.bf16.msra.mxu1 %v7111_v53  ;;  %vm9661_vm7 = vcmask 998400  }
 0x310   : > { %3129 = vst [vmem:[#allocation2 + $0x218] sm:$0x33] %v3125_v41  ;;  %v3081_v37 = vsel %vm238_vm0, %v9640_v1, %v3077_v47  ;;  %v2858_v10 = vrot.slane %v2855_v23, 4  ;;  %v9657_v47 = vrot.slane %v8525_v58, 4 }
 0x311   : > { %v3082_v30 = vsel %vm3079_vm13, %v8379_v46, %v3081_v37  ;;  %v3162_v34 = vpop.permute.xlu0 %3161  ;;  %v9659_v37 = vld [vmem:[#allocation7_spill] sm:$0xff] }
 0x312   : > { %3086 = vst [vmem:[#allocation2 + $0x208] sm:$0xcc] %v3082_v30  ;;  %v2861_v16 = vsel %vm238_vm0, %v9641_v22, %v2858_v10  ;;  %v3165_v35 = vrot.slane %v3162_v34, 4  ;;  %v9660_v10 = vrot.slane %v9659_v37, 4 }
 0x313   : > { %v2862_v29 = vsel %vm9642_vm2, %v8412_v13, %v2861_v16  ;;  %v2942_v48 = vpop.permute.xlu1 %2941  ;;  %vm9664_vm2 = vcmask 1031168  }
 0x314   : > { %2866 = vst [vmem:[#allocation2 + $0x1e8] sm:$0x33] %v2862_v29  ;;  %v3168_v50 = vsel %vm238_vm0, %v9643_v24, %v3165_v35  ;;  %v2945_v5 = vrot.slane %v2942_v48, 4  ;;  %v9662_v29 = vld [vmem:[#allocation8_spill] sm:$0xff] }
 0x315   : > { %v3169_v46 = vsel %vm9644_vm6, %v8401_v31, %v3168_v50  ;;  %v2899_v44 = vpop.permute.xlu0 %2898  ;;  %v7114_v2 = vld [vmem:[#allocation2 + $0x228] ss:$16 sps:$4 sm:$0xff]   ;;  %v7116_v45 = vld [vmem:[#allocation2 + $0x22c] ss:$16 sps:$4 sm:$0xff]   ;;  %v9663_v48 = vrot.slane %v9662_v29, 4  ;;  %vm9671_vm6 = vmmov %vm9652_vm12 }
 0x316   : > { %3173 = vst [vmem:[#allocation2 + $0x218] sm:$0xcc] %v3169_v46  ;;  %v2948_v32 = vsel %vm238_vm0, %v9645_v56, %v2945_v5  ;;  %v2902_v26 = vrot.slane %v2899_v44, 4  ;;  %6482 = vmatprep.subr.bf16.mxu1 %v7116_v45  ;;  %v9665_v46 = vld [vmem:[#allocation6_spill] sm:$0xff] }
 0x317   : > { %v2949_v13 = vsel %vm9646_vm10, %v8434_v42, %v2948_v32  ;;  %v2681_v3 = vpop.permute.xlu1 %2680  ;;  %6483 = vmatpush1.bf16.msra.mxu1 %v7114_v2  ;;  %v9666_v44 = vrot.slane %v9665_v46, 4  ;;  %vm9679_vm10 = vcmask 990208  }
 0x318   : > { %2953 = vst [vmem:[#allocation2 + $0x1f8] sm:$0x33] %v2949_v13  ;;  %v2905_v6 = vsel %vm238_vm0, %v9647_v12, %v2902_v26  ;;  %v2684_v31 = vrot.slane %v2681_v3, 4  ;;  %v9667_v26 = vld [vmem:[#allocation10_spill] sm:$0xff] }
 0x319   : > { %v2906_v40 = vsel %vm9648_vm15, %v8423_v33, %v2905_v6  ;;  %v2986_v7 = vpop.permute.xlu0 %2985  ;;  %v9668_v13 = vrot.slane %v9667_v26, 4  ;;  %vm9684_vm15 = vcmask 973824  }
 0x31a   : > { %2910 = vst [vmem:[#allocation2 + $0x1e8] sm:$0xcc] %v2906_v40  ;;  %v2687_v11 = vsel %vm238_vm0, %v9649_v52, %v2684_v31  ;;  %v2989_v9 = vrot.slane %v2986_v7, 4  ;;  %v9669_v52 = vld [vmem:[#allocation9_spill] sm:$0xff] }
 0x31b   : > { %v2688_v42 = vsel %vm9650_vm9, %v8466_v8, %v2687_v11  ;;  %v2768_v15 = vpop.permute.xlu1 %2767  ;;  %v9670_v11 = vrot.slane %v9669_v52, 4  ;;  %vm9687_vm9 = vcmask 982016  }
 0x31c   : > { %2692 = vst [vmem:[#allocation2 + $0x1c8] sm:$0x33] %v2688_v42  ;;  %v2992_v17 = vsel %vm238_vm0, %v9651_v14, %v2989_v9  ;;  %v2771_v0 = vrot.slane %v2768_v15, 4 }
 0x31d   : > { %v2993_v33 = vsel %vm9652_vm12, %v8445_v61, %v2992_v17  ;;  %v2725_v60 = vpop.permute.xlu0 %2724  ;;  %v7117_v27 = vld [vmem:[#allocation2 + $0x208] ss:$16 sps:$4 sm:$0xff]   ;;  %v7119_v19 = vld [vmem:[#allocation2 + $0x20c] ss:$16 sps:$4 sm:$0xff]   ;;  %vm9692_vm12 = vcmask 105472  }
 0x31e   : > { %2997 = vst [vmem:[#allocation2 + $0x1f8] sm:$0xcc] %v2993_v33  ;;  %v2774_v39 = vsel %vm238_vm0, %v9653_v62, %v2771_v0  ;;  %v2728_v8 = vrot.slane %v2725_v60, 4  ;;  %6484 = vmatprep.subr.bf16.mxu1 %v7119_v19 }
 0x31f   : > { %v2775_v36 = vsel %vm9654_vm3, %v8496_v49, %v2774_v39  ;;  %v5476_v25 = vpop.permute.xlu1 %5475  ;;  %6485 = vmatpush1.bf16.msra.mxu1 %v7117_v27  ;;  %v9675_v39 = vld [vmem:[#allocation11_spill] sm:$0xff] }
 0x320   : > { %2779 = vst [vmem:[#allocation2 + $0x1d8] sm:$0x33] %v2775_v36  ;;  %v2731_v53 = vsel %vm238_vm0, %v9655_v28, %v2728_v8  ;;  %v5479_v61 = vrot.slane %v5476_v25, 4  ;;  %6486 = vmatprep.subr.bf16.mxu1 %v7125_v51  ;;  %v9672_v51 = vld [vmem:[#allocation12_spill] sm:$0xff]  ;;  %v9676_v8 = vrot.slane %v9675_v39, 4 }
 0x321   : > { %v2732_v18 = vsel %vm9656_vm11, %v8479_v4, %v2731_v53  ;;  %v2812_v38 = vpop.permute.xlu0 %2811  ;;  %v9673_v33 = vrot.slane %v9672_v51, 4 }
 0x322   : > { %2736 = vst [vmem:[#allocation2 + $0x1c8] sm:$0xcc] %v2732_v18  ;;  %v5483_v49 = vsel %vm238_vm0, %v9657_v47, %v5479_v61  ;;  %v2815_v41 = vrot.slane %v2812_v38, 4  ;;  %v9677_v18 = vld [vmem:[#allocation14_spill] sm:$0xff] }
 0x323   : > { %v5484_v23 = vsel %vm9658_vm5, %v8525_v58, %v5483_v49  ;;  %v2638_v1 = vpop.permute.xlu1 %2637  ;;  %6487 = vmatpush2.bf16.msra.mxu1 %v7123_v55  ;;  %v9678_v38 = vrot.slane %v9677_v18, 4  ;;  %vm9704_vm5 = vcmask 138240  }
 0x324   : > { %5488 = vst [vmem:[#allocation2 + $0x3c8] sm:$0x33] %v5484_v23  ;;  %v2818_v30 = vsel %vm238_vm0, %v9660_v10, %v2815_v41  ;;  %v2641_v34 = vrot.slane %v2638_v1, 4  ;;  %v7137_v1 = vld [vmem:[#allocation2 + $0x18c] ss:$16 sps:$4 sm:$0xff]  }
 0x325   : > { %v2819_v4 = vsel %vm9661_vm7, %v9659_v37, %v2818_v30  ;;  %v2593_v22 = vpop.permute.xlu0 %2592  ;;  %v7120_v16 = vld [vmem:[#allocation2 + $0x1e8] ss:$16 sps:$4 sm:$0xff]   ;;  %v7122_v35 = vld [vmem:[#allocation2 + $0x1ec] ss:$16 sps:$4 sm:$0xff]  }
 0x326   : > { %2823 = vst [vmem:[#allocation2 + $0x1d8] sm:$0xcc] %v2819_v4  ;;  %v2644_v24 = vsel %vm238_vm0, %v9663_v48, %v2641_v34  ;;  %v2596_v58 = vrot.slane %v2593_v22, 4  ;;  %6445 = vmatprep.subr.bf16.mxu0 %v7122_v35  ;;  %v9680_v37 = vld [vmem:[#allocation13_spill] sm:$0xff] }
 0x327   : > { %v2645_v50 = vsel %vm9664_vm2, %v9662_v29, %v2644_v24  ;;  %v5345_v5 = vpop.permute.xlu1 %5344  ;;  %6446 = vmatpush2.bf16.msra.mxu0 %v7120_v16  ;;  %v9681_v10 = vrot.slane %v9680_v37, 4  ;;  %v9683_v16 = vrot.slane %v8635_v63, 4  ;;  %v7135_v48 = vld [vmem:[#allocation2 + $0x188] ss:$16 sps:$4 sm:$0xff]   ;;  %vm9714_vm2 = vcmask 171008  }
 0x328   : > { %2649 = vst [vmem:[#allocation2 + $0x1b8] sm:$0xcc] %v2645_v50  ;;  %v2600_v2 = vsel %vm238_vm0, %v9666_v44, %v2596_v58  ;;  %v5348_v45 = vrot.slane %v5345_v5, 4  ;;  %v7140_v50 = vld [vmem:[#allocation2 + $0x16c] ss:$16 sps:$4 sm:$0xff]  }
 0x329   : > { %v2601_v56 = vsel %vm2598_vm14, %v9665_v46, %v2600_v2  ;;  %v5301_v32 = vpop.permute.xlu0 %5300  ;;  %v9685_v5 = vld [vmem:[#allocation15_spill] sm:$0xff] }
 0x32a   : > { %2605 = vst [vmem:[#allocation2 + $0x1b8] sm:$0x33] %v2601_v56  ;;  %v5351_v3 = vsel %vm238_vm0, %v9668_v13, %v5348_v45  ;;  %v5304_v12 = vrot.slane %v5301_v32, 4  ;;  %v9686_v46 = vrot.slane %v9685_v5, 4  ;;  %v9688_v13 = vld [vmem:[#allocation18_spill] sm:$0xff] }
 0x32b   : > { %v5352_v6 = vsel %vm3034_vm8, %v9667_v26, %v5351_v3  ;;  %v5432_v31 = vpop.permute.xlu1 %5431  ;;  %v7126_v40 = vld [vmem:[#allocation2 + $0x3c8] ss:$16 sps:$4 sm:$0xff]   ;;  %v7128_v7 = vld [vmem:[#allocation2 + $0x3cc] ss:$16 sps:$4 sm:$0xff]   ;;  %vm9674_vm8 = vcmask 941056   ;;  %v9689_v3 = vrot.slane %v9688_v13, 4 }
 0x32c   : > { %5356 = vst [vmem:[#allocation2 + $0x3a8] sm:$0xcc] %v5352_v6  ;;  %v5307_v9 = vsel %vm238_vm0, %v9670_v11, %v5304_v12  ;;  %v5435_v42 = vrot.slane %v5432_v31, 4  ;;  %6488 = vmatprep.subr.bf16.mxu1 %v7128_v7  ;;  %v7138_v6 = vld [vmem:[#allocation2 + $0x168] ss:$16 sps:$4 sm:$0xff]  }
 0x32d   : > { %v5308_v15 = vsel %vm9671_vm6, %v9669_v52, %v5307_v9  ;;  %v5388_v14 = vpop.permute.xlu0 %5387  ;;  %v7129_v17 = vld [vmem:[#allocation2 + $0x1c8] ss:$16 sps:$4 sm:$0xff]   ;;  %v7131_v0 = vld [vmem:[#allocation2 + $0x1cc] ss:$16 sps:$4 sm:$0xff]   ;;  %6489 = vmatpush2.bf16.msra.mxu1 %v7126_v40  ;;  %vm9717_vm6 = vcmask 146432  }
 0x32e   : > { %5312 = vst [vmem:[#allocation2 + $0x3a8] sm:$0x33] %v5308_v15  ;;  %v5439_v60 = vsel %vm238_vm0, %v9673_v33, %v5435_v42  ;;  %v5391_v27 = vrot.slane %v5388_v14, 4  ;;  %6447 = vmatprep.subr.bf16.mxu0 %v7131_v0  ;;  %v7146_v7 = vld [vmem:[#allocation2 + $0x14c] ss:$16 sps:$4 sm:$0xff]  }
 0x32f   : > { %v5440_v19 = vsel %vm9674_vm8, %v9672_v51, %v5439_v60  ;;  %v5171_v62 = vpop.permute.xlu1 %5170  ;;  %6448 = vmatpush2.bf16.msra.mxu0 %v7129_v17  ;;  %v9690_v52 = vld [vmem:[#allocation17_spill] sm:$0xff]  ;;  %v9693_v17 = vld [vmem:[#allocation20_spill] sm:$0xff]  ;;  %vm9720_vm8 = vcmask 154624  }
 0x330   : > { %5444 = vst [vmem:[#allocation2 + $0x3b8] sm:$0xcc] %v5440_v19  ;;  %v5394_v36 = vsel %vm238_vm0, %v9676_v8, %v5391_v27  ;;  %v5174_v25 = vrot.slane %v5171_v62, 4  ;;  %v9691_v11 = vrot.slane %v9690_v52, 4  ;;  %v9694_v0 = vrot.slane %v9693_v17, 4 }
 0x331   : > { %v5395_v28 = vsel %vm3079_vm13, %v9675_v39, %v5394_v36  ;;  %v5127_v53 = vpop.permute.xlu0 %5126  ;;  %v7132_v61 = vld [vmem:[#allocation2 + $0x1a8] ss:$16 sps:$4 sm:$0xff]   ;;  %v7134_v55 = vld [vmem:[#allocation2 + $0x1ac] ss:$16 sps:$4 sm:$0xff]   ;;  %vm9682_vm13 = vmmov %vm9661_vm7  ;;  %vm9708_vm7 = vcmask 121856  }
 0x332   : > { %5399 = vst [vmem:[#allocation2 + $0x3b8] sm:$0x33] %v5395_v28  ;;  %v5177_v47 = vsel %vm238_vm0, %v9678_v38, %v5174_v25  ;;  %v5130_v49 = vrot.slane %v5127_v53, 4  ;;  %6449 = vmatprep.subr.bf16.mxu0 %v7134_v55  ;;  %v7144_v60 = vld [vmem:[#allocation2 + $0x148] ss:$16 sps:$4 sm:$0xff]  }
 0x333   : > { %v5178_v41 = vsel %vm9679_vm10, %v9677_v18, %v5177_v47  ;;  %v5258_v23 = vpop.permute.xlu1 %5257  ;;  %6450 = vmatpush2.bf16.msra.mxu0 %v7132_v61  ;;  %v7149_v62 = vld [vmem:[#allocation2 + $0x12c] ss:$16 sps:$4 sm:$0xff]   ;;  %v9699_v18 = vld [vmem:[#allocation22_spill] sm:$0xff]  ;;  %vm9725_vm10 = vcmask 326656  }
 0x334   : > { %5182 = vst [vmem:[#allocation2 + $0x388] sm:$0xcc] %v5178_v41  ;;  %v5133_v30 = vsel %vm238_vm0, %v9681_v10, %v5130_v49  ;;  %v5261_v34 = vrot.slane %v5258_v23, 4  ;;  %6451 = vmatprep.subr.bf16.mxu0 %v7137_v1  ;;  %v9696_v39 = vld [vmem:[#allocation19_spill] sm:$0xff]  ;;  %v9700_v38 = vrot.slane %v9699_v18, 4  ;;  %v9702_v10 = vld [vmem:[#allocation21_spill] sm:$0xff] }
 0x335   : > { %v5134_v4 = vsel %vm9682_vm13, %v9680_v37, %v5133_v30  ;;  %v5214_v22 = vpop.permute.xlu0 %5213  ;;  %v9697_v8 = vrot.slane %v9696_v39, 4  ;;  %v7147_v41 = vld [vmem:[#allocation2 + $0x128] ss:$16 sps:$4 sm:$0xff]   ;;  %v7155_v37 = vld [vmem:[#allocation2 + $0x10c] ss:$16 sps:$4 sm:$0xff]   ;;  %v9703_v30 = vrot.slane %v9702_v10, 4 }
 0x336   : > { %5138 = vst [vmem:[#allocation2 + $0x388] sm:$0x33] %v5134_v4  ;;  %v5264_v35 = vsel %vm238_vm0, %v9683_v16, %v5261_v34  ;;  %v5217_v29 = vrot.slane %v5214_v22, 4  ;;  %vm9728_vm13 = vcmask 310272  }
 0x337   : > { %v5265_v24 = vsel %vm9684_vm15, %v8635_v63, %v5264_v35  ;;  %v4996_v58 = vpop.permute.xlu1 %4995  ;;  %6452 = vmatpush2.bf16.msra.mxu0 %v7135_v48  ;;  %v9705_v35 = vrot.slane %v8740_v59, 4 }
 0x338   : > { %5269 = vst [vmem:[#allocation2 + $0x398] sm:$0xcc] %v5265_v24  ;;  %v5220_v44 = vsel %vm238_vm0, %v9686_v46, %v5217_v29  ;;  %v4999_v2 = vrot.slane %v4996_v58, 4  ;;  %6453 = vmatprep.subr.bf16.mxu0 %v7140_v50  ;;  %v7153_v24 = vld [vmem:[#allocation2 + $0x108] ss:$16 sps:$4 sm:$0xff]  }
 0x339   : > { %v5221_v45 = vsel %vm9687_vm9, %v9685_v5, %v5220_v44  ;;  %v4951_v56 = vpop.permute.xlu0 %4950  ;;  %v7141_v32 = vld [vmem:[#allocation2 + $0x3a8] ss:$16 sps:$4 sm:$0xff]   ;;  %v7143_v26 = vld [vmem:[#allocation2 + $0x3ac] ss:$16 sps:$4 sm:$0xff]  }
 0x33a   : > { %5225 = vst [vmem:[#allocation2 + $0x398] sm:$0x33] %v5221_v45  ;;  %v5003_v63 = vsel %vm238_vm0, %v9689_v3, %v4999_v2  ;;  %v4954_v12 = vrot.slane %v4951_v56, 4  ;;  %6490 = vmatprep.subr.bf16.mxu1 %v7143_v26  ;;  %v9706_v5 = vld [vmem:[#allocation23_spill] sm:$0xff] }
 0x33b   : > { %v5004_v31 = vsel %vm5001_vm1, %v9688_v13, %v5003_v63  ;;  %v5084_v40 = vpop.permute.xlu1 %5083  ;;  %6491 = vmatpush2.bf16.msra.mxu1 %v7141_v32  ;;  %6454 = vmatpush2.bf16.msra.mxu0 %v7138_v6  ;;  %vm9695_vm1 = vmmov %vm9654_vm3  ;;  %v9707_v46 = vrot.slane %v9706_v5, 4  ;;  %v9709_v13 = vrot.slane %v8763_v54, 4  ;;  %v9711_v6 = vld [vmem:[#allocation16_spill] sm:$0xff] }
 0x33c   : > { %5008 = vst [vmem:[#allocation2 + $0x368] sm:$0xcc] %v5004_v31  ;;  %v4958_v9 = vsel %vm238_vm0, %v9691_v11, %v4954_v12  ;;  %v5087_v42 = vrot.slane %v5084_v40, 4  ;;  %6455 = vmatprep.subr.bf16.mxu0 %v7146_v7  ;;  %vm9698_vm3 = vmmov %vm9656_vm11  ;;  %vm9701_vm11 = vcmask 130048   ;;  %v9712_v31 = vld [vmem:[#allocation24_spill] sm:$0xff] }
 0x33d   : > { %v4959_v15 = vsel %vm9692_vm12, %v9690_v52, %v4958_v9  ;;  %v5040_v14 = vpop.permute.xlu0 %5039  ;;  %v9713_v40 = vrot.slane %v9712_v31, 4 }
 0x33e   : > { %4963 = vst [vmem:[#allocation2 + $0x368] sm:$0x33] %v4959_v15  ;;  %v5090_v51 = vsel %vm238_vm0, %v9694_v0, %v5087_v42  ;;  %v5043_v33 = vrot.slane %v5040_v14, 4  ;;  %v9715_v42 = vld [vmem:[#allocation26_spill] sm:$0xff] }
 0x33f   : > { %v5091_v27 = vsel %vm9695_vm1, %v9693_v17, %v5090_v51  ;;  %v4821_v19 = vpop.permute.xlu1 %4820  ;;  %6456 = vmatpush2.bf16.msra.mxu0 %v7144_v60  ;;  %v9716_v15 = vrot.slane %v9715_v42, 4  ;;  %v9718_v51 = vld [vmem:[#allocation25_spill] sm:$0xff] }
 0x340   : > { %5095 = vst [vmem:[#allocation2 + $0x378] sm:$0xcc] %v5091_v27  ;;  %v5046_v36 = vsel %vm238_vm0, %v9697_v8, %v5043_v33  ;;  %v4824_v25 = vrot.slane %v4821_v19, 4  ;;  %6457 = vmatprep.subr.bf16.mxu0 %v7149_v62  ;;  %v9719_v33 = vrot.slane %v9718_v51, 4 }
 0x341   : > { %v5047_v28 = vsel %vm9698_vm3, %v9696_v39, %v5046_v36  ;;  %v4777_v53 = vpop.permute.xlu0 %4776  ;;  %v7150_v61 = vld [vmem:[#allocation2 + $0x388] ss:$16 sps:$4 sm:$0xff]   ;;  %v7152_v55 = vld [vmem:[#allocation2 + $0x38c] ss:$16 sps:$4 sm:$0xff]   ;;  %v9721_v36 = vld [vmem:[#allocation28_spill] sm:$0xff] }
 0x342   : > { %5051 = vst [vmem:[#allocation2 + $0x378] sm:$0x33] %v5047_v28  ;;  %v4827_v47 = vsel %vm238_vm0, %v9700_v38, %v4824_v25  ;;  %v4780_v49 = vrot.slane %v4777_v53, 4  ;;  %6492 = vmatprep.subr.bf16.mxu1 %v7152_v55  ;;  %v9722_v25 = vrot.slane %v9721_v36, 4 }
 0x343   : > { %v4828_v23 = vsel %vm9701_vm11, %v9699_v18, %v4827_v47  ;;  %v4908_v1 = vpop.permute.xlu1 %4907  ;;  %6493 = vmatpush2.bf16.msra.mxu1 %v7150_v61  ;;  %6458 = vmatpush2.bf16.msra.mxu0 %v7147_v41  ;;  %v9723_v18 = vld [vmem:[#allocation27_spill] sm:$0xff] }
 0x344   : > { %4832 = vst [vmem:[#allocation2 + $0x348] sm:$0xcc] %v4828_v23  ;;  %v4783_v34 = vsel %vm238_vm0, %v9703_v30, %v4780_v49  ;;  %v4911_v4 = vrot.slane %v4908_v1, 4  ;;  %6459 = vmatprep.subr.bf16.mxu0 %v7155_v37  ;;  %v9724_v38 = vrot.slane %v9723_v18, 4 }
 0x345   : > { %v4784_v22 = vsel %vm9704_vm5, %v9702_v10, %v4783_v34  ;;  %v4864_v16 = vpop.permute.xlu0 %4863  ;;  %v9727_v34 = vld [vmem:[#allocation29_spill] sm:$0xff] }
 0x346   : > { %4788 = vst [vmem:[#allocation2 + $0x348] sm:$0x33] %v4784_v22  ;;  %v4914_v29 = vsel %vm238_vm0, %v9705_v35, %v4911_v4  ;;  %v4867_v48 = vrot.slane %v4864_v16, 4 }
 0x347   : > { %v4915_v58 = vsel %vm2598_vm14, %v8740_v59, %v4914_v29  ;;  %v4647_v50 = vpop.permute.xlu1 %4646  ;;  %6460 = vmatpush2.bf16.msra.mxu0 %v7153_v24  ;;  %vm9710_vm14 = vcmask 162816  }
 0x348   : > { %4919 = vst [vmem:[#allocation2 + $0x358] sm:$0xcc] %v4915_v58  ;;  %v4870_v44 = vsel %vm238_vm0, %v9707_v46, %v4867_v48  ;;  %v4650_v2 = vrot.slane %v4647_v50, 4 }
 0x349   : > { %v4871_v45 = vsel %vm9708_vm7, %v9706_v5, %v4870_v44  ;;  %v4603_v56 = vpop.permute.xlu0 %4602  ;;  %v7156_v32 = vld [vmem:[#allocation2 + $0x368] ss:$16 sps:$4 sm:$0xff]   ;;  %v7158_v26 = vld [vmem:[#allocation2 + $0x36c] ss:$16 sps:$4 sm:$0xff]  }
 0x34a   : > { %4875 = vst [vmem:[#allocation2 + $0x358] sm:$0x33] %v4871_v45  ;;  %v4653_v3 = vsel %vm238_vm0, %v9709_v13, %v4650_v2  ;;  %v4606_v59 = vrot.slane %v4603_v56, 4  ;;  %6494 = vmatprep.subr.bf16.mxu1 %v7158_v26  ;;  %6462 = vmatmul.mubr.bf16.vlgmr.msra.gmra.mxu0 %v9711_v6 }
 0x34b   : > { %v4654_v63 = vsel %vm9710_vm14, %v8763_v54, %v4653_v3  ;;  %v4734_v12 = vpop.permute.xlu1 %4733  ;;  %6495 = vmatpush2.bf16.msra.mxu1 %v7156_v32 }
 0x34c   : > { %4658 = vst [vmem:[#allocation2 + $0x328] sm:$0xcc] %v4654_v63  ;;  %v4609_v7 = vsel %vm238_vm0, %v9713_v40, %v4606_v59  ;;  %v4737_v52 = vrot.slane %v4734_v12, 4 }
 0x34d   : > { %v4610_v11 = vsel %vm9714_vm2, %v9712_v31, %v4609_v7  ;;  %v4690_v9 = vpop.permute.xlu0 %4689 }
 0x34e   : > { %4614 = vst [vmem:[#allocation2 + $0x328] sm:$0x33] %v4610_v11  ;;  %v4740_v54 = vsel %vm238_vm0, %v9716_v15, %v4737_v52  ;;  %v4693_v14 = vrot.slane %v4690_v9, 4 }
 0x34f   : > { %v4741_v17 = vsel %vm9717_vm6, %v9715_v42, %v4740_v54  ;;  %v4471_v0 = vpop.permute.xlu1 %4470 }
 0x350   : > { %4745 = vst [vmem:[#allocation2 + $0x338] sm:$0xcc] %v4741_v17  ;;  %v4696_v60 = vsel %vm238_vm0, %v9719_v33, %v4693_v14  ;;  %v4474_v27 = vrot.slane %v4471_v0, 4 }
 0x351   : > { %v4697_v19 = vsel %vm9720_vm8, %v9718_v51, %v4696_v60  ;;  %v4427_v62 = vpop.permute.xlu0 %4426  ;;  %v7159_v39 = vld [vmem:[#allocation2 + $0x348] ss:$16 sps:$4 sm:$0xff]   ;;  %v7161_v8 = vld [vmem:[#allocation2 + $0x34c] ss:$16 sps:$4 sm:$0xff]  }
 0x352   : > { %4701 = vst [vmem:[#allocation2 + $0x338] sm:$0x33] %v4697_v19  ;;  %v4478_v28 = vsel %vm238_vm0, %v9722_v25, %v4474_v27  ;;  %v4430_v53 = vrot.slane %v4427_v62, 4  ;;  %6496 = vmatprep.subr.bf16.mxu1 %v7161_v8 }
 0x353   : > { %v4479_v61 = vsel %vm4476_vm4, %v9721_v36, %v4478_v28  ;;  %v4560_v55 = vpop.permute.xlu1 %4559  ;;  %6497 = vmatpush2.bf16.msra.mxu1 %v7159_v39  ;;  %vm9726_vm4 = vcmask 179200  }
 0x354   : > { %4483 = vst [vmem:[#allocation2 + $0x308] sm:$0xcc] %v4479_v61  ;;  %v4433_v47 = vsel %vm238_vm0, %v9724_v38, %v4430_v53  ;;  %v4563_v49 = vrot.slane %v4560_v55, 4 }
 0x355   : > { %v4434_v41 = vsel %vm9725_vm10, %v9723_v18, %v4433_v47  ;;  %v4515_v23 = vpop.permute.xlu0 %4514 }
 0x356   : > { %4438 = vst [vmem:[#allocation2 + $0x308] sm:$0x33] %v4434_v41  ;;  %v4566_v1 = vsel %vm238_vm0, %v4562_v20, %v4563_v49  ;;  %v4518_v37 = vrot.slane %v4515_v23, 4 }
 0x357   : > { %v4567_v10 = vsel %vm9726_vm4, %v8838_v43, %v4566_v1  ;;  %v6381_v30 = vpop.f32.mrf.mxu0 }
 0x358   : > { %4571 = vst [vmem:[#allocation2 + $0x318] sm:$0xcc] %v4567_v10  ;;  %v4522_v4 = vsel %vm238_vm0, %v4517_v57, %v4518_v37 }
 0x359   : > { %v4523_v22 = vsel %vm9728_vm13, %v9727_v34, %v4522_v4  ;;  %v7162_v16 = vld [vmem:[#allocation2 + $0x328] ss:$16 sps:$4 sm:$0xff]   ;;  %v7164_v35 = vld [vmem:[#allocation2 + $0x32c] ss:$16 sps:$4 sm:$0xff]   ;;  %v6383_v29 = vpop.f32.mrf.mxu0 }
 0x35a   : > { %4527 = vst [vmem:[#allocation2 + $0x318] sm:$0x33] %v4523_v22  ;;  %6498 = vmatprep.subr.bf16.mxu1 %v7164_v35 }
 0x35b   : > { %v6385_v20 = vpop.f32.mrf.mxu0  ;;  %6499 = vmatpush2.bf16.msra.mxu1 %v7162_v16 }
 0x35d   : > { %v6386_v48 = vpop.f32.mrf.mxu0 }
 0x361   : > { %v7165_v24 = vld [vmem:[#allocation2 + $0x308] ss:$16 sps:$4 sm:$0xff]   ;;  %v7167_v43 = vld [vmem:[#allocation2 + $0x30c] ss:$16 sps:$4 sm:$0xff]  }
 0x362   : > { %6500 = vmatprep.subr.bf16.mxu1 %v7167_v43 }
 0x363   : > { %6501 = vmatpush2.bf16.msra.mxu1 %v7165_v24 }
 0x366   : > { %6503 = vmatmul.mubr.bf16.vlgmr.msra.gmra.mxu1 %v8895_v21 }
 0x3a2   : > { %v6422_v57 = vpop.f32.mrf.mxu1 }
 0x3a3   : > { %v6423_v58 = vadd.f32 %v6422_v57, %v6381_v30 }
 0x3a4   : > { %v6424_v50 = vpop.f32.mrf.mxu1 }
 0x3a5   : > { %6511 = vst [vmem:[%s179_s29] sm:$0xff] %v6423_v58  ;;  %v6425_v5 = vadd.f32 %v6424_v50, %v6383_v29 }
 0x3a6   : > { %v6426_v46 = vpop.f32.mrf.mxu1 }
 0x3a7   : > { %6512 = vst [vmem:[%s179_s29 + $0x8] sm:$0xff] %v6425_v5 }
 0x3a8   : > { %v6427_v44 = vpop.f32.mrf.mxu1 }
 0x40a   : > { %v6463_v2 = vpop.f32.mrf.mxu0 }
 0x40c   : > { %v6465_v45 = vpop.f32.mrf.mxu0 }
 0x40e   : > { %v6467_v56 = vpop.f32.mrf.mxu0 }
 0x410   : > { %v6468_v32 = vpop.f32.mrf.mxu0 }
 0x426   : > { %v6504_v26 = vpop.f32.mrf.mxu1 }
 0x427   : > { %v6505_v13 = vadd.f32 %v6504_v26, %v6463_v2 }
 0x428   : > { %v6506_v21 = vpop.f32.mrf.mxu1 }
 0x429   : > { %6513 = vst [vmem:[%s179_s29 + $0x10] sm:$0xff] %v6505_v13  ;;  %v6507_v3 = vadd.f32 %v6506_v21, %v6465_v45 }
 0x42a   : > { %v6508_v59 = vpop.f32.mrf.mxu1 }
 0x42b   : > { %6514 = vst [vmem:[%s179_s29 + $0x18] sm:$0xff] %v6507_v3 }
 0x42c   : > { %v6509_v63 = vpop.f32.mrf.mxu1 }
 0x42d PF: > { %s9729_s9 = sld [smem:[#allocation4_spill]] }
 0x42e   : > { %s9731_s10 = sld [smem:[#allocation5_spill]] }
 0x433   : > { %s12_s11 = sadd.s32 1, %s9729_s9   ;;  %s9730_s9 = sld [smem:[#allocation3_spill]] }
 0x434   : > { %p9_p5 = scmp.ge.s32.totalorder %s12_s11, 4  }
 0x436   :  { %11 = sbr.rel (!%p9_p5) target bundleno = 2 (0x2), region = 58 }

</bundles_post_ra>
